<compile_context>
chip_gen: v5e
topology: v5e:2x2
jax: 0.10.0
libtpu: 0.0.40
codegen_flags: <defaults>
</compile_context>

<pallas_src>
import functools

import jax
import jax.numpy as jnp
from jax import lax
from jax.experimental import pallas as pl
from jax.experimental.pallas import tpu as pltpu


LAYER_KEYS = ("ln1_g", "ln1_b", "wqkv", "wo", "bo",
              "ln2_g", "ln2_b", "w1", "b1", "w2", "b2")


def _round_up(x, m):
    return (x + m - 1) // m * m


# ----------------------------- in-kernel math helpers ------------------------

def _gelu_exact(x):
    # PyTorch nn.GELU() default = exact erf-based gelu (kept for semantics;
    # tanh-approx would shift a few VALU ops to the EUP on v5e).
    return 0.5 * x * (1.0 + lax.erf(x * 0.7071067811865476))


def _masked_layernorm(x, g, b, d_true, d_pad, eps=1e-5):
    """LayerNorm over the first d_true lanes of a zero-padded d_pad-wide tensor.

    Requires: padded lanes of x are exactly 0 and g/b are zero-padded, so the
    padded lanes of the result are exactly 0 again (keeps residuals exact).
    """
    mu = jnp.sum(x, axis=-1, keepdims=True) * (1.0 / d_true)
    xc = x - mu
    var = (jnp.sum(xc * xc, axis=-1, keepdims=True)
           - float(d_pad - d_true) * (mu * mu)) * (1.0 / d_true)
    return xc * lax.rsqrt(var + eps) * g + b


# ----------------------------- fused ViT kernel -------------------------------

def _vit_kernel(patches_ref, pw_ref, pb_ref, clspos_ref,
                maskk_ref, maskv_ref, kbias_ref,
                ln1g_ref, ln1b_ref, wqkv_ref, wo_ref, bo_ref,
                ln2g_ref, ln2b_ref, w1_ref, b1_ref, w2_ref, b2_ref,
                hg_ref, hb_ref, hw_ref, hbias_ref,
                latents_ref, pred_ref,
                x_scr,
                *, batch, n_patches, s_pad, d_true, d_pad, heads, dim_head):
    d = pl.program_id(0)
    inner = heads * dim_head
    scale = dim_head ** -0.5
    bf16 = jnp.bfloat16

    # ---- grid step 0: fused patch-embedding + cls token + positional emb ----
    @pl.when(d == 0)
    def _():
        emb = jnp.dot(patches_ref[...].astype(bf16), pw_ref[...],
                      preferred_element_type=jnp.float32) + pb_ref[...]  # (B*N, Dp)
        clspos = clspos_ref[...]
        tail = s_pad - n_patches - 1
        rows = []
        for b in range(batch):
            rows.append(clspos[0:1, :])                                   # cls + pos[0]
            rows.append(emb[b * n_patches:(b + 1) * n_patches, :]
                        + clspos[1:n_patches + 1, :])
            if tail:
                rows.append(jnp.zeros((tail, d_pad), jnp.float32))        # padded tokens
        x_scr[...] = jnp.concatenate(rows, axis=0)                        # (B*Sp, Dp)

    x = x_scr[...]                                                        # f32, resident

    # ---- PreNorm multi-head self-attention (all heads in one contraction) ----
    xn = _masked_layernorm(x, ln1g_ref[0], ln1b_ref[0], d_true, d_pad)
    qkv = jnp.dot(xn.astype(bf16), wqkv_ref[0],
                  preferred_element_type=jnp.float32)                     # (B*Sp, 3*inner)

    mask_k = maskk_ref[...]      # (inner, H*Sp)  block-diagonal head selector for K^T
    mask_v = maskv_ref[...]      # (H*Sp, inner)  block-diagonal head selector for V
    key_bias = kbias_ref[...]    # (1, H*Sp)      -1e30 on padded key slots

    attn_rows = []
    for b in range(batch):       # static, tiny; all big matmuls are batch-merged
        r0 = b * s_pad
        qb = qkv[r0:r0 + s_pad, 0 * inner:1 * inner]                      # (Sp, inner)
        kb = qkv[r0:r0 + s_pad, 1 * inner:2 * inner]
        vb = qkv[r0:r0 + s_pad, 2 * inner:3 * inner]
        # Block-diagonal K^T: column block h holds k_h^T, so a single
        # (Sp,inner)@(inner,H*Sp) matmul yields every head's q_h@k_h^T side by
        # side (lane-dense scores, one MXU push sequence instead of H).
        kbd = jnp.concatenate([kb.T] * heads, axis=1) * mask_k            # (inner, H*Sp)
        s_all = jnp.dot(qb, kbd, preferred_element_type=jnp.float32) * scale + key_bias
        s_all = s_all - jnp.max(s_all, axis=-1, keepdims=True)            # row max (softmax-safe)
        p = jnp.exp(s_all)                                                # (Sp, H*Sp) f32
        # Block-diagonal V: one (Sp,H*Sp)@(H*Sp,inner) matmul produces the
        # heads already concatenated -> feeds the wo projection directly.
        vbd = jnp.concatenate([vb] * heads, axis=0) * mask_v              # (H*Sp, inner)
        num = jnp.dot(p, vbd, preferred_element_type=jnp.float32)         # (Sp, inner)
        den = jnp.dot(p, mask_v, preferred_element_type=jnp.float32)      # per-head softmax sums
        den = jnp.maximum(den, 1e-30)                                     # underflow guard
        attn_rows.append(num * pl.reciprocal(den, approx=True))
    attn = jnp.concatenate(attn_rows, axis=0)                             # (B*Sp, inner)
    x = x + jnp.dot(attn.astype(bf16), wo_ref[0],
                    preferred_element_type=jnp.float32) + bo_ref[0]

    # ---- PreNorm MLP: Linear -> GELU (exact erf) -> Linear ----
    xn2 = _masked_layernorm(x, ln2g_ref[0], ln2b_ref[0], d_true, d_pad)
    h1 = jnp.dot(xn2.astype(bf16), w1_ref[0],
                 preferred_element_type=jnp.float32) + b1_ref[0]
    h1 = _gelu_exact(h1)
    x = x + jnp.dot(h1.astype(bf16), w2_ref[0],
                    preferred_element_type=jnp.float32) + b2_ref[0]

    x_scr[...] = x
    latents_ref[...] = x          # resident output block, flushed to HBM once

    # ---- last grid step: fused cls-pool + LayerNorm + classification head ----
    @pl.when(d == pl.num_programs(0) - 1)
    def _():
        cls = jnp.concatenate(
            [x[b * s_pad:b * s_pad + 1, :] for b in range(batch)], axis=0)  # (B, Dp)
        clsn = _masked_layernorm(cls, hg_ref[...], hb_ref[...], d_true, d_pad)
        pred_ref[...] = (jnp.dot(clsn.astype(bf16), hw_ref[...],
                                 preferred_element_type=jnp.float32)
                         + hbias_ref[...])


# ----------------------------- parameter handling ----------------------------

def init_params(key, *, channels, patch, dim, depth, heads, dim_head, mlp_dim,
                num_patches, num_classes):
    patch_dim = channels * patch * patch
    inner = heads * dim_head
    keys = iter(jax.random.split(key, 8 + depth * 4))
    w = lambda shape: jax.random.normal(next(keys), shape, jnp.float32) * 0.02

    params = {
        "patch_w": w((patch_dim, dim)),
        "patch_b": jnp.zeros((dim,), jnp.float32),
        "cls_token": w((1, 1, dim)),
        "pos_emb": w((1, num_patches + 1, dim)),
        "head_ln_g": jnp.ones((dim,), jnp.float32),
        "head_ln_b": jnp.zeros((dim,), jnp.float32),
        "head_w": w((dim, num_classes)),
        "head_b": jnp.zeros((num_classes,), jnp.float32),
        "layers": [],
    }
    for _ in range(depth):
        params["layers"].append({
            "ln1_g": jnp.ones((dim,), jnp.float32),
            "ln1_b": jnp.zeros((dim,), jnp.float32),
            "wqkv": w((dim, 3 * inner)),
            "wo": w((inner, dim)),
            "bo": jnp.zeros((dim,), jnp.float32),
            "ln2_g": jnp.ones((dim,), jnp.float32),
            "ln2_b": jnp.zeros((dim,), jnp.float32),
            "w1": w((dim, mlp_dim)),
            "b1": jnp.zeros((mlp_dim,), jnp.float32),
            "w2": w((mlp_dim, dim)),
            "b2": jnp.zeros((dim,), jnp.float32),
        })
    return params


def pack_params(params, cfg):
    """Pad to lane-dense shapes, cast matmul weights to bf16, stack over depth."""
    dim = cfg["dim"]
    d_pad, m_pad, c_pad = cfg["d_pad"], cfg["m_pad"], cfg["c_pad"]
    pd_pad, s_pad = cfg["pd_pad"], cfg["s_pad"]
    heads, dim_head = cfg["heads"], cfg["dim_head"]
    inner = heads * dim_head
    n_tok = cfg["num_patches"] + 1

    def padw(w, rows, cols):   # zero-pad 2-D weight, bf16 for the MXU
        return jnp.pad(w, ((0, rows - w.shape[0]), (0, cols - w.shape[1]))
                       ).astype(jnp.bfloat16)

    def padv(v, cols):         # zero-pad 1-D bias / LN param -> (1, cols) f32
        return jnp.pad(v, (0, cols - v.shape[0])).reshape(1, cols).astype(jnp.float32)

    packed = {
        "patch_w": padw(params["patch_w"], pd_pad, d_pad),
        "patch_b": padv(params["patch_b"], d_pad),
        "head_ln_g": padv(params["head_ln_g"], d_pad),
        "head_ln_b": padv(params["head_ln_b"], d_pad),
        "head_w": padw(params["head_w"], d_pad, c_pad),
        "head_b": padv(params["head_b"], c_pad),
    }

    # cls token folded into row 0 of the positional table (zero-padded)
    tbl = params["pos_emb"][0, :n_tok].at[0].add(params["cls_token"][0, 0])
    packed["cls_pos"] = jnp.pad(
        tbl, ((0, s_pad - n_tok), (0, d_pad - dim))).astype(jnp.float32)

    # per-layer params stacked on a leading depth axis (one pallas_call total)
    def stack(name, fn):
        return jnp.stack([fn(lp[name]) for lp in params["layers"]], axis=0)

    packed["ln1_g"] = stack("ln1_g", lambda v: padv(v, d_pad))
    packed["ln1_b"] = stack("ln1_b", lambda v: padv(v, d_pad))
    packed["wqkv"] = stack("wqkv", lambda w: padw(w, d_pad, 3 * inner))
    packed["wo"] = stack("wo", lambda w: padw(w, inner, d_pad))
    packed["bo"] = stack("bo", lambda v: padv(v, d_pad))
    packed["ln2_g"] = stack("ln2_g", lambda v: padv(v, d_pad))
    packed["ln2_b"] = stack("ln2_b", lambda v: padv(v, d_pad))
    packed["w1"] = stack("w1", lambda w: padw(w, d_pad, m_pad))
    packed["b1"] = stack("b1", lambda v: padv(v, m_pad))
    packed["w2"] = stack("w2", lambda w: padw(w, m_pad, d_pad))
    packed["b2"] = stack("b2", lambda v: padv(v, d_pad))

    # attention head-batching constants: block-diagonal selectors + key-pad bias
    hs = heads * s_pad
    row = jnp.arange(inner)[:, None]
    col = jnp.arange(hs)[None, :]
    mask_k = ((row // dim_head) == (col // s_pad)).astype(jnp.float32)   # (inner, hs)
    packed["mask_k"] = mask_k
    packed["mask_v"] = mask_k.T                                          # (hs, inner)
    packed["key_bias"] = jnp.where((jnp.arange(hs) % s_pad) < n_tok,
                                   0.0, -1e30).astype(jnp.float32)[None, :]
    return packed


# ----------------------------- Extractor forward ------------------------------

def _const_spec(shape):
    zeros = (0,) * len(shape)
    return pl.BlockSpec(shape, lambda d, _z=zeros: _z)


def _layer_spec(shape):
    block = (1,) + tuple(shape[1:])
    zeros = (0,) * (len(shape) - 1)
    return pl.BlockSpec(block, lambda d, _z=zeros: (d,) + _z)


def extractor_forward(img, packed, cfg, return_embeddings_only=False):
    """Equivalent of Extractor.forward(img): returns (pred, latents)."""
    B, C, H, W = img.shape
    p = cfg["patch"]
    hn, wn = H // p, W // p
    n = hn * wn
    patch_dim = C * p * p
    d_pad, pd_pad, s_pad = cfg["d_pad"], cfg["pd_pad"], cfg["s_pad"]
    s_true = n + 1

    # 'b c (h p1) (w p2) -> (b h w) (p1 p2 c)'  (layout glue, plain JAX)
    x = img.reshape(B, C, hn, p, wn, p)
    x = jnp.transpose(x, (0, 2, 4, 3, 5, 1)).reshape(B * n, patch_dim)
    patches = jnp.pad(x, ((0, 0), (0, pd_pad - patch_dim)))

    const_inputs = [patches, packed["patch_w"], packed["patch_b"],
                    packed["cls_pos"], packed["mask_k"], packed["mask_v"],
                    packed["key_bias"]]
    layer_inputs = [packed[k] for k in LAYER_KEYS]
    head_inputs = [packed["head_ln_g"], packed["head_ln_b"],
                   packed["head_w"], packed["head_b"]]

    kernel = functools.partial(
        _vit_kernel, batch=B, n_patches=n, s_pad=s_pad,
        d_true=cfg["dim"], d_pad=d_pad,
        heads=cfg["heads"], dim_head=cfg["dim_head"])

    latents_pad, pred_pad = pl.pallas_call(
        kernel,
        out_shape=(jax.ShapeDtypeStruct((B * s_pad, d_pad), jnp.float32),
                   jax.ShapeDtypeStruct((B, cfg["c_pad"]), jnp.float32)),
        grid_spec=pltpu.PrefetchScalarGridSpec(
            num_scalar_prefetch=0,
            grid=(cfg["depth"],),
            in_specs=([_const_spec(a.shape) for a in const_inputs]
                      + [_layer_spec(a.shape) for a in layer_inputs]
                      + [_const_spec(a.shape) for a in head_inputs]),
            out_specs=(pl.BlockSpec((B * s_pad, d_pad), lambda d: (0, 0)),
                       pl.BlockSpec((B, cfg["c_pad"]), lambda d: (0, 0))),
            scratch_shapes=[pltpu.VMEM((B * s_pad, d_pad), jnp.float32)],
        ),
        # Depth carries the token state -> 'arbitrary'.
        # TODO(synk): for v7x (2 TCs) with larger batch / real ViT dims, add a
        # leading 'parallel' batch-tile grid axis and tile the mlp/K axis so
        # double-buffered weights stay under the 64 MiB VMEM budget.
        compiler_params=pltpu.CompilerParams(dimension_semantics=("arbitrary",)),
    )(*const_inputs, *layer_inputs, *head_inputs)

    latents = latents_pad.reshape(B, s_pad, d_pad)[:, :s_true, :cfg["dim"]]
    pred = pred_pad[:, :cfg["num_classes"]]

    # TODO(synk): PyTorch hook / .clone().detach() / .to(device) are framework
    # mechanics with no compute; latents is returned directly.
    if return_embeddings_only:
        return latents
    return pred, latents


# ----------------------------- main -------------------------------------------

if __name__ == "__main__":
    # Small ViT config (same logical sizes as before).
    B, C, HW = 2, 3, 16
    PATCH = 4
    DIM, DEPTH, HEADS, DIM_HEAD, MLP_DIM = 32, 2, 4, 8, 64
    NUM_CLASSES = 10
    NUM_PATCHES = (HW // PATCH) * (HW // PATCH)

    cfg = dict(
        patch=PATCH, dim=DIM, depth=DEPTH, heads=HEADS, dim_head=DIM_HEAD,
        mlp_dim=MLP_DIM, num_classes=NUM_CLASSES, num_patches=NUM_PATCHES,
        # lane-/sublane-padded sizes used inside the kernel
        d_pad=_round_up(DIM, 128),
        m_pad=_round_up(MLP_DIM, 128),
        c_pad=_round_up(NUM_CLASSES, 128),
        pd_pad=_round_up(C * PATCH * PATCH, 128),
        s_pad=_round_up(NUM_PATCHES + 1, 32),
    )

    key = jax.random.PRNGKey(0)
    k_img, k_par = jax.random.split(key)
    img = jax.random.normal(k_img, (B, C, HW, HW), dtype=jnp.float32)

    params = init_params(
        k_par, channels=C, patch=PATCH, dim=DIM, depth=DEPTH, heads=HEADS,
        dim_head=DIM_HEAD, mlp_dim=MLP_DIM, num_patches=NUM_PATCHES,
        num_classes=NUM_CLASSES)
    packed = pack_params(params, cfg)

    fwd = jax.jit(lambda im, pk: extractor_forward(im, pk, cfg))
    pred, latents = fwd(img, packed)
    jax.block_until_ready((pred, latents))

    assert pred.shape == (B, NUM_CLASSES)
    assert latents.shape == (B, NUM_PATCHES + 1, DIM)
    assert bool(jnp.all(jnp.isfinite(pred))) and bool(jnp.all(jnp.isfinite(latents)))
    print("KERNEL_OK")
</pallas_src>

<mosaic_0001>
module attributes {stable_mosaic.version = 11 : i64} {
  func.func @_vit_kernel(%arg0: i32, %arg1: memref<32x128xf32, #tpu.memory_space<vmem>>, %arg2: memref<128x128xbf16, #tpu.memory_space<vmem>>, %arg3: memref<1x128xf32, #tpu.memory_space<vmem>>, %arg4: memref<32x128xf32, #tpu.memory_space<vmem>>, %arg5: memref<32x128xf32, #tpu.memory_space<vmem>>, %arg6: memref<128x32xf32, #tpu.memory_space<vmem>>, %arg7: memref<1x128xf32, #tpu.memory_space<vmem>>, %arg8: memref<1x1x128xf32, #tpu.memory_space<vmem>>, %arg9: memref<1x1x128xf32, #tpu.memory_space<vmem>>, %arg10: memref<1x128x96xbf16, #tpu.memory_space<vmem>>, %arg11: memref<1x32x128xbf16, #tpu.memory_space<vmem>>, %arg12: memref<1x1x128xf32, #tpu.memory_space<vmem>>, %arg13: memref<1x1x128xf32, #tpu.memory_space<vmem>>, %arg14: memref<1x1x128xf32, #tpu.memory_space<vmem>>, %arg15: memref<1x128x128xbf16, #tpu.memory_space<vmem>>, %arg16: memref<1x1x128xf32, #tpu.memory_space<vmem>>, %arg17: memref<1x128x128xbf16, #tpu.memory_space<vmem>>, %arg18: memref<1x1x128xf32, #tpu.memory_space<vmem>>, %arg19: memref<1x128xf32, #tpu.memory_space<vmem>>, %arg20: memref<1x128xf32, #tpu.memory_space<vmem>>, %arg21: memref<128x128xbf16, #tpu.memory_space<vmem>>, %arg22: memref<1x128xf32, #tpu.memory_space<vmem>>, %arg23: memref<64x128xf32, #tpu.memory_space<vmem>>, %arg24: memref<2x128xf32, #tpu.memory_space<vmem>>, %arg25: memref<64x128xf32, #tpu.memory_space<vmem>>) attributes {dimension_semantics = [#tpu.dimension_semantics<arbitrary>], iteration_bounds = array<i64: 2>, scalar_prefetch = 0 : i64, scratch_operands = 1 : i64, tpu.core_type = #tpu.core_type<tc>, window_params = [{pipeline_mode = #tpu.pipeline_mode<synchronous>, transform_indices = @transform_0, window_bounds = array<i64: 32, 128>}, {pipeline_mode = #tpu.pipeline_mode<synchronous>, transform_indices = @transform_1, window_bounds = array<i64: 128, 128>}, {pipeline_mode = #tpu.pipeline_mode<synchronous>, transform_indices = @transform_2, window_bounds = array<i64: 1, 128>}, {pipeline_mode = #tpu.pipeline_mode<synchronous>, transform_indices = @transform_3, window_bounds = array<i64: 32, 128>}, {pipeline_mode = #tpu.pipeline_mode<synchronous>, transform_indices = @transform_4, window_bounds = array<i64: 32, 128>}, {pipeline_mode = #tpu.pipeline_mode<synchronous>, transform_indices = @transform_5, window_bounds = array<i64: 128, 32>}, {pipeline_mode = #tpu.pipeline_mode<synchronous>, transform_indices = @transform_6, window_bounds = array<i64: 1, 128>}, {transform_indices = @transform_7, window_bounds = array<i64: 1, 1, 128>}, {transform_indices = @transform_8, window_bounds = array<i64: 1, 1, 128>}, {transform_indices = @transform_9, window_bounds = array<i64: 1, 128, 96>}, {transform_indices = @transform_10, window_bounds = array<i64: 1, 32, 128>}, {transform_indices = @transform_11, window_bounds = array<i64: 1, 1, 128>}, {transform_indices = @transform_12, window_bounds = array<i64: 1, 1, 128>}, {transform_indices = @transform_13, window_bounds = array<i64: 1, 1, 128>}, {transform_indices = @transform_14, window_bounds = array<i64: 1, 128, 128>}, {transform_indices = @transform_15, window_bounds = array<i64: 1, 1, 128>}, {transform_indices = @transform_16, window_bounds = array<i64: 1, 128, 128>}, {transform_indices = @transform_17, window_bounds = array<i64: 1, 1, 128>}, {pipeline_mode = #tpu.pipeline_mode<synchronous>, transform_indices = @transform_18, window_bounds = array<i64: 1, 128>}, {pipeline_mode = #tpu.pipeline_mode<synchronous>, transform_indices = @transform_19, window_bounds = array<i64: 1, 128>}, {pipeline_mode = #tpu.pipeline_mode<synchronous>, transform_indices = @transform_20, window_bounds = array<i64: 128, 128>}, {pipeline_mode = #tpu.pipeline_mode<synchronous>, transform_indices = @transform_21, window_bounds = array<i64: 1, 128>}, {pipeline_mode = #tpu.pipeline_mode<synchronous>, transform_indices = @transform_22, window_bounds = array<i64: 64, 128>}, {pipeline_mode = #tpu.pipeline_mode<synchronous>, transform_indices = @transform_23, window_bounds = array<i64: 2, 128>}]} {
    %c0_i32 = arith.constant 0 : i32
    %0 = arith.cmpi eq, %arg0, %c0_i32 : i32
    %1 = arith.extui %0 : i1 to i32
    %c0_i32_0 = arith.constant 0 : i32
    %2 = arith.cmpi ne, %1, %c0_i32_0 : i32
    scf.if %2 {
      %c0_76 = arith.constant 0 : index
      %c0_77 = arith.constant 0 : index
      %155 = vector.load %arg1[%c0_76, %c0_77] : memref<32x128xf32, #tpu.memory_space<vmem>>, vector<32x128xf32>
      %156 = arith.truncf %155 : vector<32x128xf32> to vector<32x128xbf16>
      %c0_78 = arith.constant 0 : index
      %c0_79 = arith.constant 0 : index
      %157 = vector.load %arg2[%c0_78, %c0_79] : memref<128x128xbf16, #tpu.memory_space<vmem>>, vector<128x128xbf16>
      %cst_80 = arith.constant dense<0.000000e+00> : vector<32x128xf32>
      %158 = tpu.matmul %156, %157, %cst_80 {dimension_numbers = #tpu.dot_dimension_numbers<[1], [0], [0], [1], [0, 0, 1, 1], [], []>} : vector<32x128xbf16>, vector<128x128xbf16>, vector<32x128xf32> -> vector<32x128xf32>
      %c0_81 = arith.constant 0 : index
      %c0_82 = arith.constant 0 : index
      %159 = vector.load %arg3[%c0_81, %c0_82] : memref<1x128xf32, #tpu.memory_space<vmem>>, vector<1x128xf32>
      %160 = vector.broadcast %159 : vector<1x128xf32> to vector<32x128xf32>
      %161 = arith.addf %158, %160 : vector<32x128xf32>
      %c0_83 = arith.constant 0 : index
      %c0_84 = arith.constant 0 : index
      %162 = vector.load %arg4[%c0_83, %c0_84] : memref<32x128xf32, #tpu.memory_space<vmem>>, vector<32x128xf32>
      %163 = vector.extract_strided_slice %162 {offsets = [0, 0], sizes = [1, 128], strides = [1, 1]} : vector<32x128xf32> to vector<1x128xf32>
      %164 = vector.extract_strided_slice %161 {offsets = [0, 0], sizes = [16, 128], strides = [1, 1]} : vector<32x128xf32> to vector<16x128xf32>
      %165 = vector.extract_strided_slice %162 {offsets = [1, 0], sizes = [16, 128], strides = [1, 1]} : vector<32x128xf32> to vector<16x128xf32>
      %166 = arith.addf %164, %165 : vector<16x128xf32>
      %cst_85 = arith.constant 0.000000e+00 : f32
      %167 = vector.broadcast %cst_85 : f32 to vector<15x128xf32>
      %168 = vector.extract_strided_slice %162 {offsets = [0, 0], sizes = [1, 128], strides = [1, 1]} : vector<32x128xf32> to vector<1x128xf32>
      %169 = vector.extract_strided_slice %161 {offsets = [16, 0], sizes = [16, 128], strides = [1, 1]} : vector<32x128xf32> to vector<16x128xf32>
      %170 = vector.extract_strided_slice %162 {offsets = [1, 0], sizes = [16, 128], strides = [1, 1]} : vector<32x128xf32> to vector<16x128xf32>
      %171 = arith.addf %169, %170 : vector<16x128xf32>
      %cst_86 = arith.constant 0.000000e+00 : f32
      %172 = vector.broadcast %cst_86 : f32 to vector<15x128xf32>
      %173 = tpu.concatenate %163, %166, %167, %168, %171, %172 in 0 : vector<1x128xf32>, vector<16x128xf32>, vector<15x128xf32>, vector<1x128xf32>, vector<16x128xf32>, vector<15x128xf32> -> vector<64x128xf32>
      %c0_87 = arith.constant 0 : index
      %c0_88 = arith.constant 0 : index
      %174 = vector.load %arg25[%c0_87, %c0_88] : memref<64x128xf32, #tpu.memory_space<vmem>>, vector<64x128xf32>
      tpu.vector_store %arg25[%c0_87, %c0_88], %173 {strides = array<i32>} : memref<64x128xf32, #tpu.memory_space<vmem>>, vector<64x128xf32>,
    } else {
    }
    %c0 = arith.constant 0 : index
    %c0_1 = arith.constant 0 : index
    %3 = vector.load %arg25[%c0, %c0_1] : memref<64x128xf32, #tpu.memory_space<vmem>>, vector<64x128xf32>
    %c0_2 = arith.constant 0 : index
    %c0_3 = arith.constant 0 : index
    %c0_4 = arith.constant 0 : index
    %4 = vector.load %arg8[%c0_2, %c0_3, %c0_4] : memref<1x1x128xf32, #tpu.memory_space<vmem>>, vector<1x1x128xf32>
    %5 = vector.shape_cast %4 : vector<1x1x128xf32> to vector<1x128xf32>
    %c0_5 = arith.constant 0 : index
    %c0_6 = arith.constant 0 : index
    %c0_7 = arith.constant 0 : index
    %6 = vector.load %arg9[%c0_5, %c0_6, %c0_7] : memref<1x1x128xf32, #tpu.memory_space<vmem>>, vector<1x1x128xf32>
    %7 = vector.shape_cast %6 : vector<1x1x128xf32> to vector<1x128xf32>
    %cst = arith.constant dense<0.000000e+00> : vector<64xf32>
    %8 = vector.multi_reduction <add>, %3, %cst [1] : vector<64x128xf32> to vector<64xf32>
    %9 = vector.shape_cast %8 : vector<64xf32> to vector<64x1xf32>
    %cst_8 = arith.constant 3.125000e-02 : f32
    %10 = vector.broadcast %cst_8 : f32 to vector<64x1xf32>
    %11 = arith.mulf %9, %10 : vector<64x1xf32>
    %12 = vector.broadcast %11 : vector<64x1xf32> to vector<64x128xf32>
    %13 = arith.subf %3, %12 : vector<64x128xf32>
    %14 = arith.mulf %13, %13 : vector<64x128xf32>
    %cst_9 = arith.constant dense<0.000000e+00> : vector<64xf32>
    %15 = vector.multi_reduction <add>, %14, %cst_9 [1] : vector<64x128xf32> to vector<64xf32>
    %16 = vector.shape_cast %15 : vector<64xf32> to vector<64x1xf32>
    %17 = arith.mulf %11, %11 : vector<64x1xf32>
    %cst_10 = arith.constant 9.600000e+01 : f32
    %18 = vector.broadcast %cst_10 : f32 to vector<64x1xf32>
    %19 = arith.mulf %18, %17 : vector<64x1xf32>
    %20 = arith.subf %16, %19 : vector<64x1xf32>
    %cst_11 = arith.constant 3.125000e-02 : f32
    %21 = vector.broadcast %cst_11 : f32 to vector<64x1xf32>
    %22 = arith.mulf %20, %21 : vector<64x1xf32>
    %cst_12 = arith.constant 9.99999974E-6 : f32
    %23 = vector.broadcast %cst_12 : f32 to vector<64x1xf32>
    %24 = arith.addf %22, %23 : vector<64x1xf32>
    %25 = math.rsqrt %24 : vector<64x1xf32>
    %26 = vector.broadcast %25 : vector<64x1xf32> to vector<64x128xf32>
    %27 = arith.mulf %13, %26 : vector<64x128xf32>
    %28 = vector.broadcast %5 : vector<1x128xf32> to vector<64x128xf32>
    %29 = arith.mulf %27, %28 : vector<64x128xf32>
    %30 = vector.broadcast %7 : vector<1x128xf32> to vector<64x128xf32>
    %31 = arith.addf %29, %30 : vector<64x128xf32>
    %32 = arith.truncf %31 : vector<64x128xf32> to vector<64x128xbf16>
    %c0_13 = arith.constant 0 : index
    %c0_14 = arith.constant 0 : index
    %c0_15 = arith.constant 0 : index
    %33 = vector.load %arg10[%c0_13, %c0_14, %c0_15] : memref<1x128x96xbf16, #tpu.memory_space<vmem>>, vector<1x128x96xbf16>
    %34 = vector.shape_cast %33 : vector<1x128x96xbf16> to vector<128x96xbf16>
    %cst_16 = arith.constant dense<0.000000e+00> : vector<64x96xf32>
    %35 = tpu.matmul %32, %34, %cst_16 {dimension_numbers = #tpu.dot_dimension_numbers<[1], [0], [0], [1], [0, 0, 1, 1], [], []>} : vector<64x128xbf16>, vector<128x96xbf16>, vector<64x96xf32> -> vector<64x96xf32>
    %c0_17 = arith.constant 0 : index
    %c0_18 = arith.constant 0 : index
    %36 = vector.load %arg5[%c0_17, %c0_18] : memref<32x128xf32, #tpu.memory_space<vmem>>, vector<32x128xf32>
    %c0_19 = arith.constant 0 : index
    %c0_20 = arith.constant 0 : index
    %37 = vector.load %arg6[%c0_19, %c0_20] : memref<128x32xf32, #tpu.memory_space<vmem>>, vector<128x32xf32>
    %c0_21 = arith.constant 0 : index
    %c0_22 = arith.constant 0 : index
    %38 = vector.load %arg7[%c0_21, %c0_22] : memref<1x128xf32, #tpu.memory_space<vmem>>, vector<1x128xf32>
    %39 = vector.extract_strided_slice %35 {offsets = [0, 0], sizes = [32, 32], strides = [1, 1]} : vector<64x96xf32> to vector<32x32xf32>
    %40 = vector.extract_strided_slice %35 {offsets = [0, 32], sizes = [32, 32], strides = [1, 1]} : vector<64x96xf32> to vector<32x32xf32>
    %41 = vector.extract_strided_slice %35 {offsets = [0, 64], sizes = [32, 32], strides = [1, 1]} : vector<64x96xf32> to vector<32x32xf32>
    %42 = tpu.transpose %40, [1, 0] : vector<32x32xf32> -> vector<32x32xf32>
    %43 = tpu.concatenate %42, %42, %42, %42 in 1 : vector<32x32xf32>, vector<32x32xf32>, vector<32x32xf32>, vector<32x32xf32> -> vector<32x128xf32>
    %44 = arith.mulf %43, %36 : vector<32x128xf32>
    %cst_23 = arith.constant dense<0.000000e+00> : vector<32x128xf32>
    %45 = tpu.matmul %39, %44, %cst_23 {dimension_numbers = #tpu.dot_dimension_numbers<[1], [0], [0], [1], [0, 0, 1, 1], [], []>} : vector<32x32xf32>, vector<32x128xf32>, vector<32x128xf32> -> vector<32x128xf32>
    %cst_24 = arith.constant 0.353553385 : f32
    %46 = vector.broadcast %cst_24 : f32 to vector<32x128xf32>
    %47 = arith.mulf %45, %46 : vector<32x128xf32>
    %48 = vector.broadcast %38 : vector<1x128xf32> to vector<32x128xf32>
    %49 = arith.addf %47, %48 : vector<32x128xf32>
    %cst_25 = arith.constant dense<0xFF800000> : vector<32xf32>
    %50 = vector.multi_reduction <maximumf>, %49, %cst_25 [1] : vector<32x128xf32> to vector<32xf32>
    %51 = vector.shape_cast %50 : vector<32xf32> to vector<32x1xf32>
    %52 = vector.broadcast %51 : vector<32x1xf32> to vector<32x128xf32>
    %53 = arith.subf %49, %52 : vector<32x128xf32>
    %54 = math.exp %53 : vector<32x128xf32>
    %55 = tpu.concatenate %41, %41, %41, %41 in 0 : vector<32x32xf32>, vector<32x32xf32>, vector<32x32xf32>, vector<32x32xf32> -> vector<128x32xf32>
    %56 = arith.mulf %55, %37 : vector<128x32xf32>
    %cst_26 = arith.constant dense<0.000000e+00> : vector<32x32xf32>
    %57 = tpu.matmul %54, %56, %cst_26 {dimension_numbers = #tpu.dot_dimension_numbers<[1], [0], [0], [1], [0, 0, 1, 1], [], []>} : vector<32x128xf32>, vector<128x32xf32>, vector<32x32xf32> -> vector<32x32xf32>
    %cst_27 = arith.constant dense<0.000000e+00> : vector<32x32xf32>
    %58 = tpu.matmul %54, %37, %cst_27 {dimension_numbers = #tpu.dot_dimension_numbers<[1], [0], [0], [1], [0, 0, 1, 1], [], []>} : vector<32x128xf32>, vector<128x32xf32>, vector<32x32xf32> -> vector<32x32xf32>
    %cst_28 = arith.constant 1.000000e-30 : f32
    %59 = vector.broadcast %cst_28 : f32 to vector<32x32xf32>
    %60 = arith.maximumf %58, %59 : vector<32x32xf32>
    %61 = tpu.reciprocal %60 {approx = true} : vector<32x32xf32> -> vector<32x32xf32>
    %62 = arith.mulf %57, %61 : vector<32x32xf32>
    %63 = vector.extract_strided_slice %35 {offsets = [32, 0], sizes = [32, 32], strides = [1, 1]} : vector<64x96xf32> to vector<32x32xf32>
    %64 = vector.extract_strided_slice %35 {offsets = [32, 32], sizes = [32, 32], strides = [1, 1]} : vector<64x96xf32> to vector<32x32xf32>
    %65 = vector.extract_strided_slice %35 {offsets = [32, 64], sizes = [32, 32], strides = [1, 1]} : vector<64x96xf32> to vector<32x32xf32>
    %66 = tpu.transpose %64, [1, 0] : vector<32x32xf32> -> vector<32x32xf32>
    %67 = tpu.concatenate %66, %66, %66, %66 in 1 : vector<32x32xf32>, vector<32x32xf32>, vector<32x32xf32>, vector<32x32xf32> -> vector<32x128xf32>
    %68 = arith.mulf %67, %36 : vector<32x128xf32>
    %cst_29 = arith.constant dense<0.000000e+00> : vector<32x128xf32>
    %69 = tpu.matmul %63, %68, %cst_29 {dimension_numbers = #tpu.dot_dimension_numbers<[1], [0], [0], [1], [0, 0, 1, 1], [], []>} : vector<32x32xf32>, vector<32x128xf32>, vector<32x128xf32> -> vector<32x128xf32>
    %cst_30 = arith.constant 0.353553385 : f32
    %70 = vector.broadcast %cst_30 : f32 to vector<32x128xf32>
    %71 = arith.mulf %69, %70 : vector<32x128xf32>
    %72 = vector.broadcast %38 : vector<1x128xf32> to vector<32x128xf32>
    %73 = arith.addf %71, %72 : vector<32x128xf32>
    %cst_31 = arith.constant dense<0xFF800000> : vector<32xf32>
    %74 = vector.multi_reduction <maximumf>, %73, %cst_31 [1] : vector<32x128xf32> to vector<32xf32>
    %75 = vector.shape_cast %74 : vector<32xf32> to vector<32x1xf32>
    %76 = vector.broadcast %75 : vector<32x1xf32> to vector<32x128xf32>
    %77 = arith.subf %73, %76 : vector<32x128xf32>
    %78 = math.exp %77 : vector<32x128xf32>
    %79 = tpu.concatenate %65, %65, %65, %65 in 0 : vector<32x32xf32>, vector<32x32xf32>, vector<32x32xf32>, vector<32x32xf32> -> vector<128x32xf32>
    %80 = arith.mulf %79, %37 : vector<128x32xf32>
    %cst_32 = arith.constant dense<0.000000e+00> : vector<32x32xf32>
    %81 = tpu.matmul %78, %80, %cst_32 {dimension_numbers = #tpu.dot_dimension_numbers<[1], [0], [0], [1], [0, 0, 1, 1], [], []>} : vector<32x128xf32>, vector<128x32xf32>, vector<32x32xf32> -> vector<32x32xf32>
    %cst_33 = arith.constant dense<0.000000e+00> : vector<32x32xf32>
    %82 = tpu.matmul %78, %37, %cst_33 {dimension_numbers = #tpu.dot_dimension_numbers<[1], [0], [0], [1], [0, 0, 1, 1], [], []>} : vector<32x128xf32>, vector<128x32xf32>, vector<32x32xf32> -> vector<32x32xf32>
    %cst_34 = arith.constant 1.000000e-30 : f32
    %83 = vector.broadcast %cst_34 : f32 to vector<32x32xf32>
    %84 = arith.maximumf %82, %83 : vector<32x32xf32>
    %85 = tpu.reciprocal %84 {approx = true} : vector<32x32xf32> -> vector<32x32xf32>
    %86 = arith.mulf %81, %85 : vector<32x32xf32>
    %87 = tpu.concatenate %62, %86 in 0 : vector<32x32xf32>, vector<32x32xf32> -> vector<64x32xf32>
    %88 = arith.truncf %87 : vector<64x32xf32> to vector<64x32xbf16>
    %c0_35 = arith.constant 0 : index
    %c0_36 = arith.constant 0 : index
    %c0_37 = arith.constant 0 : index
    %89 = vector.load %arg11[%c0_35, %c0_36, %c0_37] : memref<1x32x128xbf16, #tpu.memory_space<vmem>>, vector<1x32x128xbf16>
    %90 = vector.shape_cast %89 : vector<1x32x128xbf16> to vector<32x128xbf16>
    %cst_38 = arith.constant dense<0.000000e+00> : vector<64x128xf32>
    %91 = tpu.matmul %88, %90, %cst_38 {dimension_numbers = #tpu.dot_dimension_numbers<[1], [0], [0], [1], [0, 0, 1, 1], [], []>} : vector<64x32xbf16>, vector<32x128xbf16>, vector<64x128xf32> -> vector<64x128xf32>
    %92 = arith.addf %3, %91 : vector<64x128xf32>
    %c0_39 = arith.constant 0 : index
    %c0_40 = arith.constant 0 : index
    %c0_41 = arith.constant 0 : index
    %93 = vector.load %arg12[%c0_39, %c0_40, %c0_41] : memref<1x1x128xf32, #tpu.memory_space<vmem>>, vector<1x1x128xf32>
    %94 = vector.shape_cast %93 : vector<1x1x128xf32> to vector<1x128xf32>
    %95 = vector.broadcast %94 : vector<1x128xf32> to vector<64x128xf32>
    %96 = arith.addf %92, %95 : vector<64x128xf32>
    %c0_42 = arith.constant 0 : index
    %c0_43 = arith.constant 0 : index
    %c0_44 = arith.constant 0 : index
    %97 = vector.load %arg13[%c0_42, %c0_43, %c0_44] : memref<1x1x128xf32, #tpu.memory_space<vmem>>, vector<1x1x128xf32>
    %98 = vector.shape_cast %97 : vector<1x1x128xf32> to vector<1x128xf32>
    %c0_45 = arith.constant 0 : index
    %c0_46 = arith.constant 0 : index
    %c0_47 = arith.constant 0 : index
    %99 = vector.load %arg14[%c0_45, %c0_46, %c0_47] : memref<1x1x128xf32, #tpu.memory_space<vmem>>, vector<1x1x128xf32>
    %100 = vector.shape_cast %99 : vector<1x1x128xf32> to vector<1x128xf32>
    %cst_48 = arith.constant dense<0.000000e+00> : vector<64xf32>
    %101 = vector.multi_reduction <add>, %96, %cst_48 [1] : vector<64x128xf32> to vector<64xf32>
    %102 = vector.shape_cast %101 : vector<64xf32> to vector<64x1xf32>
    %cst_49 = arith.constant 3.125000e-02 : f32
    %103 = vector.broadcast %cst_49 : f32 to vector<64x1xf32>
    %104 = arith.mulf %102, %103 : vector<64x1xf32>
    %105 = vector.broadcast %104 : vector<64x1xf32> to vector<64x128xf32>
    %106 = arith.subf %96, %105 : vector<64x128xf32>
    %107 = arith.mulf %106, %106 : vector<64x128xf32>
    %cst_50 = arith.constant dense<0.000000e+00> : vector<64xf32>
    %108 = vector.multi_reduction <add>, %107, %cst_50 [1] : vector<64x128xf32> to vector<64xf32>
    %109 = vector.shape_cast %108 : vector<64xf32> to vector<64x1xf32>
    %110 = arith.mulf %104, %104 : vector<64x1xf32>
    %cst_51 = arith.constant 9.600000e+01 : f32
    %111 = vector.broadcast %cst_51 : f32 to vector<64x1xf32>
    %112 = arith.mulf %111, %110 : vector<64x1xf32>
    %113 = arith.subf %109, %112 : vector<64x1xf32>
    %cst_52 = arith.constant 3.125000e-02 : f32
    %114 = vector.broadcast %cst_52 : f32 to vector<64x1xf32>
    %115 = arith.mulf %113, %114 : vector<64x1xf32>
    %cst_53 = arith.constant 9.99999974E-6 : f32
    %116 = vector.broadcast %cst_53 : f32 to vector<64x1xf32>
    %117 = arith.addf %115, %116 : vector<64x1xf32>
    %118 = math.rsqrt %117 : vector<64x1xf32>
    %119 = vector.broadcast %118 : vector<64x1xf32> to vector<64x128xf32>
    %120 = arith.mulf %106, %119 : vector<64x128xf32>
    %121 = vector.broadcast %98 : vector<1x128xf32> to vector<64x128xf32>
    %122 = arith.mulf %120, %121 : vector<64x128xf32>
    %123 = vector.broadcast %100 : vector<1x128xf32> to vector<64x128xf32>
    %124 = arith.addf %122, %123 : vector<64x128xf32>
    %125 = arith.truncf %124 : vector<64x128xf32> to vector<64x128xbf16>
    %c0_54 = arith.constant 0 : index
    %c0_55 = arith.constant 0 : index
    %c0_56 = arith.constant 0 : index
    %126 = vector.load %arg15[%c0_54, %c0_55, %c0_56] : memref<1x128x128xbf16, #tpu.memory_space<vmem>>, vector<1x128x128xbf16>
    %127 = vector.shape_cast %126 : vector<1x128x128xbf16> to vector<128x128xbf16>
    %cst_57 = arith.constant dense<0.000000e+00> : vector<64x128xf32>
    %128 = tpu.matmul %125, %127, %cst_57 {dimension_numbers = #tpu.dot_dimension_numbers<[1], [0], [0], [1], [0, 0, 1, 1], [], []>} : vector<64x128xbf16>, vector<128x128xbf16>, vector<64x128xf32> -> vector<64x128xf32>
    %c0_58 = arith.constant 0 : index
    %c0_59 = arith.constant 0 : index
    %c0_60 = arith.constant 0 : index
    %129 = vector.load %arg16[%c0_58, %c0_59, %c0_60] : memref<1x1x128xf32, #tpu.memory_space<vmem>>, vector<1x1x128xf32>
    %130 = vector.shape_cast %129 : vector<1x1x128xf32> to vector<1x128xf32>
    %131 = vector.broadcast %130 : vector<1x128xf32> to vector<64x128xf32>
    %132 = arith.addf %128, %131 : vector<64x128xf32>
    %cst_61 = arith.constant 5.000000e-01 : f32
    %133 = vector.broadcast %cst_61 : f32 to vector<64x128xf32>
    %134 = arith.mulf %133, %132 : vector<64x128xf32>
    %cst_62 = arith.constant 0.707106769 : f32
    %135 = vector.broadcast %cst_62 : f32 to vector<64x128xf32>
    %136 = arith.mulf %132, %135 : vector<64x128xf32>
    %137 = math.erf %136 : vector<64x128xf32>
    %cst_63 = arith.constant 1.000000e+00 : f32
    %138 = vector.broadcast %cst_63 : f32 to vector<64x128xf32>
    %139 = arith.addf %138, %137 : vector<64x128xf32>
    %140 = arith.mulf %134, %139 : vector<64x128xf32>
    %141 = arith.truncf %140 : vector<64x128xf32> to vector<64x128xbf16>
    %c0_64 = arith.constant 0 : index
    %c0_65 = arith.constant 0 : index
    %c0_66 = arith.constant 0 : index
    %142 = vector.load %arg17[%c0_64, %c0_65, %c0_66] : memref<1x128x128xbf16, #tpu.memory_space<vmem>>, vector<1x128x128xbf16>
    %143 = vector.shape_cast %142 : vector<1x128x128xbf16> to vector<128x128xbf16>
    %cst_67 = arith.constant dense<0.000000e+00> : vector<64x128xf32>
    %144 = tpu.matmul %141, %143, %cst_67 {dimension_numbers = #tpu.dot_dimension_numbers<[1], [0], [0], [1], [0, 0, 1, 1], [], []>} : vector<64x128xbf16>, vector<128x128xbf16>, vector<64x128xf32> -> vector<64x128xf32>
    %145 = arith.addf %96, %144 : vector<64x128xf32>
    %c0_68 = arith.constant 0 : index
    %c0_69 = arith.constant 0 : index
    %c0_70 = arith.constant 0 : index
    %146 = vector.load %arg18[%c0_68, %c0_69, %c0_70] : memref<1x1x128xf32, #tpu.memory_space<vmem>>, vector<1x1x128xf32>
    %147 = vector.shape_cast %146 : vector<1x1x128xf32> to vector<1x128xf32>
    %148 = vector.broadcast %147 : vector<1x128xf32> to vector<64x128xf32>
    %149 = arith.addf %145, %148 : vector<64x128xf32>
    %c0_71 = arith.constant 0 : index
    %c0_72 = arith.constant 0 : index
    %150 = vector.load %arg25[%c0_71, %c0_72] : memref<64x128xf32, #tpu.memory_space<vmem>>, vector<64x128xf32>
    tpu.vector_store %arg25[%c0_71, %c0_72], %149 {strides = array<i32>} : memref<64x128xf32, #tpu.memory_space<vmem>>, vector<64x128xf32>,
    %c0_73 = arith.constant 0 : index
    %c0_74 = arith.constant 0 : index
    %151 = vector.load %arg23[%c0_73, %c0_74] : memref<64x128xf32, #tpu.memory_space<vmem>>, vector<64x128xf32>
    tpu.vector_store %arg23[%c0_73, %c0_74], %149 {strides = array<i32>} : memref<64x128xf32, #tpu.memory_space<vmem>>, vector<64x128xf32>,
    %c1_i32 = arith.constant 1 : i32
    %152 = arith.cmpi eq, %arg0, %c1_i32 : i32
    %153 = arith.extui %152 : i1 to i32
    %c0_i32_75 = arith.constant 0 : i32
    %154 = arith.cmpi ne, %153, %c0_i32_75 : i32
    scf.if %154 {
      %155 = vector.extract_strided_slice %149 {offsets = [0, 0], sizes = [1, 128], strides = [1, 1]} : vector<64x128xf32> to vector<1x128xf32>
      %156 = vector.extract_strided_slice %149 {offsets = [32, 0], sizes = [1, 128], strides = [1, 1]} : vector<64x128xf32> to vector<1x128xf32>
      %157 = tpu.concatenate %155, %156 in 0 : vector<1x128xf32>, vector<1x128xf32> -> vector<2x128xf32>
      %c0_76 = arith.constant 0 : index
      %c0_77 = arith.constant 0 : index
      %158 = vector.load %arg19[%c0_76, %c0_77] : memref<1x128xf32, #tpu.memory_space<vmem>>, vector<1x128xf32>
      %c0_78 = arith.constant 0 : index
      %c0_79 = arith.constant 0 : index
      %159 = vector.load %arg20[%c0_78, %c0_79] : memref<1x128xf32, #tpu.memory_space<vmem>>, vector<1x128xf32>
      %cst_80 = arith.constant dense<0.000000e+00> : vector<2xf32>
      %160 = vector.multi_reduction <add>, %157, %cst_80 [1] : vector<2x128xf32> to vector<2xf32>
      %161 = vector.shape_cast %160 : vector<2xf32> to vector<2x1xf32>
      %cst_81 = arith.constant 3.125000e-02 : f32
      %162 = vector.broadcast %cst_81 : f32 to vector<2x1xf32>
      %163 = arith.mulf %161, %162 : vector<2x1xf32>
      %164 = vector.broadcast %163 : vector<2x1xf32> to vector<2x128xf32>
      %165 = arith.subf %157, %164 : vector<2x128xf32>
      %166 = arith.mulf %165, %165 : vector<2x128xf32>
      %cst_82 = arith.constant dense<0.000000e+00> : vector<2xf32>
      %167 = vector.multi_reduction <add>, %166, %cst_82 [1] : vector<2x128xf32> to vector<2xf32>
      %168 = vector.shape_cast %167 : vector<2xf32> to vector<2x1xf32>
      %169 = arith.mulf %163, %163 : vector<2x1xf32>
      %cst_83 = arith.constant 9.600000e+01 : f32
      %170 = vector.broadcast %cst_83 : f32 to vector<2x1xf32>
      %171 = arith.mulf %170, %169 : vector<2x1xf32>
      %172 = arith.subf %168, %171 : vector<2x1xf32>
      %cst_84 = arith.constant 3.125000e-02 : f32
      %173 = vector.broadcast %cst_84 : f32 to vector<2x1xf32>
      %174 = arith.mulf %172, %173 : vector<2x1xf32>
      %cst_85 = arith.constant 9.99999974E-6 : f32
      %175 = vector.broadcast %cst_85 : f32 to vector<2x1xf32>
      %176 = arith.addf %174, %175 : vector<2x1xf32>
      %177 = math.rsqrt %176 : vector<2x1xf32>
      %178 = vector.broadcast %177 : vector<2x1xf32> to vector<2x128xf32>
      %179 = arith.mulf %165, %178 : vector<2x128xf32>
      %180 = vector.broadcast %158 : vector<1x128xf32> to vector<2x128xf32>
      %181 = arith.mulf %179, %180 : vector<2x128xf32>
      %182 = vector.broadcast %159 : vector<1x128xf32> to vector<2x128xf32>
      %183 = arith.addf %181, %182 : vector<2x128xf32>
      %184 = arith.truncf %183 : vector<2x128xf32> to vector<2x128xbf16>
      %c0_86 = arith.constant 0 : index
      %c0_87 = arith.constant 0 : index
      %185 = vector.load %arg21[%c0_86, %c0_87] : memref<128x128xbf16, #tpu.memory_space<vmem>>, vector<128x128xbf16>
      %cst_88 = arith.constant dense<0.000000e+00> : vector<2x128xf32>
      %186 = tpu.matmul %184, %185, %cst_88 {dimension_numbers = #tpu.dot_dimension_numbers<[1], [0], [0], [1], [0, 0, 1, 1], [], []>} : vector<2x128xbf16>, vector<128x128xbf16>, vector<2x128xf32> -> vector<2x128xf32>
      %c0_89 = arith.constant 0 : index
      %c0_90 = arith.constant 0 : index
      %187 = vector.load %arg22[%c0_89, %c0_90] : memref<1x128xf32, #tpu.memory_space<vmem>>, vector<1x128xf32>
      %188 = vector.broadcast %187 : vector<1x128xf32> to vector<2x128xf32>
      %189 = arith.addf %186, %188 : vector<2x128xf32>
      %c0_91 = arith.constant 0 : index
      %c0_92 = arith.constant 0 : index
      %190 = vector.load %arg24[%c0_91, %c0_92] : memref<2x128xf32, #tpu.memory_space<vmem>>, vector<2x128xf32>
      tpu.vector_store %arg24[%c0_91, %c0_92], %189 {strides = array<i32>} : memref<2x128xf32, #tpu.memory_space<vmem>>, vector<2x128xf32>,
    } else {
    }
    return
  }
  func.func @transform_0(%arg0: i32) -> (i32, i32) {
    %c0_i32 = arith.constant 0 : i32
    %c0_i32_0 = arith.constant 0 : i32
    %c0_i32_1 = arith.constant 0 : i32
    return %c0_i32, %c0_i32_0 : i32, i32
  }
  func.func @transform_1(%arg0: i32) -> (i32, i32) {
    %c0_i32 = arith.constant 0 : i32
    %c0_i32_0 = arith.constant 0 : i32
    %c0_i32_1 = arith.constant 0 : i32
    return %c0_i32, %c0_i32_0 : i32, i32
  }
  func.func @transform_2(%arg0: i32) -> (i32, i32) {
    %c0_i32 = arith.constant 0 : i32
    %c0_i32_0 = arith.constant 0 : i32
    %c0_i32_1 = arith.constant 0 : i32
    return %c0_i32, %c0_i32_0 : i32, i32
  }
  func.func @transform_3(%arg0: i32) -> (i32, i32) {
    %c0_i32 = arith.constant 0 : i32
    %c0_i32_0 = arith.constant 0 : i32
    %c0_i32_1 = arith.constant 0 : i32
    return %c0_i32, %c0_i32_0 : i32, i32
  }
  func.func @transform_4(%arg0: i32) -> (i32, i32) {
    %c0_i32 = arith.constant 0 : i32
    %c0_i32_0 = arith.constant 0 : i32
    %c0_i32_1 = arith.constant 0 : i32
    return %c0_i32, %c0_i32_0 : i32, i32
  }
  func.func @transform_5(%arg0: i32) -> (i32, i32) {
    %c0_i32 = arith.constant 0 : i32
    %c0_i32_0 = arith.constant 0 : i32
    %c0_i32_1 = arith.constant 0 : i32
    return %c0_i32, %c0_i32_0 : i32, i32
  }
  func.func @transform_6(%arg0: i32) -> (i32, i32) {
    %c0_i32 = arith.constant 0 : i32
    %c0_i32_0 = arith.constant 0 : i32
    %c0_i32_1 = arith.constant 0 : i32
    return %c0_i32, %c0_i32_0 : i32, i32
  }
  func.func @transform_7(%arg0: i32) -> (i32, i32, i32) {
    %c0_i32 = arith.constant 0 : i32
    %c0_i32_0 = arith.constant 0 : i32
    %c0_i32_1 = arith.constant 0 : i32
    return %arg0, %c0_i32, %c0_i32_0 : i32, i32, i32
  }
  func.func @transform_8(%arg0: i32) -> (i32, i32, i32) {
    %c0_i32 = arith.constant 0 : i32
    %c0_i32_0 = arith.constant 0 : i32
    %c0_i32_1 = arith.constant 0 : i32
    return %arg0, %c0_i32, %c0_i32_0 : i32, i32, i32
  }
  func.func @transform_9(%arg0: i32) -> (i32, i32, i32) {
    %c0_i32 = arith.constant 0 : i32
    %c0_i32_0 = arith.constant 0 : i32
    %c0_i32_1 = arith.constant 0 : i32
    return %arg0, %c0_i32, %c0_i32_0 : i32, i32, i32
  }
  func.func @transform_10(%arg0: i32) -> (i32, i32, i32) {
    %c0_i32 = arith.constant 0 : i32
    %c0_i32_0 = arith.constant 0 : i32
    %c0_i32_1 = arith.constant 0 : i32
    return %arg0, %c0_i32, %c0_i32_0 : i32, i32, i32
  }
  func.func @transform_11(%arg0: i32) -> (i32, i32, i32) {
    %c0_i32 = arith.constant 0 : i32
    %c0_i32_0 = arith.constant 0 : i32
    %c0_i32_1 = arith.constant 0 : i32
    return %arg0, %c0_i32, %c0_i32_0 : i32, i32, i32
  }
  func.func @transform_12(%arg0: i32) -> (i32, i32, i32) {
    %c0_i32 = arith.constant 0 : i32
    %c0_i32_0 = arith.constant 0 : i32
    %c0_i32_1 = arith.constant 0 : i32
    return %arg0, %c0_i32, %c0_i32_0 : i32, i32, i32
  }
  func.func @transform_13(%arg0: i32) -> (i32, i32, i32) {
    %c0_i32 = arith.constant 0 : i32
    %c0_i32_0 = arith.constant 0 : i32
    %c0_i32_1 = arith.constant 0 : i32
    return %arg0, %c0_i32, %c0_i32_0 : i32, i32, i32
  }
  func.func @transform_14(%arg0: i32) -> (i32, i32, i32) {
    %c0_i32 = arith.constant 0 : i32
    %c0_i32_0 = arith.constant 0 : i32
    %c0_i32_1 = arith.constant 0 : i32
    return %arg0, %c0_i32, %c0_i32_0 : i32, i32, i32
  }
  func.func @transform_15(%arg0: i32) -> (i32, i32, i32) {
    %c0_i32 = arith.constant 0 : i32
    %c0_i32_0 = arith.constant 0 : i32
    %c0_i32_1 = arith.constant 0 : i32
    return %arg0, %c0_i32, %c0_i32_0 : i32, i32, i32
  }
  func.func @transform_16(%arg0: i32) -> (i32, i32, i32) {
    %c0_i32 = arith.constant 0 : i32
    %c0_i32_0 = arith.constant 0 : i32
    %c0_i32_1 = arith.constant 0 : i32
    return %arg0, %c0_i32, %c0_i32_0 : i32, i32, i32
  }
  func.func @transform_17(%arg0: i32) -> (i32, i32, i32) {
    %c0_i32 = arith.constant 0 : i32
    %c0_i32_0 = arith.constant 0 : i32
    %c0_i32_1 = arith.constant 0 : i32
    return %arg0, %c0_i32, %c0_i32_0 : i32, i32, i32
  }
  func.func @transform_18(%arg0: i32) -> (i32, i32) {
    %c0_i32 = arith.constant 0 : i32
    %c0_i32_0 = arith.constant 0 : i32
    %c0_i32_1 = arith.constant 0 : i32
    return %c0_i32, %c0_i32_0 : i32, i32
  }
  func.func @transform_19(%arg0: i32) -> (i32, i32) {
    %c0_i32 = arith.constant 0 : i32
    %c0_i32_0 = arith.constant 0 : i32
    %c0_i32_1 = arith.constant 0 : i32
    return %c0_i32, %c0_i32_0 : i32, i32
  }
  func.func @transform_20(%arg0: i32) -> (i32, i32) {
    %c0_i32 = arith.constant 0 : i32
    %c0_i32_0 = arith.constant 0 : i32
    %c0_i32_1 = arith.constant 0 : i32
    return %c0_i32, %c0_i32_0 : i32, i32
  }
  func.func @transform_21(%arg0: i32) -> (i32, i32) {
    %c0_i32 = arith.constant 0 : i32
    %c0_i32_0 = arith.constant 0 : i32
    %c0_i32_1 = arith.constant 0 : i32
    return %c0_i32, %c0_i32_0 : i32, i32
  }
  func.func @transform_22(%arg0: i32) -> (i32, i32) {
    %c0_i32 = arith.constant 0 : i32
    %c0_i32_0 = arith.constant 0 : i32
    %c0_i32_1 = arith.constant 0 : i32
    return %c0_i32, %c0_i32_0 : i32, i32
  }
  func.func @transform_23(%arg0: i32) -> (i32, i32) {
    %c0_i32 = arith.constant 0 : i32
    %c0_i32_0 = arith.constant 0 : i32
    %c0_i32_1 = arith.constant 0 : i32
    return %c0_i32, %c0_i32_0 : i32, i32
  }
}

</mosaic_0001>

<bundles_post_ra>
// kernel: _lambda_.1
= control target key start
LH: loop header
LB: loop body
LE: loop exit
PB: predicated region body
PF: predicated region fallthrough
CT: control target
= control target key end

     0   :  { %s4861_s0 = inlined_call_operand.vmem [shape: f32[32,128], index: 0, kind: input, shape index: {}]   ;;  %s4862_s1 = inlined_call_operand.vmem [shape: bf16[128,128], index: 1, kind: input, shape index: {}]   ;;  %s4863_s2 = inlined_call_operand.vmem [shape: f32[1,128], index: 2, kind: input, shape index: {}]   ;;  %s4864_s3 = inlined_call_operand.vmem [shape: f32[32,128], index: 3, kind: input, shape index: {}]   ;;  %s4865_s4 = inlined_call_operand.vmem [shape: f32[32,128], index: 4, kind: input, shape index: {}]   ;;  %s4866_s5 = inlined_call_operand.vmem [shape: f32[128,32], index: 5, kind: input, shape index: {}]   ;;  %s4867_s6 = inlined_call_operand.vmem [shape: f32[1,128], index: 6, kind: input, shape index: {}]   ;;  %s4868_s7 = inlined_call_operand.vmem [shape: f32[2,1,128], index: 7, kind: input, shape index: {}]   ;;  %s4869_s8 = inlined_call_operand.vmem [shape: f32[2,1,128], index: 8, kind: input, shape index: {}]   ;;  %s4870_s9 = inlined_call_operand.vmem [shape: bf16[2,128,96], index: 9, kind: input, shape index: {}]   ;;  %s4871_s10 = inlined_call_operand.vmem [shape: bf16[2,32,128], index: 10, kind: input, shape index: {}]   ;;  %s4872_s11 = inlined_call_operand.vmem [shape: f32[2,1,128], index: 11, kind: input, shape index: {}]   ;;  %s4873_s12 = inlined_call_operand.vmem [shape: f32[2,1,128], index: 12, kind: input, shape index: {}]   ;;  %s4874_s13 = inlined_call_operand.vmem [shape: f32[2,1,128], index: 13, kind: input, shape index: {}]   ;;  %s4875_s14 = inlined_call_operand.vmem [shape: bf16[2,128,128], index: 14, kind: input, shape index: {}]   ;;  %s4876_s15 = inlined_call_operand.vmem [shape: f32[2,1,128], index: 15, kind: input, shape index: {}]   ;;  %s4877_s16 = inlined_call_operand.vmem [shape: bf16[2,128,128], index: 16, kind: input, shape index: {}]   ;;  %s4878_s17 = inlined_call_operand.vmem [shape: f32[2,1,128], index: 17, kind: input, shape index: {}]   ;;  %s4879_s18 = inlined_call_operand.vmem [shape: f32[1,128], index: 18, kind: input, shape index: {}]   ;;  %s4880_s19 = inlined_call_operand.vmem [shape: f32[1,128], index: 19, kind: input, shape index: {}]   ;;  %s4881_s20 = inlined_call_operand.vmem [shape: bf16[128,128], index: 20, kind: input, shape index: {}]   ;;  %s4882_s21 = inlined_call_operand.vmem [shape: f32[1,128], index: 21, kind: input, shape index: {}]   ;;  %s4883_s22 = inlined_call_operand.vmem [shape: f32[64,128], index: 22, kind: output, shape index: {0}]   ;;  %s4884_s23 = inlined_call_operand.hbm [shape: f32[2,128], index: 23, kind: output, shape index: {1}]  }
   0x1   :  { %4891 = sst [smem:[#allocation7_spill]] %s4861_s0 }
   0x2   :  { %4892 = sst [smem:[#allocation8_spill]] %s4862_s1 }
   0x3   :  { %4893 = sst [smem:[#allocation9_spill]] %s4863_s2 }
   0x4   :  { %4894 = sst [smem:[#allocation10_spill]] %s4864_s3 }
   0x5   :  { %4895 = sst [smem:[#allocation11_spill]] %s4865_s4 }
   0x6   :  { %4896 = sst [smem:[#allocation12_spill]] %s4866_s5 }
   0x7   :  { %4897 = sst [smem:[#allocation13_spill]] %s4867_s6 }
   0x8   :  { %4898 = sst [smem:[#allocation14_spill]] %s4868_s7 }
   0x9   :  { %4899 = sst [smem:[#allocation15_spill]] %s4870_s9 }
   0xa   :  { %4900 = sst [smem:[#allocation16_spill]] %s4871_s10 }
   0xb   :  { %4901 = sst [smem:[#allocation17_spill]] %s4879_s18 }
   0xc   :  { %4902 = sst [smem:[#allocation18_spill]] %s4880_s19 }
   0xd   :  { %4903 = sst [smem:[#allocation19_spill]] %s4882_s21 }
   0xe   :  { %4904 = sst [smem:[#allocation20_spill]] %s4884_s23 }
   0xf   :  { %29 = vsyncpa [#allocation4], 0  ;;  %s3839_s4 = smov 0  }
  0x10 LB: > { %4905 = sst [smem:[#allocation6_spill]] %s3712_s4  ;;  %s3845_s30 = sadd.s32 4294967295, %s3712_s4   ;;  %s3712_s4 = sphi %s3839_s4, %s35_s4  }
  0x11   : > { %p3199_p0 = scmp.ge.s32.totalorder %s3712_s4, 1  ;;  %p717_p1 = scmp.lt.s32.totalorder %s3712_s4, 3 }
  0x13   : > { %p718_p2 = pnand %p3199_p0, %p717_p1 }
  0x14   : > { %p812_p3 = scmp.lt.s32.totalorder (!%p718_p2), %s3845_s30, 1  ;;  %s4907_s9 = sld [smem:[#allocation15_spill]] (!%p718_p2) }
  0x15   : > { %721 = sbr.rel (%p718_p2) target bundleno = 3018 (0xbca), region = 108  ;;  %s4908_s10 = sld [smem:[#allocation16_spill]] (!%p718_p2) }
  0x16   : > { %p3208_p4 = scmp.ne.s32.totalorder (!%p718_p2), %s3845_s30, 0 }
  0x1a   : > { %s3851_s24 = scalar_select %p812_p3, %s3845_s30, 1 }
  0x1b   : > { %857 = sbr.rel (%p3208_p4) target bundleno = 210 (0xd2), region = 112  ;;  %s4909_s29 = sld [smem:[#allocation8_spill]] (!%p3208_p4) }
  0x1c   : > { %s3402_s7 = sshll.u32 %s3851_s24, 6  ;;  %s3403_s28 = sshll.u32 %s3851_s24, 4 }
  0x1d   : > { %s3866_s0 = scalar_lea.vmem %s4907_s9, %s3402_s7  ;;  %s3871_s4 = scalar_lea.vmem %s4908_s10, %s3403_s28 }
  0x1e   : > { %s3888_s9 = scalar_lea.vmem %s4875_s14, %s3402_s7  ;;  %s3897_s23 = scalar_lea.vmem %s4877_s16, %s3402_s7 }
  0x1f   : > { %s4910_s19 = sld [smem:[#allocation7_spill]] (!%p3208_p4) }
  0x20   : > { %v3714_v14 = vmov 0.0   ;;  %s4911_s7 = sld [smem:[#allocation10_spill]]  ;;  %vm957_vm0 = vcmask 1046528   ;;  %vm971_vm1 = vcmask 1040384  }
  0x21   : > { %v3413_v0 = vld [vmem:[%s4909_s29 + $0x38] sm:$0xff]  ;;  %v3412_v1 = vld [vmem:[%s4909_s29 + $0x30] sm:$0xff]  ;;  %v3411_v2 = vld [vmem:[%s4909_s29 + $0x28] sm:$0xff]  ;;  %993 = vst [vmem:[#allocation2 + $0x10] sm:$0xff] %v3714_v14  ;;  %s4912_s6 = sld [smem:[#allocation9_spill]] }
  0x22   : > { %932 = vmatpush.bf16.msra.mxu0 %v3413_v0  ;;  %3448 = vmatpush.bf16.msra.mxu1 %v3413_v0  ;;  %v3410_v3 = vld [vmem:[%s4909_s29 + $0x20] sm:$0xff]  ;;  %v3409_v4 = vld [vmem:[%s4909_s29 + $0x18] sm:$0xff]  ;;  %v3408_v5 = vld [vmem:[%s4909_s29 + $0x10] sm:$0xff]  ;;  %997 = vst [vmem:[#allocation2 + $0x38] sm:$0xff] %v3714_v14 }
  0x23   : > { %v3407_v6 = vld [vmem:[%s4909_s29 + $0x8] sm:$0xff]  ;;  %v3406_v7 = vld [vmem:[%s4909_s29] sm:$0xff] }
  0x25   : > { %v858_v8 = vld [vmem:[%s4910_s19] sm:$0xff]  ;;  %v859_v9 = vld [vmem:[%s4910_s19 + $0x8] sm:$0xff]  ;;  %v860_v10 = vld [vmem:[%s4910_s19 + $0x10] sm:$0xff] }
  0x26   : > { %933 = vmatpush.bf16.msra.mxu0 %v3412_v1  ;;  %3449 = vmatpush.bf16.msra.mxu1 %v3412_v1  ;;  %v861_v11 = vld [vmem:[%s4910_s19 + $0x18] sm:$0xff]  ;;  %v862_v12 = vpack.c.bf16 %v859_v9, %v858_v8  ;;  %v951_v15 = vld [vmem:[%s4911_s7] sm:$0xff]  ;;  %v952_v16 = vld [vmem:[%s4911_s7 + $0x8] sm:$0xff] }
  0x27   : > { %v863_v13 = vpack.c.bf16 %v861_v11, %v860_v10  ;;  %v958_v17 = vrot.slane %v951_v15, 1  ;;  %v959_v18 = vrot.slane %v952_v16, 1  ;;  %v3492_v19 = vld [vmem:[%s4912_s6] ss:$0 sm:$0xff]  ;;  %v953_v25 = vld [vmem:[%s4911_s7 + $0x10] sm:$0xff] }
  0x28   : > { %v961_v28 = vrot.slane %v953_v25, 1 }
  0x29   : > { %v960_v21 = vsel %vm957_vm0, %v958_v17, %v959_v18 }
  0x2a   : > { %934 = vmatpush.bf16.msra.mxu0 %v3411_v2  ;;  %3450 = vmatpush.bf16.msra.mxu1 %v3411_v2  ;;  %v962_v34 = vsel %vm957_vm0, %v959_v18, %v961_v28 }
  0x2e   : > { %935 = vmatpush.bf16.msra.mxu0 %v3410_v3  ;;  %3451 = vmatpush.bf16.msra.mxu1 %v3410_v3 }
  0x32   : > { %936 = vmatpush.bf16.msra.mxu0 %v3409_v4  ;;  %3452 = vmatpush.bf16.msra.mxu1 %v3409_v4 }
  0x36   : > { %937 = vmatpush.bf16.msra.mxu0 %v3408_v5  ;;  %3453 = vmatpush.bf16.msra.mxu1 %v3408_v5 }
  0x3a   : > { %938 = vmatpush.bf16.msra.mxu0 %v3407_v6  ;;  %3454 = vmatpush.bf16.msra.mxu1 %v3407_v6 }
  0x3e   : > { %939 = vmatpush.bf16.msra.mxu0 %v3406_v7  ;;  %3455 = vmatpush.bf16.msra.mxu1 %v3406_v7 }
  0x41   : > { %940 = vmatmul.bf16.vlgmr.msra.gmra.mxu0 %v862_v12  ;;  %945 = vmatmul.bf16.vlgmr.msra.gmra.mxu1 %v863_v13 }
  0xbe   : > { %v941_v20 = vpop.f32.mrf.mxu0  ;;  %v946_v22 = vpop.f32.mrf.mxu1 }
  0xbf   : > { %v942_v23 = vadd.f32 %v3492_v19, %v941_v20  ;;  %v947_v24 = vadd.f32 %v3492_v19, %v946_v22 }
  0xc1   : > { %v965_v26 = vadd.f32 %v960_v21, %v942_v23  ;;  %v967_v27 = vadd.f32 %v960_v21, %v947_v24 }
  0xc3   : > { %v972_v29 = vrot.slane %v965_v26, 7  ;;  %v980_v30 = vrot.slane %v967_v27, 7 }
  0xc5   : > { %v986_v31 = vsel %vm971_vm1, %v951_v15, %v972_v29  ;;  %v988_v32 = vsel %vm971_vm1, %v951_v15, %v980_v30 }
  0xc6   : > { %990 = vst [vmem:[#allocation2 + $0x30] sm:$0xff] %v986_v31  ;;  %v943_v33 = vpop.f32.mrf.mxu0  ;;  %v948_v35 = vpop.f32.mrf.mxu1 }
  0xc7   : > { %994 = vst [vmem:[#allocation2 + $0x8] sm:$0xff] %v988_v32  ;;  %v944_v36 = vadd.f32 %v3492_v19, %v943_v33  ;;  %v949_v37 = vadd.f32 %v3492_v19, %v948_v35 }
  0xc9   : > { %v966_v38 = vadd.f32 %v962_v34, %v944_v36  ;;  %v968_v39 = vadd.f32 %v962_v34, %v949_v37 }
  0xcb   : > { %v973_v40 = vrot.slane %v966_v38, 7  ;;  %v981_v41 = vrot.slane %v968_v39, 7 }
  0xcd   : > { %v974_v42 = vsel %vm971_vm1, %v972_v29, %v973_v40  ;;  %v987_v43 = vsel %vm971_vm1, %v973_v40, 0.0  ;;  %v982_v44 = vsel %vm971_vm1, %v980_v30, %v981_v41  ;;  %v989_v45 = vsel %vm971_vm1, %v981_v41, 0.0 }
  0xce   : > { %991 = vst [vmem:[#allocation2] sm:$0xff] %v974_v42 }
  0xcf   : > { %992 = vst [vmem:[#allocation2 + $0x18] sm:$0xff] %v987_v43 }
  0xd0   : > { %995 = vst [vmem:[#allocation2 + $0x20] sm:$0xff] %v982_v44 }
  0xd1   : > { %996 = vst [vmem:[#allocation2 + $0x28] sm:$0xff] %v989_v45 }
  0xd2 PF: > { %v1002_v46 = vld [vmem:[#allocation2 + $0x8] sm:$0xff]  ;;  %v998_v48 = vld [vmem:[#allocation2 + $0x30] sm:$0xff]  ;;  %v1005_v52 = vld [vmem:[#allocation2 + $0x38] sm:$0xff]  ;;  %s4917_s2 = sld [smem:[#allocation14_spill]]  ;;  %s4919_s27 = scalar_lea.vmem %s4869_s8, %s3851_s24 }
  0xd3   : > { %1016 = vadd.xlane.f32.xlu2 %v1002_v46  ;;  %1008 = vadd.xlane.f32.xlu0 %v998_v48  ;;  %v1001_v50 = vld [vmem:[#allocation2 + $0x10] sm:$0xff]  ;;  %v3421_v22 = vld [vmem:[%s3866_s0 + $0x38] sm:$0xff]  ;;  %v3419_v24 = vld [vmem:[%s3866_s0 + $0x28] sm:$0xff]  ;;  %s3715_s6 = smov 96   ;;  %s3716_s3 = smov 32  }
  0xd4   : > { %1282 = vmatpush.bf16.msra.mxu0 %v3421_v22  ;;  %3456 = vmatpush.bf16.msra.mxu3 %v3421_v22  ;;  %v3420_v23 = vld [vmem:[%s3866_s0 + $0x30] sm:$0xff]  ;;  %v3418_v25 = vld [vmem:[%s3866_s0 + $0x20] sm:$0xff]  ;;  %v3417_v26 = vld [vmem:[%s3866_s0 + $0x18] sm:$0xff]  ;;  %s3717_s25 = smov 64   ;;  %s4923_s26 = sld [smem:[#allocation12_spill]] }
  0xd5   : > { %v999_v51 = vld [vmem:[#allocation2] sm:$0xff]  ;;  %v3416_v29 = vld [vmem:[%s3866_s0 + $0x10] sm:$0xff]  ;;  %v3415_v36 = vld [vmem:[%s3866_s0 + $0x8] sm:$0xff]  ;;  %s4924_s21 = sld [smem:[#allocation13_spill]]  ;;  %s4926_s18 = scalar_lea.vmem %s4873_s12, %s3851_s24 }
  0xd6   : > { %v1000_v47 = vld [vmem:[#allocation2 + $0x18] sm:$0xff]  ;;  %v3414_v44 = vld [vmem:[%s3866_s0] sm:$0xff]  ;;  %s4927_s10 = scalar_lea.vmem %s4874_s13, %s3851_s24  ;;  %s4928_s5 = scalar_lea.vmem %s4876_s15, %s3851_s24 }
  0xd7   : > { %1012 = vadd.xlane.f32.xlu1 %v1000_v47  ;;  %v1003_v49 = vld [vmem:[#allocation2 + $0x20] sm:$0xff]  ;;  %p3365_p5 = scmp.ne.s32.totalorder %s3845_s30, 1 }
  0xd8   : > { %v1004_v53 = vld [vmem:[#allocation2 + $0x28] sm:$0xff]  ;;  %1283 = vmatpush.bf16.msra.mxu0 %v3420_v23  ;;  %3457 = vmatpush.bf16.msra.mxu3 %v3420_v23  ;;  %s4918_s28 = scalar_lea.vmem %s4917_s2, %s3851_s24  ;;  %s4922_s2 = sld [smem:[#allocation11_spill]] }
  0xdb   : > { %1018 = vadd.xlane.f32.xlu2 %v1003_v49  ;;  %1010 = vadd.xlane.f32.xlu0 %v999_v51 }
  0xdc   : > { %1284 = vmatpush.bf16.msra.mxu0 %v3419_v24  ;;  %3458 = vmatpush.bf16.msra.mxu3 %v3419_v24 }
  0xdf   : > { %1014 = vadd.xlane.f32.xlu1 %v1001_v50 }
  0xe0   : > { %1285 = vmatpush.bf16.msra.mxu0 %v3418_v25  ;;  %3459 = vmatpush.bf16.msra.mxu3 %v3418_v25 }
  0xe3   : > { %1020 = vadd.xlane.f32.xlu0 %v1004_v53 }
  0xe4   : > { %1286 = vmatpush.bf16.msra.mxu0 %v3417_v26  ;;  %3460 = vmatpush.bf16.msra.mxu3 %v3417_v26 }
  0xe7   : > { %1022 = vadd.xlane.f32.xlu1 %v1005_v52 }
  0xe8   : > { %1287 = vmatpush.bf16.msra.mxu0 %v3416_v29  ;;  %3461 = vmatpush.bf16.msra.mxu3 %v3416_v29 }
  0xec   : > { %1288 = vmatpush.bf16.msra.mxu0 %v3415_v36  ;;  %3462 = vmatpush.bf16.msra.mxu3 %v3415_v36 }
  0xf0   : > { %1289 = vmatpush.bf16.msra.mxu0 %v3414_v44  ;;  %3463 = vmatpush.bf16.msra.mxu3 %v3414_v44 }
 0x146   : > { %v1017_v54 = vpop.xlane.xlu2 %1016  ;;  %v1009_v57 = vpop.xlane.xlu0 %1008 }
 0x147   : > { %v1024_v58 = vmul.f32 0.03125, %v1009_v57  ;;  %v3978_v10 = vmul.f32 0.03125, %v1017_v54 }
 0x149   : > { %v3962_v60 = vsub.f32 %v998_v48, %v1024_v58  ;;  %v3983_v14 = vsub.f32 %v1002_v46, %v3978_v10  ;;  %v1064_v28 = vmul.f32 %v1024_v58, %v1024_v58 }
 0x14a   : > { %v1013_v55 = vpop.xlane.xlu1 %1012 }
 0x14b   : > { %v1026_v56 = vmul.f32 0.03125, %v1013_v55  ;;  %v1040_v62 = vmul.f32 %v3962_v60, %v3962_v60  ;;  %v1044_v18 = vmul.f32 %v3983_v14, %v3983_v14  ;;  %v1072_v32 = vmul.f32 96.0, %v1064_v28 }
 0x14c   : > { %v1068_v55 = vmul.f32 %v3978_v10, %v3978_v10 }
 0x14d   : > { %v3960_v59 = vsub.f32 %v1000_v47, %v1026_v56  ;;  %1048 = vadd.xlane.f32.xlu2 %v1040_v62  ;;  %v1066_v27 = vmul.f32 %v1026_v56, %v1026_v56 }
 0x14e   : > { %v1019_v63 = vpop.xlane.xlu2 %1018  ;;  %v1011_v3 = vpop.xlane.xlu0 %1010 }
 0x14f   : > { %v1042_v61 = vmul.f32 %v3960_v59, %v3960_v59  ;;  %v1029_v1 = vmul.f32 0.03125, %v1019_v63  ;;  %v1025_v4 = vmul.f32 0.03125, %v1011_v3  ;;  %v1074_v30 = vmul.f32 96.0, %v1066_v27 }
 0x151   : > { %1052 = vadd.xlane.f32.xlu1 %v1042_v61  ;;  %v3968_v5 = vsub.f32 %v1003_v49, %v1029_v1  ;;  %v3972_v7 = vsub.f32 %v999_v51, %v1025_v4  ;;  %v1069_v37 = vmul.f32 %v1029_v1, %v1029_v1  ;;  %v1065_v40 = vmul.f32 %v1025_v4, %v1025_v4 }
 0x152   : > { %v1015_v0 = vpop.xlane.xlu1 %1014 }
 0x153   : > { %v1027_v2 = vmul.f32 0.03125, %v1015_v0  ;;  %v1045_v8 = vmul.f32 %v3968_v5, %v3968_v5  ;;  %v1041_v11 = vmul.f32 %v3972_v7, %v3972_v7  ;;  %v1077_v45 = vmul.f32 96.0, %v1069_v37 }
 0x154   : > { %v1073_v48 = vmul.f32 96.0, %v1065_v40 }
 0x155   : > { %v3970_v6 = vsub.f32 %v1001_v50, %v1027_v2  ;;  %1050 = vadd.xlane.f32.xlu0 %v1041_v11  ;;  %v1067_v39 = vmul.f32 %v1027_v2, %v1027_v2 }
 0x156   : > { %v1021_v12 = vpop.xlane.xlu0 %1020 }
 0x157   : > { %v1043_v9 = vmul.f32 %v3970_v6, %v3970_v6  ;;  %v1030_v15 = vmul.f32 0.03125, %v1021_v12  ;;  %v1075_v47 = vmul.f32 96.0, %v1067_v39 }
 0x159   : > { %1058 = vadd.xlane.f32.xlu1 %v1045_v8  ;;  %1054 = vadd.xlane.f32.xlu2 %v1043_v9  ;;  %v3985_v16 = vsub.f32 %v1004_v53, %v1030_v15  ;;  %v1070_v56 = vmul.f32 %v1030_v15, %v1030_v15  ;;  %v1076_v9 = vmul.f32 96.0, %v1068_v55 }
 0x15a   : > { %v1023_v13 = vpop.xlane.xlu1 %1022 }
 0x15b   : > { %v3987_v17 = vmul.f32 0.03125, %v1023_v13  ;;  %v1046_v19 = vmul.f32 %v3985_v16, %v3985_v16  ;;  %v1078_v8 = vmul.f32 96.0, %v1070_v56 }
 0x15d   : > { %1056 = vadd.xlane.f32.xlu0 %v1044_v18  ;;  %v3994_v20 = vsub.f32 %v1005_v52, %v3987_v17  ;;  %v1071_v10 = vmul.f32 %v3987_v17, %v3987_v17 }
 0x15f   : > { %v1047_v21 = vmul.f32 %v3994_v20, %v3994_v20  ;;  %v1079_v27 = vmul.f32 96.0, %v1071_v10 }
 0x161   : > { %1060 = vadd.xlane.f32.xlu2 %v1046_v19 }
 0x165   : > { %1062 = vadd.xlane.f32.xlu0 %v1047_v21 }
 0x1c0   : > { %v1049_v34 = vpop.xlane.xlu2 %1048 }
 0x1c1   : > { %v1080_v35 = vsub.f32 %v1049_v34, %v1072_v32 }
 0x1c3   : > { %v1088_v41 = vmul.f32 0.03125, %v1080_v35 }
 0x1c4   : > { %v1053_v31 = vpop.xlane.xlu1 %1052 }
 0x1c5   : > { %v1082_v33 = vsub.f32 %v1053_v31, %v1074_v30  ;;  %v1096_v43 = vadd.f32 1e-05, %v1088_v41 }
 0x1c7   : > { %v1090_v38 = vmul.f32 0.03125, %v1082_v33  ;;  %vm1110_vm4 = vweird.f32 %v1096_v43 }
 0x1c8   : > { %v1051_v51 = vpop.xlane.xlu0 %1050 }
 0x1c9   : > { %v4005_v42 = vadd.f32 1e-05, %v1090_v38  ;;  %v1081_v53 = vsub.f32 %v1051_v51, %v1073_v48 }
 0x1cb   : > { %3581 = vrsqrt.f32 %v4005_v42  ;;  %v1089_v58 = vmul.f32 0.03125, %v1081_v53  ;;  %vm1130_vm5 = vweird.f32 %v4005_v42 }
 0x1cc   : > { %3583 = vrsqrt.f32 %v1096_v43  ;;  %v1059_v46 = vpop.xlane.xlu1 %1058  ;;  %v1055_v50 = vpop.xlane.xlu2 %1054 }
 0x1cd   : > { %v1085_v49 = vsub.f32 %v1059_v46, %v1077_v45  ;;  %v1083_v52 = vsub.f32 %v1055_v50, %v1075_v47  ;;  %v4019_v2 = vadd.f32 1e-05, %v1089_v58 }
 0x1cf   : > { %v1093_v54 = vmul.f32 0.03125, %v1085_v49  ;;  %v1091_v57 = vmul.f32 0.03125, %v1083_v52  ;;  %v4065_v52 = vld [vmem:[%s4918_s28] ss:$0 sm:$0xff]  ;;  %vm1120_vm12 = vweird.f32 %v4019_v2 }
 0x1d0   : > { %v1057_v13 = vpop.xlane.xlu0 %1056 }
 0x1d1   : > { %v4011_v61 = vpop.eup %3581  ;;  %v4013_v62 = vadd.f32 1e-05, %v1093_v54  ;;  %v4017_v1 = vadd.f32 1e-05, %v1091_v57  ;;  %v1084_v19 = vsub.f32 %v1057_v13, %v1076_v9 }
 0x1d2   : > { %v3584_v63 = vpop.eup %3583  ;;  %v1125_v0 = vmul.f32 %v4011_v61, %v4005_v42  ;;  %vm1131_vm2 = vweird.f32 %v4011_v61 }
 0x1d3   : > { %v1105_v3 = vmul.f32 %v3584_v63, %v1096_v43  ;;  %3585 = vrsqrt.f32 %v4013_v62  ;;  %v1092_v24 = vmul.f32 0.03125, %v1084_v19  ;;  %vm1111_vm3 = vweird.f32 %v3584_v63  ;;  %vm4049_vm7 = vmor %vm1130_vm5, %vm1131_vm2 }
 0x1d4   : > { %v1126_v4 = vmul.f32 %v4011_v61, %v1125_v0  ;;  %3587 = vrsqrt.f32 %v4017_v1  ;;  %v1061_v12 = vpop.xlane.xlu2 %1060  ;;  %vm4042_vm6 = vmor %vm1110_vm4, %vm1111_vm3  ;;  %vm1140_vm8 = vweird.f32 %v4017_v1  ;;  %vm1160_vm14 = vweird.f32 %v4013_v62 }
 0x1d5   : > { %v1106_v11 = vmul.f32 %v3584_v63, %v1105_v3  ;;  %3589 = vrsqrt.f32 %v4019_v2  ;;  %v1086_v18 = vsub.f32 %v1061_v12, %v1078_v8  ;;  %v4036_v34 = vadd.f32 1e-05, %v1092_v24 }
 0x1d6   : > { %v1127_v15 = vmul.f32 0.5, %v1126_v4 }
 0x1d7   : > { %v1107_v21 = vmul.f32 0.5, %v1106_v11  ;;  %v1094_v23 = vmul.f32 0.03125, %v1086_v18  ;;  %vm1150_vm3 = vweird.f32 %v4036_v34 }
 0x1d8   : > { %v1128_v22 = vsub.f32 1.5, %v1127_v15  ;;  %v1063_v39 = vpop.xlane.xlu0 %1062 }
 0x1d9   : > { %v4027_v25 = vpop.eup %3585  ;;  %v1108_v26 = vsub.f32 1.5, %v1107_v21  ;;  %v4032_v29 = vadd.f32 1e-05, %v1094_v23  ;;  %v1087_v44 = vsub.f32 %v1063_v39, %v1079_v27 }
 0x1da   : > { %v3588_v28 = vpop.eup %3587  ;;  %v1155_v17 = vmul.f32 %v4027_v25, %v4013_v62  ;;  %v1129_v31 = vmul.f32 %v4011_v61, %v1128_v22  ;;  %vm1161_vm11 = vweird.f32 %v4027_v25 }
 0x1db   : > { %v3590_v30 = vpop.eup %3589  ;;  %v1109_v32 = vmul.f32 %v3584_v63, %v1108_v26  ;;  %v1135_v33 = vmul.f32 %v3588_v28, %v4017_v1  ;;  %3591 = vrsqrt.f32 %v4032_v29  ;;  %v1095_v49 = vmul.f32 0.03125, %v1087_v44  ;;  %vm4089_vm0 = vmor %vm1160_vm14, %vm1161_vm11 }
 0x1dc   : > { %v1156_v35 = vmul.f32 %v4027_v25, %v1155_v17  ;;  %v1115_v36 = vmul.f32 %v3590_v30, %v4019_v2  ;;  %3593 = vrsqrt.f32 %v4036_v34  ;;  %v1133_v46 = vsel %vm4049_vm7, %v4011_v61, %v1129_v31  ;;  %v3574_v2 = vld [vmem:[%s4919_s27] ss:$0 sm:$0xff]  ;;  %s4925_s27 = scalar_lea.vmem %s4872_s11, %s3851_s24 }
 0x1dd   : > { %v1136_v38 = vmul.f32 %v3588_v28, %v1135_v33  ;;  %v1113_v42 = vsel %vm4042_vm6, %v3584_v63, %v1109_v32  ;;  %vm1141_vm9 = vweird.f32 %v3588_v28  ;;  %vm1121_vm10 = vweird.f32 %v3590_v30 }
 0x1de   : > { %v1157_v41 = vmul.f32 0.5, %v1156_v35  ;;  %v1116_v43 = vmul.f32 %v3590_v30, %v1115_v36  ;;  %v1184_v51 = vmul.f32 %v1113_v42, %v3962_v60  ;;  %v4067_v55 = vadd.f32 1e-05, %v1095_v49  ;;  %vm1142_vm13 = vmor %vm1140_vm8, %vm1141_vm9 }
 0x1df   : > { %v1137_v45 = vmul.f32 0.5, %v1136_v38  ;;  %v1186_v56 = vmul.f32 %v1133_v46, %v3960_v59  ;;  %vm1122_vm15 = vmor %vm1120_vm12, %vm1121_vm10  ;;  %vm1170_vm4 = vweird.f32 %v4032_v29  ;;  %vm1420_vm10 = vcmask 261120  }
 0x1e0   : > { %v1158_v47 = vsub.f32 1.5, %v1157_v41  ;;  %v1117_v48 = vmul.f32 0.5, %v1116_v43  ;;  %3595 = vrsqrt.f32 %v4067_v55  ;;  %v1195_v3 = vmul.f32 %v4065_v52, %v1184_v51 }
 0x1e1   : > { %v1138_v50 = vsub.f32 1.5, %v1137_v45  ;;  %v3592_v53 = vpop.eup %3591  ;;  %v1197_v10 = vmul.f32 %v4065_v52, %v1186_v56  ;;  %vm1180_vm8 = vweird.f32 %v4067_v55  ;;  %vm1430_vm11 = vcmask 785408  }
 0x1e2   : > { %v1118_v54 = vsub.f32 1.5, %v1117_v48  ;;  %v3594_v57 = vpop.eup %3593  ;;  %v1165_v60 = vmul.f32 %v3592_v53, %v4032_v29  ;;  %v1159_v61 = vmul.f32 %v4027_v25, %v1158_v47  ;;  %vm1171_vm1 = vweird.f32 %v3592_v53 }
 0x1e3   : > { %v1139_v58 = vmul.f32 %v3588_v28, %v1138_v50  ;;  %v1145_v0 = vmul.f32 %v3594_v57, %v4036_v34  ;;  %v1206_v21 = vadd.f32 %v3574_v2, %v1195_v3  ;;  %vm1151_vm2 = vweird.f32 %v3594_v57  ;;  %vm1172_vm6 = vmor %vm1170_vm4, %vm1171_vm1 }
 0x1e4   : > { %v1119_v63 = vmul.f32 %v3590_v30, %v1118_v54  ;;  %v1166_v59 = vmul.f32 %v3592_v53, %v1165_v60  ;;  %v1163_v15 = vsel %vm4089_vm0, %v4027_v25, %v1159_v61  ;;  %v1208_v24 = vadd.f32 %v3574_v2, %v1197_v10  ;;  %vm1152_vm5 = vmor %vm1150_vm3, %vm1151_vm2 }
 0x1e5   : > { %v1143_v4 = vsel %vm1142_vm13, %v3588_v28, %v1139_v58  ;;  %v1146_v8 = vmul.f32 %v3594_v57, %v1145_v0  ;;  %v1189_v17 = vmul.f32 %v1163_v15, %v3968_v5  ;;  %vm1425_vm12 = vcmask 523264  }
 0x1e6   : > { %v1123_v1 = vsel %vm1122_vm15, %v3590_v30, %v1119_v63  ;;  %v1187_v9 = vmul.f32 %v1143_v4, %v3970_v6  ;;  %v1167_v11 = vmul.f32 0.5, %v1166_v59  ;;  %v3596_v22 = vpop.eup %3595 }
 0x1e7   : > { %v1185_v12 = vmul.f32 %v1123_v1, %v3972_v7  ;;  %v1147_v13 = vmul.f32 0.5, %v1146_v8  ;;  %v1175_v7 = vmul.f32 %v3596_v22, %v4067_v55  ;;  %v1200_v37 = vmul.f32 %v4065_v52, %v1189_v17 }
 0x1e8   : > { %v1198_v18 = vmul.f32 %v4065_v52, %v1187_v9  ;;  %v1168_v19 = vsub.f32 1.5, %v1167_v11  ;;  %vm1181_vm7 = vweird.f32 %v3596_v22 }
 0x1e9   : > { %v1196_v6 = vmul.f32 %v4065_v52, %v1185_v12  ;;  %v1148_v23 = vsub.f32 1.5, %v1147_v13  ;;  %v1176_v31 = vmul.f32 %v3596_v22, %v1175_v7  ;;  %v1211_v41 = vadd.f32 %v3574_v2, %v1200_v37  ;;  %vm1182_vm9 = vmor %vm1180_vm8, %vm1181_vm7 }
 0x1ea   : > { %v1209_v26 = vadd.f32 %v3574_v2, %v1198_v18  ;;  %v1169_v27 = vmul.f32 %v3592_v53, %v1168_v19 }
 0x1eb   : > { %v1207_v28 = vadd.f32 %v3574_v2, %v1196_v6  ;;  %v1149_v30 = vmul.f32 %v3594_v57, %v1148_v23  ;;  %v1177_v35 = vmul.f32 0.5, %v1176_v31 }
 0x1ec   : > { %v1215_v25 = vpack.c.bf16 %v1209_v26, %v1208_v24  ;;  %v1173_v38 = vsel %vm1172_vm6, %v3592_v53, %v1169_v27 }
 0x1ed   : > { %v1214_v32 = vpack.c.bf16 %v1207_v28, %v1206_v21  ;;  %v1153_v33 = vsel %vm1152_vm5, %v3594_v57, %v1149_v30  ;;  %v1178_v5 = vsub.f32 1.5, %v1177_v35  ;;  %v1190_v39 = vmul.f32 %v1173_v38, %v3985_v16  ;;  %v4161_v21 = vld [vmem:[%s4922_s2 + $0x18] sm:$0xff]  ;;  %v4171_v28 = vld [vmem:[%s4922_s2 + $0x10] sm:$0xff]  ;;  %v4188_v38 = vld [vmem:[%s4922_s2] sm:$0xff] }
 0x1ee   : > { %v1188_v36 = vmul.f32 %v1153_v33, %v3983_v14  ;;  %v4180_v33 = vld [vmem:[%s4922_s2 + $0x8] sm:$0xff] }
 0x1ef   : > { %1290 = vmatmul.bf16.vlgmr.msra.gmra.mxu0 %v1214_v32  ;;  %v1179_v29 = vmul.f32 %v3596_v22, %v1178_v5  ;;  %v1201_v14 = vmul.f32 %v4065_v52, %v1190_v39 }
 0x1f0   : > { %v1199_v34 = vmul.f32 %v4065_v52, %v1188_v36 }
 0x1f1   : > { %v1183_v44 = vsel %vm1182_vm9, %v3596_v22, %v1179_v29  ;;  %v1212_v46 = vadd.f32 %v3574_v2, %v1201_v14  ;;  %v1330_v14 = vld [vmem:[%s4923_s26 + $0x78] sm:$0xff] }
 0x1f2   : > { %v1210_v40 = vadd.f32 %v3574_v2, %v1199_v34  ;;  %v1191_v42 = vmul.f32 %v1183_v44, %v3994_v20  ;;  %v1326_v44 = vld [vmem:[%s4923_s26 + $0x58] sm:$0xff]  ;;  %1680 = vmatpush.msrb.mxu3 %v1330_v14 }
 0x1f4   : > { %v1216_v43 = vpack.c.bf16 %v1211_v41, %v1210_v40  ;;  %v1202_v45 = vmul.f32 %v4065_v52, %v1191_v42  ;;  %v4209_v40 = vld [vmem:[%s4923_s26] sm:$0xff]  ;;  %v4228_v42 = vld [vmem:[%s4923_s26 + $0x48] sm:$0xff] }
 0x1f6   : > { %1300 = vmatmul.bf16.vlgmr.msra.gmra.mxu3 %v1216_v43  ;;  %v1213_v47 = vadd.f32 %v3574_v2, %v1202_v45  ;;  %v1322_v45 = vld [vmem:[%s4923_s26 + $0x38] sm:$0xff] }
 0x1f8   : > { %v1217_v48 = vpack.c.bf16 %v1213_v47, %v1212_v46  ;;  %v1329_v46 = vld [vmem:[%s4923_s26 + $0x70] sm:$0xff]  ;;  %v1320_v47 = vld [vmem:[%s4923_s26 + $0x28] sm:$0xff] }
 0x1f9   : > { %1681 = vmatpush.msrb.mxu3 %v1329_v46 }
 0x1ff   : > { %1295 = vmatmul.bf16.gmra.mxu0 %v1215_v25 }
 0x206   : > { %1305 = vmatmul.bf16.gmra.mxu3 %v1217_v48  ;;  %v1328_v48 = vld [vmem:[%s4923_s26 + $0x68] sm:$0xff] }
 0x207   : > { %1682 = vmatpush.msrb.mxu3 %v1328_v48 }
 0x26c   : > { %v4112_v16 = vpop.f32.mrf.mxu0 }
 0x26d   : > { %1336 = vrot.lane.b32.xlu1 %v4112_v16, %s3715_s6 }
 0x274   : > { %v4116_v49 = vpop.f32.mrf.mxu0 }
 0x275   : > { %1338 = vrot.lane.b32.xlu2 %v4116_v49, %s3715_s6 }
 0x279   : > { %v4120_v20 = vpop.f32.mrf.mxu3 }
 0x27a   : > { %1725 = vrot.lane.b32.xlu1 %v4120_v20, %s3715_s6 }
 0x27c   : > { %v4128_v51 = vpop.f32.mrf.mxu0 }
 0x281   : > { %v4124_v50 = vpop.f32.mrf.mxu3 }
 0x282   : > { %1727 = vrot.lane.b32.xlu0 %v4124_v50, %s3715_s6 }
 0x284   : > { %v4136_v53 = vpop.f32.mrf.mxu0 }
 0x289   : > { %v4130_v52 = vpop.f32.mrf.mxu3 }
 0x28a   : > { %1340 = vrot.lane.b32.xlu0 %v4128_v51, %s3715_s6  ;;  %1729 = vrot.lane.b32.xlu2 %v4130_v52, %s3715_s6 }
 0x291   : > { %v4138_v54 = vpop.f32.mrf.mxu3 }
 0x292   : > { %1342 = vrot.lane.b32.xlu2 %v4136_v53, %s3715_s6  ;;  %1731 = vrot.lane.b32.xlu1 %v4138_v54, %s3715_s6 }
 0x2cf   : > { %v1339_v56 = vpop.permute.xlu2 %1338 }
 0x2df   : > { %v1337_v55 = vpop.permute.xlu1 %1336 }
 0x2e0   : > { %1348 = vxpose.xlu0.b32.start [1/4] (short) (narrow) %v1337_v55, 32  ;;  %v1318_v55 = vld [vmem:[%s4923_s26 + $0x18] sm:$0xff] }
 0x2e4   : > { %v1730_v58 = vpop.permute.xlu2 %1729 }
 0x2e8   : > { %1349 = vxpose.xlu0.b32.cont [2/4] (short) (narrow) %v1339_v56, 32  ;;  %v1327_v56 = vld [vmem:[%s4923_s26 + $0x60] sm:$0xff] }
 0x2e9   : > { %1683 = vmatpush.msrb.mxu3 %v1327_v56 }
 0x2eb   : > { %1684 = vmatpush.msrb.mxu3 %v1326_v44 }
 0x2ec   : > { %v1343_v61 = vpop.permute.xlu2 %1342  ;;  %v1726_v2 = vpop.permute.xlu1 %1725 }
 0x2f4   : > { %v1728_v57 = vpop.permute.xlu0 %1727 }
 0x2fc   : > { %v1341_v60 = vpop.permute.xlu0 %1340 }
 0x2fd   : > { %1350 = vxpose.xlu0.b32.cont [3/4] (short) (narrow) %v1341_v60, 32  ;;  %v1323_v60 = vld [vmem:[%s4923_s26 + $0x40] sm:$0xff] }
 0x304   : > { %v1732_v1 = vpop.permute.xlu1 %1731 }
 0x305   : > { %1351 = vxpose.xlu0.b32.end [4/4] (short) (narrow) %v1343_v61, 32 }
 0x391   : > { %v1364_v63 = vpop.trf.xlu0 }
 0x392   : > { %1384 = vrot.lane.b32.xlu2 %v1364_v63, %s3716_s3 }
 0x399   : > { %v1365_v0 = vpop.trf.xlu0 }
 0x39a   : > { %1396 = vrot.lane.b32.xlu2 %v1364_v63, %s3717_s25  ;;  %1386 = vrot.lane.b32.xlu1 %v1365_v0, %s3716_s3 }
 0x3a1   : > { %v1366_v59 = vpop.trf.xlu0 }
 0x3a2   : > { %1398 = vrot.lane.b32.xlu1 %v1365_v0, %s3717_s25  ;;  %1388 = vrot.lane.b32.xlu2 %v1366_v59, %s3716_s3 }
 0x3a9   : > { %v1367_v3 = vpop.trf.xlu0 }
 0x3aa   : > { %1410 = vrot.lane.b32.xlu1 %v1365_v0, %s3715_s6  ;;  %1400 = vrot.lane.b32.xlu2 %v1366_v59, %s3717_s25 }
 0x3b2   : > { %1412 = vrot.lane.b32.xlu2 %v1366_v59, %s3715_s6  ;;  %1402 = vrot.lane.b32.xlu1 %v1367_v3, %s3717_s25 }
 0x3ba   : > { %1414 = vrot.lane.b32.xlu1 %v1367_v3, %s3715_s6  ;;  %1390 = vrot.lane.b32.xlu2 %v1367_v3, %s3716_s3 }
 0x3c2   : > { %1408 = vrot.lane.b32.xlu2 %v1364_v63, %s3715_s6 }
 0x3ec   : > { %v1385_v4 = vpop.permute.xlu2 %1384 }
 0x3ed   : > { %v1421_v31 = vsel %vm1420_vm10, %v1364_v63, %v1385_v4  ;;  %v1321_v63 = vld [vmem:[%s4923_s26 + $0x30] sm:$0xff] }
 0x3ef   : > { %1737 = vxpose.xlu1.b32.start [1/4] (short) (narrow) %v1726_v2, 32  ;;  %v1319_v2 = vld [vmem:[%s4923_s26 + $0x20] sm:$0xff] }
 0x3f4   : > { %v1397_v8 = vpop.permute.xlu2 %1396 }
 0x3f5   : > { %v1426_v35 = vsel %vm1425_vm12, %v1421_v31, %v1397_v8  ;;  %v1317_v8 = vld [vmem:[%s4923_s26 + $0x10] sm:$0xff] }
 0x3f7   : > { %1738 = vxpose.xlu1.b32.cont [2/4] (short) (narrow) %v1728_v57, 32  ;;  %v1316_v57 = vld [vmem:[%s4923_s26 + $0x8] sm:$0xff] }
 0x3fc   : > { %v1389_v9 = vpop.permute.xlu2 %1388 }
 0x3fd   : > { %v1423_v19 = vsel %vm1420_vm10, %v1366_v59, %v1389_v9 }
 0x3ff   : > { %1739 = vxpose.xlu1.b32.cont [3/4] (short) (narrow) %v1730_v58, 32  ;;  %v1325_v58 = vld [vmem:[%s4923_s26 + $0x50] sm:$0xff] }
 0x400   : > { %1685 = vmatpush.msrb.mxu3 %v1325_v58 }
 0x402   : > { %1686 = vmatpush.msrb.mxu3 %v4228_v42 }
 0x404   : > { %v1401_v62 = vpop.permute.xlu2 %1400  ;;  %1687 = vmatpush.msrb.mxu3 %v1323_v60 }
 0x405   : > { %v1428_v22 = vsel %vm1425_vm12, %v1423_v19, %v1401_v62 }
 0x406   : > { %1688 = vmatpush.msrb.mxu3 %v1322_v45 }
 0x407   : > { %1740 = vxpose.xlu1.b32.end [4/4] (short) (narrow) %v1732_v1, 32 }
 0x408   : > { %1689 = vmatpush.msrb.mxu3 %v1321_v63 }
 0x40a   : > { %1690 = vmatpush.msrb.mxu3 %v1320_v47 }
 0x40c   : > { %v1387_v10 = vpop.permute.xlu1 %1386  ;;  %v1413_v12 = vpop.permute.xlu2 %1412  ;;  %1691 = vmatpush.msrb.mxu3 %v1319_v2 }
 0x40d   : > { %v1422_v26 = vsel %vm1420_vm10, %v1365_v0, %v1387_v10  ;;  %v1433_v27 = vsel %vm1430_vm11, %v1428_v22, %v1413_v12 }
 0x40e   : > { %v1437_v36 = vmul.f32 %v1433_v27, %v4171_v28  ;;  %1692 = vmatpush.msrb.mxu3 %v1318_v55 }
 0x410   : > { %1693 = vmatpush.msrb.mxu3 %v1317_v8 }
 0x412   : > { %1694 = vmatpush.msrb.mxu3 %v1316_v57 }
 0x414   : > { %v1399_v11 = vpop.permute.xlu1 %1398  ;;  %v1391_v15 = vpop.permute.xlu2 %1390  ;;  %1695 = vmatpush.msrb.mxu3 %v4209_v40 }
 0x415   : > { %v1424_v6 = vsel %vm1420_vm10, %v1367_v3, %v1391_v15  ;;  %v1427_v17 = vsel %vm1425_vm12, %v1422_v26, %v1399_v11 }
 0x416   : > { %1999 = vmatpush.msra.mxu3 %v1330_v14 }
 0x418   : > { %2000 = vmatpush.msra.mxu3 %v1329_v46 }
 0x41a   : > { %2001 = vmatpush.msra.mxu3 %v1328_v48 }
 0x41c   : > { %v1411_v13 = vpop.permute.xlu1 %1410  ;;  %v1409_v30 = vpop.permute.xlu2 %1408  ;;  %2002 = vmatpush.msra.mxu3 %v1327_v56 }
 0x41d   : > { %v1432_v32 = vsel %vm1430_vm11, %v1427_v17, %v1411_v13  ;;  %v1431_v37 = vsel %vm1430_vm11, %v1426_v35, %v1409_v30 }
 0x41e   : > { %v1436_v5 = vmul.f32 %v1432_v32, %v4180_v33  ;;  %v1435_v34 = vmul.f32 %v1431_v37, %v4188_v38  ;;  %2003 = vmatpush.msra.mxu3 %v1326_v44 }
 0x420   : > { %2004 = vmatpush.msra.mxu3 %v1325_v58 }
 0x422   : > { %2005 = vmatpush.msra.mxu3 %v4228_v42 }
 0x424   : > { %v1403_v18 = vpop.permute.xlu1 %1402  ;;  %2006 = vmatpush.msra.mxu3 %v1323_v60 }
 0x425   : > { %v1429_v23 = vsel %vm1425_vm12, %v1424_v6, %v1403_v18 }
 0x426   : > { %2007 = vmatpush.msra.mxu3 %v1322_v45 }
 0x428   : > { %2008 = vmatpush.msra.mxu3 %v1321_v63 }
 0x42a   : > { %2009 = vmatpush.msra.mxu3 %v1320_v47 }
 0x42c   : > { %v1415_v24 = vpop.permute.xlu1 %1414  ;;  %2010 = vmatpush.msra.mxu3 %v1319_v2 }
 0x42d   : > { %v1434_v7 = vsel %vm1430_vm11, %v1429_v23, %v1415_v24 }
 0x42e   : > { %v1438_v25 = vmul.f32 %v1434_v7, %v4161_v21  ;;  %2011 = vmatpush.msra.mxu3 %v1318_v55 }
 0x430   : > { %1459 = vmatpush.msra.mxu1 %v1438_v25  ;;  %2012 = vmatpush.msra.mxu3 %v1317_v8 }
 0x432   : > { %1460 = vmatpush.msra.mxu1 %v1437_v36  ;;  %2013 = vmatpush.msra.mxu3 %v1316_v57 }
 0x434   : > { %1461 = vmatpush.msra.mxu1 %v1436_v5  ;;  %2014 = vmatpush.msra.mxu3 %v4209_v40 }
 0x436   : > { %1462 = vmatpush.msra.mxu1 %v1435_v34 }
 0x437   : > { %3273 = vmatmul.msk.f32.vlgmr.msra.gmra.mxu1 %vm1420_vm10, %v4112_v16 }
 0x43f   : > { %3274 = vmatmul.msk.f32.gmra.mxu1 %vm1420_vm10, %v4116_v49 }
 0x447   : > { %3275 = vmatmul.msk.f32.gmra.mxu1 %vm1420_vm10, %v4128_v51 }
 0x44f   : > { %3276 = vmatmul.msk.f32.gmra.mxu1 %vm1420_vm10, %v4136_v53 }
 0x493   : > { %v4200_v39 = vpop.trf.xlu1 }
 0x49b   : > { %v4202_v29 = vpop.trf.xlu1 }
 0x49c   : > { %1799 = vrot.lane.b32.xlu1 %v4202_v29, %s3715_s6 }
 0x4a3   : > { %v1755_v41 = vpop.trf.xlu1 }
 0x4a4   : > { %1523 = vrot.lane.b32.xlu1 %v4209_v40, %s3717_s25  ;;  %1777 = vrot.lane.b32.xlu2 %v1755_v41, %s3716_s3 }
 0x4ab   : > { %v4214_v43 = vpop.trf.xlu1 }
 0x4ac   : > { %1779 = vrot.lane.b32.xlu0 %v4214_v43, %s3716_s3  ;;  %1789 = vrot.lane.b32.xlu2 %v1755_v41, %s3717_s25 }
 0x4b4   : > { %1545 = vrot.lane.b32.xlu0 %v1326_v44, %s3717_s25  ;;  %1775 = vrot.lane.b32.xlu2 %v4202_v29, %s3716_s3 }
 0x4bc   : > { %1541 = vrot.lane.b32.xlu0 %v4228_v42, %s3717_s25  ;;  %1801 = vrot.lane.b32.xlu2 %v1755_v41, %s3715_s6 }
 0x4c4   : > { %1537 = vrot.lane.b32.xlu0 %v1322_v45, %s3717_s25  ;;  %1787 = vrot.lane.b32.xlu2 %v4202_v29, %s3717_s25 }
 0x4cc   : > { %1533 = vrot.lane.b32.xlu0 %v1320_v47, %s3717_s25  ;;  %1773 = vrot.lane.b32.xlu2 %v4200_v39, %s3716_s3  ;;  %s4931_s3 = sld [smem:[#allocation18_spill]] (!%p3365_p5) }
 0x4d4   : > { %1529 = vrot.lane.b32.xlu0 %v1318_v55, %s3717_s25  ;;  %1785 = vrot.lane.b32.xlu2 %v4200_v39, %s3717_s25 }
 0x4dc   : > { %1525 = vrot.lane.b32.xlu0 %v1316_v57, %s3717_s25  ;;  %1797 = vrot.lane.b32.xlu2 %v4200_v39, %s3715_s6 }
 0x4e4   : > { %1553 = vrot.lane.b32.xlu2 %v1330_v14, %s3717_s25 }
 0x4ec   : > { %1551 = vrot.lane.b32.xlu2 %v1329_v46, %s3717_s25 }
 0x4f4   : > { %1549 = vrot.lane.b32.xlu2 %v1328_v48, %s3717_s25 }
 0x4fc   : > { %1547 = vrot.lane.b32.xlu2 %v1327_v56, %s3717_s25 }
 0x4fe   : > { %v1778_v61 = vpop.permute.xlu2 %1777 }
 0x4ff   : > { %v1811_v0 = vsel %vm1420_vm10, %v1755_v41, %v1778_v61 }
 0x504   : > { %1543 = vrot.lane.b32.xlu2 %v1325_v58, %s3717_s25 }
 0x506   : > { %v1790_v59 = vpop.permute.xlu2 %1789 }
 0x507   : > { %v1815_v3 = vsel %vm1425_vm12, %v1811_v0, %v1790_v59 }
 0x50c   : > { %1791 = vrot.lane.b32.xlu2 %v4214_v43, %s3717_s25 }
 0x50e   : > { %v1776_v4 = vpop.permute.xlu2 %1775  ;;  %v1800_v7 = vpop.permute.xlu1 %1799 }
 0x50f   : > { %v1810_v10 = vsel %vm1420_vm10, %v4202_v29, %v1776_v4 }
 0x514   : > { %1803 = vrot.lane.b32.xlu2 %v4214_v43, %s3715_s6  ;;  %s4932_s6 = sld [smem:[#allocation19_spill]] (!%p3365_p5) }
 0x516   : > { %v1802_v1 = vpop.permute.xlu2 %1801  ;;  %v4323_v35 = vpop.permute.xlu1 %1523 }
 0x517   : > { %v4298_v9 = vsel %vm1430_vm11, %v1815_v3, %v1802_v1  ;;  %v1571_v5 = vmul.f32 %v4323_v35, %v4112_v16 }
 0x518   : > { %v1823_v61 = vmul.f32 %v4298_v9, %v4171_v28 }
 0x51c   : > { %1539 = vrot.lane.b32.xlu2 %v1323_v60, %s3717_s25 }
 0x51e   : > { %v1780_v62 = vpop.permute.xlu0 %1779  ;;  %v1788_v11 = vpop.permute.xlu2 %1787 }
 0x51f   : > { %v1814_v12 = vsel %vm1425_vm12, %v1810_v10, %v1788_v11  ;;  %v1812_v48 = vsel %vm1420_vm10, %v4214_v43, %v1780_v62 }
 0x520   : > { %v1818_v60 = vsel %vm1430_vm11, %v1814_v12, %v1800_v7 }
 0x521   : > { %v1822_v59 = vmul.f32 %v1818_v60, %v4180_v33 }
 0x524   : > { %1535 = vrot.lane.b32.xlu2 %v1321_v63, %s3717_s25  ;;  %v1464_v63 = vpop.f32.mrf.mxu1 }
 0x525   : > { %v1476_v43 = vmul.f32 0.35355338, %v1464_v63 }
 0x526   : > { %v4306_v13 = vpop.permute.xlu0 %1545  ;;  %v1774_v15 = vpop.permute.xlu2 %1773 }
 0x527   : > { %v1809_v18 = vsel %vm1420_vm10, %v4200_v39, %v1774_v15  ;;  %v1582_v14 = vmul.f32 %v4306_v13, %v4136_v53 }
 0x52c   : > { %1531 = vrot.lane.b32.xlu2 %v1319_v2, %s3717_s25 }
 0x52e   : > { %v1542_v19 = vpop.permute.xlu0 %1541  ;;  %v1786_v6 = vpop.permute.xlu2 %1785 }
 0x52f   : > { %v1813_v22 = vsel %vm1425_vm12, %v1809_v18, %v1786_v6  ;;  %v1580_v4 = vmul.f32 %v1542_v19, %v4116_v49  ;;  %v4360_v28 = vmul.f32 %v1542_v19, %v4124_v50 }
 0x534   : > { %1527 = vrot.lane.b32.xlu2 %v1317_v8, %s3717_s25 }
 0x536   : > { %v4314_v23 = vpop.permute.xlu0 %1537  ;;  %v1798_v24 = vpop.permute.xlu2 %1797 }
 0x537   : > { %v1817_v0 = vsel %vm1430_vm11, %v1813_v22, %v1798_v24  ;;  %v1578_v11 = vmul.f32 %v4314_v23, %v4136_v53 }
 0x538   : > { %v1821_v2 = vmul.f32 %v1817_v0, %v4188_v38 }
 0x53e   : > { %v4316_v26 = vpop.permute.xlu0 %1533  ;;  %v1554_v27 = vpop.permute.xlu2 %1553 }
 0x53f   : > { %v1586_v25 = vmul.f32 %v1554_v27, %v4136_v53  ;;  %v1905_v12 = vmul.f32 %v1554_v27, %v4138_v54  ;;  %v1576_v22 = vmul.f32 %v4316_v26, %v4116_v49  ;;  %v4389_v27 = vmul.f32 %v4316_v26, %v4124_v50 }
 0x546   : > { %v4318_v17 = vpop.permute.xlu0 %1529  ;;  %v1552_v30 = vpop.permute.xlu2 %1551 }
 0x547   : > { %v1585_v31 = vmul.f32 %v1552_v30, %v4128_v51  ;;  %v1904_v10 = vmul.f32 %v1552_v30, %v4130_v52 }
 0x549   : > { %v3493_v32 = vpack.i.bf16 %v1585_v31, %v1586_v25  ;;  %v3533_v18 = vpack.i.bf16 %v1904_v10, %v1905_v12 }
 0x54b   : > { %3494 = vrot.lane.b32.xlu2 %v3493_v32, %s3717_s25 }
 0x54e   : > { %v4325_v36 = vpop.permute.xlu0 %1525  ;;  %v1550_v37 = vpop.permute.xlu2 %1549 }
 0x54f   : > { %v1572_v34 = vmul.f32 %v4325_v36, %v4116_v49  ;;  %v1584_v40 = vmul.f32 %v1550_v37, %v4116_v49  ;;  %v1903_v7 = vmul.f32 %v1550_v37, %v4124_v50  ;;  %v1574_v37 = vmul.f32 %v4318_v17, %v4136_v53 }
 0x551   : > { %v3528_v39 = vpack.i.bf16 %v1571_v5, %v1572_v34 }
 0x553   : > { %3529 = vrot.lane.b32.xlu2 %v3528_v39, %s3717_s25 }
 0x556   : > { %v1548_v29 = vpop.permute.xlu2 %1547 }
 0x557   : > { %v1583_v41 = vmul.f32 %v1548_v29, %v4112_v16  ;;  %v1902_v6 = vmul.f32 %v1548_v29, %v4120_v20  ;;  %v1897_v29 = vmul.f32 %v4314_v23, %v4138_v54  ;;  %v1467_v23 = vpop.f32.mrf.mxu1 }
 0x559   : > { %v3498_v44 = vpack.i.bf16 %v1583_v41, %v1584_v40  ;;  %v3538_v31 = vpack.i.bf16 %v1902_v6, %v1903_v7 }
 0x55b   : > { %3499 = vrot.lane.b32.xlu0 %v3498_v44, %s3717_s25 }
 0x55e   : > { %v4335_v42 = vpop.permute.xlu2 %1543 }
 0x55f   : > { %v1581_v45 = vmul.f32 %v4335_v42, %v4128_v51  ;;  %v1900_v53 = vmul.f32 %v4335_v42, %v4130_v52 }
 0x561   : > { %v3503_v46 = vpack.i.bf16 %v1581_v45, %v1582_v14 }
 0x563   : > { %3504 = vrot.lane.b32.xlu1 %v3503_v46, %s3717_s25 }
 0x566   : > { %v1792_v47 = vpop.permute.xlu2 %1791 }
 0x567   : > { %v1816_v55 = vsel %vm1425_vm12, %v1812_v48, %v1792_v47  ;;  %v1470_v47 = vpop.f32.mrf.mxu1  ;;  %v1477_v48 = vmul.f32 0.35355338, %v1467_v23 }
 0x56e   : > { %v1804_v56 = vpop.permute.xlu2 %1803 }
 0x56f   : > { %v1820_v57 = vsel %vm1430_vm11, %v1816_v55, %v1804_v56  ;;  %v1473_v56 = vpop.f32.mrf.mxu1 }
 0x570   : > { %v1824_v58 = vmul.f32 %v1820_v57, %v4161_v21  ;;  %v4356_v21 = vld [vmem:[%s4924_s21] ss:$0 sm:$0xff] }
 0x571   : > { %v4371_v9 = vadd.f32 %v4356_v21, %v1476_v43  ;;  %v4421_v55 = vadd.f32 %v4356_v21, %v1477_v48 }
 0x572   : > { %1845 = vmatpush.msrb.mxu1 %v1824_v58 }
 0x574   : > { %1846 = vmatpush.msrb.mxu1 %v1823_v61 }
 0x576   : > { %1847 = vmatpush.msrb.mxu1 %v1822_v59  ;;  %v1540_v3 = vpop.permute.xlu2 %1539 }
 0x577   : > { %v4363_v8 = vmul.f32 %v1540_v3, %v4120_v20  ;;  %v1579_v33 = vmul.f32 %v1540_v3, %v4112_v16 }
 0x578   : > { %1848 = vmatpush.msrb.mxu1 %v1821_v2 }
 0x579   : > { %v3548_v1 = vpack.i.bf16 %v4363_v8, %v4360_v28  ;;  %v3508_v38 = vpack.i.bf16 %v1579_v33, %v1580_v4  ;;  %3277 = vmatmul.msk.f32.vlgmr.msrb.gmra.mxu1 %vm1420_vm10, %v4120_v20 }
 0x57b   : > { %3509 = vrot.lane.b32.xlu0 %v3508_v38, %s3717_s25 }
 0x57c   : > { %1487 = vmax.xlane.f32.xlu2 %v4371_v9 }
 0x57e   : > { %v1536_v62 = vpop.permute.xlu2 %1535 }
 0x57f   : > { %v1577_v15 = vmul.f32 %v1536_v62, %v4128_v51  ;;  %v1896_v49 = vmul.f32 %v1536_v62, %v4130_v52 }
 0x581   : > { %v3513_v19 = vpack.i.bf16 %v1577_v15, %v1578_v11  ;;  %3278 = vmatmul.msk.f32.gmra.mxu1 %vm1420_vm10, %v4124_v50  ;;  %v3553_v44 = vpack.i.bf16 %v1896_v49, %v1897_v29 }
 0x583   : > { %3534 = vrot.lane.b32.xlu0 %v3533_v18, %s3717_s25  ;;  %3514 = vrot.lane.b32.xlu1 %v3513_v19, %s3717_s25 }
 0x586   : > { %v1532_v24 = vpop.permute.xlu2 %1531 }
 0x587   : > { %v4393_v30 = vmul.f32 %v1532_v24, %v4120_v20  ;;  %v1575_v25 = vmul.f32 %v1532_v24, %v4112_v16  ;;  %v1893_v16 = vmul.f32 %v4318_v17, %v4138_v54  ;;  %v1901_v17 = vmul.f32 %v4306_v13, %v4138_v54 }
 0x588   : > { %v1478_v13 = vmul.f32 0.35355338, %v1470_v47 }
 0x589   : > { %v3558_v32 = vpack.i.bf16 %v4393_v30, %v4389_v27  ;;  %v3518_v5 = vpack.i.bf16 %v1575_v25, %v1576_v22  ;;  %3279 = vmatmul.msk.f32.gmra.mxu1 %vm1420_vm10, %v4130_v52 }
 0x58a   : > { %v4429_v42 = vadd.f32 %v4356_v21, %v1478_v13 }
 0x58b   : > { %3539 = vrot.lane.b32.xlu0 %v3538_v31, %s3717_s25  ;;  %3519 = vrot.lane.b32.xlu1 %v3518_v5, %s3717_s25 }
 0x58e   : > { %v1528_v26 = vpop.permute.xlu2 %1527 }
 0x58f   : > { %v1892_v34 = vmul.f32 %v1528_v26, %v4130_v52  ;;  %v1573_v39 = vmul.f32 %v1528_v26, %v4128_v51  ;;  %v3543_v51 = vpack.i.bf16 %v1900_v53, %v1901_v17  ;;  %v1479_v52 = vmul.f32 0.35355338, %v1473_v56 }
 0x591   : > { %v3563_v40 = vpack.i.bf16 %v1892_v34, %v1893_v16  ;;  %v3523_v41 = vpack.i.bf16 %v1573_v39, %v1574_v37  ;;  %3280 = vmatmul.msk.f32.gmra.mxu1 %vm1420_vm10, %v4138_v54  ;;  %v4425_v54 = vadd.f32 %v4356_v21, %v1479_v52 }
 0x593   : > { %3524 = vrot.lane.b32.xlu1 %v3523_v41, %s3717_s25 }
 0x594   : > { %3554 = vrot.lane.b32.xlu2 %v3553_v44, %s3717_s25  ;;  %v1891_v44 = vmul.f32 %v4325_v36, %v4124_v50 }
 0x59b   : > { %3544 = vrot.lane.b32.xlu1 %v3543_v51, %s3717_s25  ;;  %v1890_v51 = vmul.f32 %v4323_v35, %v4120_v20 }
 0x59d   : > { %v3568_v30 = vpack.i.bf16 %v1890_v51, %v1891_v44 }
 0x5a5   : > { %v3495_v14 = vpop.permute.xlu2 %3494 }
 0x5a6   : > { %v3496_v45 = vunpack.i.l.bf16 %v3495_v14  ;;  %v3497_v46 = vunpack.i.h.bf16 %v3495_v14 }
 0x5a8   : > { %1651 = vmatpush.msra.mxu2 %v3496_v45 }
 0x5aa   : > { %1652 = vmatpush.msra.mxu2 %v3497_v46 }
 0x5ad   : > { %v3530_v59 = vpop.permute.xlu2 %3529 }
 0x5ae   : > { %v3531_v37 = vunpack.i.l.bf16 %v3530_v59  ;;  %v3532_v16 = vunpack.i.h.bf16 %v3530_v59 }
 0x5b5   : > { %1489 = vmax.xlane.f32.xlu0 %v4421_v55 }
 0x5bd   : > { %1493 = vmax.xlane.f32.xlu2 %v4425_v54 }
 0x5c5   : > { %1491 = vmax.xlane.f32.xlu1 %v4429_v42 }
 0x5cd   : > { %v3500_v57 = vpop.permute.xlu0 %3499 }
 0x5ce   : > { %v3501_v58 = vunpack.i.l.bf16 %v3500_v57  ;;  %v3502_v60 = vunpack.i.h.bf16 %v3500_v57 }
 0x5d0   : > { %1653 = vmatpush.msra.mxu2 %v3501_v58 }
 0x5d2   : > { %1654 = vmatpush.msra.mxu2 %v3502_v60 }
 0x5d5   : > { %v3505_v61 = vpop.permute.xlu1 %3504  ;;  %3564 = vrot.lane.b32.xlu2 %v3563_v40, %s3717_s25 }
 0x5d6   : > { %v3506_v63 = vunpack.i.l.bf16 %v3505_v61  ;;  %v3507_v0 = vunpack.i.h.bf16 %v3505_v61 }
 0x5d8   : > { %1655 = vmatpush.msra.mxu2 %v3506_v63 }
 0x5da   : > { %1656 = vmatpush.msra.mxu2 %v3507_v0 }
 0x5de   : > { %3549 = vrot.lane.b32.xlu1 %v3548_v1, %s3717_s25 }
 0x5ed   : > { %v3510_v43 = vpop.permute.xlu0 %3509 }
 0x5ee   : > { %v3511_v3 = vunpack.i.l.bf16 %v3510_v43  ;;  %v3512_v33 = vunpack.i.h.bf16 %v3510_v43 }
 0x5ef   : > { %v1488_v2 = vpop.xlane.xlu2 %1487 }
 0x5f0   : > { %v1495_v4 = vsub.f32 %v4371_v9, %v1488_v2  ;;  %1657 = vmatpush.msra.mxu2 %v3511_v3 }
 0x5f2   : > { %v1499_v38 = vmul.f32 1.442695, %v1495_v4  ;;  %1658 = vmatpush.msra.mxu2 %v3512_v33 }
 0x5f4   : > { %3597 = vpow2.f32 %v1499_v38 }
 0x5f5   : > { %v3515_v10 = vpop.permute.xlu1 %3514  ;;  %v3535_v22 = vpop.permute.xlu0 %3534 }
 0x5f6   : > { %v1850_v62 = vpop.f32.mrf.mxu1  ;;  %v3516_v11 = vunpack.i.l.bf16 %v3515_v10  ;;  %v3517_v15 = vunpack.i.h.bf16 %v3515_v10  ;;  %v3536_v39 = vunpack.i.l.bf16 %v3535_v22  ;;  %v3537_v41 = vunpack.i.h.bf16 %v3535_v22 }
 0x5f7   : > { %v1862_v12 = vmul.f32 0.35355338, %v1850_v62  ;;  %v3555_v45 = vpop.permute.xlu2 %3554 }
 0x5f8   : > { %1659 = vmatpush.msra.mxu2 %v3516_v11  ;;  %v3556_v61 = vunpack.i.l.bf16 %v3555_v45 }
 0x5f9   : > { %v4439_v28 = vadd.f32 %v4356_v21, %v1862_v12 }
 0x5fa   : > { %v3598_v8 = vpop.eup %3597  ;;  %1660 = vmatpush.msra.mxu2 %v3517_v15 }
 0x5fb   : > { %1870 = vmax.xlane.f32.xlu0 %v4439_v28  ;;  %1696 = vmatmul.f32.vlgmr.msrb.gmra.mxu3 %v3598_v8 }
 0x5fd   : > { %v3520_v1 = vpop.permute.xlu1 %3519  ;;  %v3540_v29 = vpop.permute.xlu0 %3539 }
 0x5fe   : > { %v1853_v9 = vpop.f32.mrf.mxu1  ;;  %v3521_v18 = vunpack.i.l.bf16 %v3520_v1  ;;  %v3522_v19 = vunpack.i.h.bf16 %v3520_v1  ;;  %v3541_v17 = vunpack.i.l.bf16 %v3540_v29  ;;  %v3542_v27 = vunpack.i.h.bf16 %v3540_v29  ;;  %v3423_v1 = vld [vmem:[%s3871_s4 + $0x8] sm:$0xff] }
 0x5ff   : > { %v1863_v6 = vmul.f32 0.35355338, %v1853_v9  ;;  %2078 = vmatpush.bf16.msra.mxu1 %v3423_v1  ;;  %v3663_v1 = vld [vmem:[#allocation2 + $0x18] sm:$0xff] }
 0x600   : > { %1661 = vmatpush.msra.mxu2 %v3521_v18 }
 0x601   : > { %v4443_v25 = vadd.f32 %v4356_v21, %v1863_v6 }
 0x602   : > { %1662 = vmatpush.msra.mxu2 %v3522_v19 }
 0x605   : > { %v3525_v24 = vpop.permute.xlu1 %3524 }
 0x606   : > { %v1856_v7 = vpop.f32.mrf.mxu1  ;;  %v3526_v31 = vunpack.i.l.bf16 %v3525_v24  ;;  %v3527_v49 = vunpack.i.h.bf16 %v3525_v24 }
 0x607   : > { %v1864_v5 = vmul.f32 0.35355338, %v1856_v7 }
 0x608   : > { %1872 = vmax.xlane.f32.xlu1 %v4443_v25  ;;  %1663 = vmatpush.msra.mxu2 %v3526_v31  ;;  %v3422_v31 = vld [vmem:[%s3871_s4] sm:$0xff]  ;;  %s4929_s4 = scalar_lea.vmem %s4878_s17, %s3851_s24  ;;  %s4930_s24 = sld [smem:[#allocation17_spill]] (!%p3365_p5) }
 0x609   : > { %v4447_v26 = vadd.f32 %v4356_v21, %v1864_v5  ;;  %2079 = vmatpush.bf16.msra.mxu1 %v3422_v31 }
 0x60a   : > { %1664 = vmatpush.msra.mxu2 %v3527_v49 }
 0x60b   : > { %1874 = vmax.xlane.f32.xlu2 %v4447_v26 }
 0x60c   : > { %1665 = vmatpush.msra.mxu2 %v3531_v37 }
 0x60d   : > { %v3545_v23 = vpop.permute.xlu1 %3544 }
 0x60e   : > { %1666 = vmatpush.msra.mxu2 %v3532_v16  ;;  %v1859_v34 = vpop.f32.mrf.mxu1  ;;  %v3547_v50 = vunpack.i.h.bf16 %v3545_v23 }
 0x60f   : > { %v1865_v40 = vmul.f32 0.35355338, %v1859_v34  ;;  %3559 = vrot.lane.b32.xlu0 %v3558_v32, %s3717_s25  ;;  %1667 = vmatmul.f32.vlgmr.msra.gmra.mxu2 %v3598_v8  ;;  %v3546_v32 = vunpack.i.l.bf16 %v3545_v23 }
 0x610   : > { %1970 = vmatpush.msrb.mxu2 %v3536_v39 }
 0x611   : > { %v4457_v53 = vadd.f32 %v4356_v21, %v1865_v40 }
 0x612   : > { %1971 = vmatpush.msrb.mxu2 %v3537_v41 }
 0x613   : > { %1876 = vmax.xlane.f32.xlu1 %v4457_v53 }
 0x614   : > { %1972 = vmatpush.msrb.mxu2 %v3541_v17 }
 0x616   : > { %1973 = vmatpush.msrb.mxu2 %v3542_v27 }
 0x617   : > { %3569 = vrot.lane.b32.xlu0 %v3568_v30, %s3717_s25 }
 0x618   : > { %1974 = vmatpush.msrb.mxu2 %v3546_v32 }
 0x61a   : > { %1975 = vmatpush.msrb.mxu2 %v3547_v50 }
 0x628   : > { %v1490_v36 = vpop.xlane.xlu0 %1489 }
 0x629   : > { %v1496_v21 = vsub.f32 %v4421_v55, %v1490_v36 }
 0x62b   : > { %v1501_v14 = vmul.f32 1.442695, %v1496_v21 }
 0x62d   : > { %3599 = vpow2.f32 %v1501_v14 }
 0x630   : > { %v1494_v47 = vpop.xlane.xlu2 %1493 }
 0x631   : > { %v1498_v56 = vsub.f32 %v4425_v54, %v1494_v47 }
 0x633   : > { %v3600_v20 = vpop.eup %3599  ;;  %v1505_v52 = vmul.f32 1.442695, %v1498_v56 }
 0x634   : > { %1670 = vmatmul.f32.gmra.mxu2 %v3600_v20  ;;  %1699 = vmatmul.f32.gmra.mxu3 %v3600_v20 }
 0x638   : > { %v1492_v35 = vpop.xlane.xlu1 %1491  ;;  %v3565_v59 = vpop.permute.xlu2 %3564 }
 0x639   : > { %v1497_v46 = vsub.f32 %v4429_v42, %v1492_v35  ;;  %v3557_v42 = vunpack.i.h.bf16 %v3555_v45  ;;  %v3566_v8 = vunpack.i.l.bf16 %v3565_v59  ;;  %v3567_v18 = vunpack.i.h.bf16 %v3565_v59 }
 0x63b   : > { %v1503_v48 = vmul.f32 1.442695, %v1497_v46 }
 0x63d   : > { %3601 = vpow2.f32 %v1503_v48 }
 0x63e   : > { %3603 = vpow2.f32 %v1505_v52 }
 0x643   : > { %v3602_v13 = vpop.eup %3601 }
 0x644   : > { %1673 = vmatmul.f32.gmra.mxu2 %v3602_v13  ;;  %1702 = vmatmul.f32.gmra.mxu3 %v3602_v13  ;;  %v3604_v55 = vpop.eup %3603 }
 0x64c   : > { %1676 = vmatmul.f32.gmra.mxu2 %v3604_v55  ;;  %1705 = vmatmul.f32.gmra.mxu3 %v3604_v55 }
 0x650   : > { %v3550_v57 = vpop.permute.xlu1 %3549 }
 0x651   : > { %v3551_v58 = vunpack.i.l.bf16 %v3550_v57  ;;  %v3552_v60 = vunpack.i.h.bf16 %v3550_v57 }
 0x653   : > { %1976 = vmatpush.msrb.mxu2 %v3551_v58 }
 0x655   : > { %1977 = vmatpush.msrb.mxu2 %v3552_v60 }
 0x657   : > { %1978 = vmatpush.msrb.mxu2 %v3556_v61 }
 0x659   : > { %1979 = vmatpush.msrb.mxu2 %v3557_v42 }
 0x66e   : > { %v1871_v63 = vpop.xlane.xlu0 %1870 }
 0x66f   : > { %v1878_v54 = vsub.f32 %v4439_v28, %v1871_v63 }
 0x671   : > { %v1882_v0 = vmul.f32 1.442695, %v1878_v54 }
 0x673   : > { %3605 = vpow2.f32 %v1882_v0 }
 0x679   : > { %v3606_v43 = vpop.eup %3605 }
 0x67a   : > { %2015 = vmatmul.f32.vlgmr.msra.gmra.mxu3 %v3606_v43 }
 0x67b   : > { %v1873_v3 = vpop.xlane.xlu1 %1872 }
 0x67c   : > { %v1879_v2 = vsub.f32 %v4443_v25, %v1873_v3 }
 0x67e   : > { %v1884_v4 = vmul.f32 1.442695, %v1879_v2  ;;  %v1875_v33 = vpop.xlane.xlu2 %1874  ;;  %v1697_v5 = vpop.f32.mrf.mxu3 }
 0x67f   : > { %v1880_v38 = vsub.f32 %v4447_v26, %v1875_v33  ;;  %v1709_v49 = vmax.f32 %v1697_v5, 1e-30 }
 0x680   : > { %3607 = vpow2.f32 %v1884_v4  ;;  %v3576_v4 = vld [vmem:[%s4925_s27] ss:$0 sm:$0xff] }
 0x681   : > { %v3560_v10 = vpop.permute.xlu0 %3559  ;;  %v1886_v11 = vmul.f32 1.442695, %v1880_v38  ;;  %v3661_v38 = vld [vmem:[#allocation2 + $0x30] sm:$0xff] }
 0x682   : > { %v3561_v62 = vunpack.i.l.bf16 %v3560_v10  ;;  %v3562_v12 = vunpack.i.h.bf16 %v3560_v10 }
 0x683   : > { %3609 = vpow2.f32 %v1886_v11 }
 0x684   : > { %1980 = vmatpush.msrb.mxu2 %v3561_v62 }
 0x686   : > { %v3608_v15 = vpop.eup %3607  ;;  %v1877_v28 = vpop.xlane.xlu1 %1876  ;;  %1981 = vmatpush.msrb.mxu2 %v3562_v12  ;;  %v3662_v12 = vld [vmem:[#allocation2] sm:$0xff] }
 0x687   : > { %2018 = vmatmul.f32.gmra.mxu3 %v3608_v15  ;;  %v1881_v9 = vsub.f32 %v4457_v53, %v1877_v28 }
 0x688   : > { %1982 = vmatpush.msrb.mxu2 %v3566_v8 }
 0x689   : > { %v3570_v19 = vpop.permute.xlu0 %3569  ;;  %v1888_v22 = vmul.f32 1.442695, %v1881_v9  ;;  %v3610_v7 = vpop.eup %3609 }
 0x68a   : > { %1983 = vmatpush.msrb.mxu2 %v3567_v18  ;;  %v3571_v6 = vunpack.i.l.bf16 %v3570_v19  ;;  %v3572_v24 = vunpack.i.h.bf16 %v3570_v19 }
 0x68b   : > { %3611 = vpow2.f32 %v1888_v22 }
 0x68c   : > { %1984 = vmatpush.msrb.mxu2 %v3571_v6  ;;  %3613 = vrcp.f32 %v1709_v49  ;;  %v3664_v6 = vld [vmem:[#allocation2 + $0x10] sm:$0xff] }
 0x68e   : > { %1985 = vmatpush.msrb.mxu2 %v3572_v24 }
 0x68f   : > { %1986 = vmatmul.f32.vlgmr.msrb.gmra.mxu2 %v3606_v43  ;;  %2021 = vmatmul.f32.gmra.mxu3 %v3610_v7 }
 0x691   : > { %v3612_v25 = vpop.eup %3611 }
 0x692   : > { %v1668_v37 = vpop.f32.mrf.mxu2  ;;  %v3614_v34 = vpop.eup %3613 }
 0x693   : > { %v1717_v40 = vmul.f32 %v3614_v34, %v1668_v37 }
 0x697   : > { %1989 = vmatmul.f32.gmra.mxu2 %v3608_v15  ;;  %2024 = vmatmul.f32.gmra.mxu3 %v3612_v25 }
 0x69f   : > { %1992 = vmatmul.f32.gmra.mxu2 %v3610_v7 }
 0x6a7   : > { %1995 = vmatmul.f32.gmra.mxu2 %v3612_v25  ;;  %v3665_v25 = vld [vmem:[#allocation2 + $0x8] sm:$0xff] }
 0x6b7   : > { %v1700_v26 = vpop.f32.mrf.mxu3  ;;  %v1671_v29 = vpop.f32.mrf.mxu2 }
 0x6b8   : > { %v1710_v16 = vmax.f32 %v1700_v26, 1e-30  ;;  %v3666_v26 = vld [vmem:[#allocation2 + $0x20] sm:$0xff] }
 0x6ba   : > { %3615 = vrcp.f32 %v1710_v16 }
 0x6c0   : > { %v3616_v39 = vpop.eup %3615 }
 0x6c1   : > { %v1718_v41 = vmul.f32 %v3616_v39, %v1671_v29  ;;  %v3667_v39 = vld [vmem:[#allocation2 + $0x28] sm:$0xff] }
 0x6c3   : > { %v2040_v44 = vpack.c.bf16 %v1718_v41, %v1717_v40 }
 0x6c5   : > { %3289 = vmatmul.msk.bf16.vlgmr.msra.gmra.mxu1 %vm1420_vm10, %v2040_v44 }
 0x6c7   : > { %v1703_v53 = vpop.f32.mrf.mxu3  ;;  %v1674_v51 = vpop.f32.mrf.mxu2 }
 0x6c8   : > { %v1711_v17 = vmax.f32 %v1703_v53, 1e-30 }
 0x6ca   : > { %3617 = vrcp.f32 %v1711_v17 }
 0x6cf   : > { %v1706_v23 = vpop.f32.mrf.mxu3  ;;  %v1677_v50 = vpop.f32.mrf.mxu2 }
 0x6d0   : > { %v1712_v27 = vmax.f32 %v1706_v23, 1e-30  ;;  %v3618_v30 = vpop.eup %3617 }
 0x6d1   : > { %v1719_v36 = vmul.f32 %v3618_v30, %v1674_v51 }
 0x6d2   : > { %3619 = vrcp.f32 %v1712_v27  ;;  %v3668_v27 = vld [vmem:[#allocation2 + $0x38] sm:$0xff] }
 0x6d8   : > { %v3620_v32 = vpop.eup %3619 }
 0x6d9   : > { %v1720_v21 = vmul.f32 %v3620_v32, %v1677_v50 }
 0x6db   : > { %v2041_v14 = vpack.c.bf16 %v1720_v21, %v1719_v36 }
 0x6dd   : > { %3290 = vmatmul.msk.bf16.gmra.mxu1 %vm1420_vm10, %v2041_v14 }
 0x6fd   : > { %v2016_v45 = vpop.f32.mrf.mxu3 }
 0x6fe   : > { %v2028_v35 = vmax.f32 %v2016_v45, 1e-30 }
 0x700   : > { %3621 = vrcp.f32 %v2028_v35 }
 0x706   : > { %v3622_v56 = vpop.eup %3621 }
 0x70a   : > { %v2019_v20 = vpop.f32.mrf.mxu3 }
 0x70b   : > { %v2029_v46 = vmax.f32 %v2019_v20, 1e-30 }
 0x70d   : > { %3623 = vrcp.f32 %v2029_v46 }
 0x712   : > { %v1987_v47 = vpop.f32.mrf.mxu2  ;;  %v2022_v48 = vpop.f32.mrf.mxu3 }
 0x713   : > { %v3624_v52 = vpop.eup %3623  ;;  %v2036_v55 = vmul.f32 %v3622_v56, %v1987_v47  ;;  %v2030_v61 = vmax.f32 %v2022_v48, 1e-30 }
 0x715   : > { %3625 = vrcp.f32 %v2030_v61 }
 0x71a   : > { %v1990_v13 = vpop.f32.mrf.mxu2  ;;  %v2025_v60 = vpop.f32.mrf.mxu3 }
 0x71b   : > { %v2037_v57 = vmul.f32 %v3624_v52, %v1990_v13  ;;  %v2031_v42 = vmax.f32 %v2025_v60, 1e-30  ;;  %v3626_v54 = vpop.eup %3625 }
 0x71d   : > { %v2042_v58 = vpack.c.bf16 %v2037_v57, %v2036_v55  ;;  %3627 = vrcp.f32 %v2031_v42  ;;  %v3431_v42 = vld [vmem:[%s3888_s9 + $0x38] sm:$0xff] }
 0x71e   : > { %2401 = vmatpush.bf16.msrb.mxu0 %v3431_v42 }
 0x71f   : > { %3291 = vmatmul.msk.bf16.gmra.mxu1 %vm1420_vm10, %v2042_v58 }
 0x722   : > { %v1993_v63 = vpop.f32.mrf.mxu2 }
 0x723   : > { %v3628_v0 = vpop.eup %3627  ;;  %v2038_v43 = vmul.f32 %v3626_v54, %v1993_v63 }
 0x72a   : > { %v1996_v59 = vpop.f32.mrf.mxu2 }
 0x72b   : > { %v2039_v3 = vmul.f32 %v3628_v0, %v1996_v59  ;;  %v3430_v0 = vld [vmem:[%s3888_s9 + $0x30] sm:$0xff] }
 0x72c   : > { %2402 = vmatpush.bf16.msrb.mxu0 %v3430_v0 }
 0x72d   : > { %v2043_v2 = vpack.c.bf16 %v2039_v3, %v2038_v43  ;;  %v3429_v3 = vld [vmem:[%s3888_s9 + $0x28] sm:$0xff] }
 0x72f   : > { %3292 = vmatmul.msk.bf16.gmra.mxu1 %vm1420_vm10, %v2043_v2 }
 0x730   : > { %2403 = vmatpush.bf16.msrb.mxu0 %v3429_v3 }
 0x742   : > { %v2081_v33 = vpop.f32.mrf.mxu1 }
 0x743   : > { %v2101_v10 = vadd.f32 %v3661_v38, %v2081_v33  ;;  %v3427_v38 = vld [vmem:[%s3888_s9 + $0x18] sm:$0xff] }
 0x745   : > { %v4481_v62 = vadd.f32 %v3576_v4, %v2101_v10 }
 0x747   : > { %2123 = vadd.xlane.f32.xlu0 %v4481_v62 }
 0x74a   : > { %v2083_v11 = vpop.f32.mrf.mxu1 }
 0x74b   : > { %v2102_v15 = vadd.f32 %v3662_v12, %v2083_v11  ;;  %v3426_v12 = vld [vmem:[%s3888_s9 + $0x10] sm:$0xff] }
 0x74d   : > { %v4484_v28 = vadd.f32 %v3576_v4, %v2102_v15 }
 0x74f   : > { %2125 = vadd.xlane.f32.xlu1 %v4484_v28 }
 0x75a   : > { %v2086_v8 = vpop.f32.mrf.mxu1 }
 0x75b   : > { %v2103_v9 = vadd.f32 %v3663_v1, %v2086_v8 }
 0x75d   : > { %v4487_v18 = vadd.f32 %v3576_v4, %v2103_v9  ;;  %v3425_v9 = vld [vmem:[%s3888_s9 + $0x8] sm:$0xff] }
 0x75f   : > { %2127 = vadd.xlane.f32.xlu1 %v4487_v18 }
 0x762   : > { %v2088_v19 = vpop.f32.mrf.mxu1 }
 0x763   : > { %v2104_v22 = vadd.f32 %v3664_v6, %v2088_v19 }
 0x765   : > { %v4490_v24 = vadd.f32 %v3576_v4, %v2104_v22 }
 0x767   : > { %2129 = vadd.xlane.f32.xlu1 %v4490_v24 }
 0x79c   : > { %v2091_v7 = vpop.f32.mrf.mxu1 }
 0x79d   : > { %v2105_v31 = vadd.f32 %v3665_v25, %v2091_v7  ;;  %v3424_v25 = vld [vmem:[%s3888_s9] sm:$0xff] }
 0x79f   : > { %v4493_v5 = vadd.f32 %v3576_v4, %v2105_v31 }
 0x7a1   : > { %2131 = vadd.xlane.f32.xlu2 %v4493_v5 }
 0x7a4   : > { %v2093_v49 = vpop.f32.mrf.mxu1 }
 0x7a5   : > { %v2106_v37 = vadd.f32 %v3666_v26, %v2093_v49 }
 0x7a7   : > { %v4496_v16 = vadd.f32 %v3576_v4, %v2106_v37 }
 0x7a9   : > { %2133 = vadd.xlane.f32.xlu1 %v4496_v16 }
 0x7ac   : > { %v2096_v34 = vpop.f32.mrf.mxu1 }
 0x7ad   : > { %v2107_v29 = vadd.f32 %v3667_v39, %v2096_v34 }
 0x7af   : > { %v4499_v40 = vadd.f32 %v3576_v4, %v2107_v29 }
 0x7b1   : > { %2135 = vadd.xlane.f32.xlu0 %v4499_v40 }
 0x7b4   : > { %v2098_v51 = vpop.f32.mrf.mxu1 }
 0x7b5   : > { %v2108_v30 = vadd.f32 %v3668_v27, %v2098_v51 }
 0x7b7   : > { %v4510_v36 = vadd.f32 %v3576_v4, %v2108_v30  ;;  %v3428_v4 = vld [vmem:[%s3888_s9 + $0x20] sm:$0xff] }
 0x7b8   : > { %2404 = vmatpush.bf16.msrb.mxu0 %v3428_v4 }
 0x7ba   : > { %v2124_v41 = vpop.xlane.xlu0 %2123 }
 0x7bb   : > { %v2139_v44 = vmul.f32 0.03125, %v2124_v41 }
 0x7bc   : > { %2405 = vmatpush.bf16.msrb.mxu0 %v3427_v38 }
 0x7bd   : > { %v4503_v53 = vsub.f32 %v4481_v62, %v2139_v44  ;;  %v2179_v33 = vmul.f32 %v2139_v44, %v2139_v44 }
 0x7bf   : > { %v2155_v17 = vmul.f32 %v4503_v53, %v4503_v53  ;;  %v2187_v10 = vmul.f32 96.0, %v2179_v33 }
 0x7c0   : > { %2406 = vmatpush.bf16.msrb.mxu0 %v3426_v12 }
 0x7c1   : > { %2163 = vadd.xlane.f32.xlu2 %v2155_v17 }
 0x7c2   : > { %v2126_v23 = vpop.xlane.xlu1 %2125 }
 0x7c3   : > { %v2140_v32 = vmul.f32 0.03125, %v2126_v23 }
 0x7c4   : > { %2407 = vmatpush.bf16.msrb.mxu0 %v3425_v9 }
 0x7c5   : > { %v4508_v50 = vsub.f32 %v4484_v28, %v2140_v32  ;;  %v2180_v8 = vmul.f32 %v2140_v32, %v2140_v32 }
 0x7c7   : > { %v2156_v21 = vmul.f32 %v4508_v50, %v4508_v50  ;;  %v2188_v6 = vmul.f32 96.0, %v2180_v8 }
 0x7c8   : > { %2408 = vmatpush.bf16.msrb.mxu0 %v3424_v25 }
 0x7c9   : > { %2165 = vadd.xlane.f32.xlu1 %v2156_v21  ;;  %2137 = vadd.xlane.f32.xlu2 %v4510_v36 }
 0x7d2   : > { %v2128_v14 = vpop.xlane.xlu1 %2127 }
 0x7d3   : > { %v2141_v45 = vmul.f32 0.03125, %v2128_v14 }
 0x7d5   : > { %v4516_v20 = vsub.f32 %v4487_v18, %v2141_v45  ;;  %v2181_v51 = vmul.f32 %v2141_v45, %v2141_v45 }
 0x7d7   : > { %v2157_v35 = vmul.f32 %v4516_v20, %v4516_v20  ;;  %v2189_v21 = vmul.f32 96.0, %v2181_v51 }
 0x7d9   : > { %2167 = vadd.xlane.f32.xlu1 %v2157_v35 }
 0x7da   : > { %v2130_v46 = vpop.xlane.xlu1 %2129 }
 0x7db   : > { %v4520_v47 = vmul.f32 0.03125, %v2130_v46 }
 0x7dd   : > { %v4524_v48 = vsub.f32 %v4490_v24, %v4520_v47 }
 0x7df   : > { %v2158_v56 = vmul.f32 %v4524_v48, %v4524_v48 }
 0x7e1   : > { %2169 = vadd.xlane.f32.xlu0 %v2158_v56 }
 0x814   : > { %v2132_v52 = vpop.xlane.xlu2 %2131 }
 0x815   : > { %v4528_v13 = vmul.f32 0.03125, %v2132_v52 }
 0x817   : > { %v4532_v55 = vsub.f32 %v4493_v5, %v4528_v13 }
 0x819   : > { %v2159_v57 = vmul.f32 %v4532_v55, %v4532_v55 }
 0x81b   : > { %2171 = vadd.xlane.f32.xlu2 %v2159_v57  ;;  %v2182_v57 = vmul.f32 %v4520_v47, %v4520_v47 }
 0x81c   : > { %v2134_v58 = vpop.xlane.xlu1 %2133 }
 0x81d   : > { %v4536_v60 = vmul.f32 0.03125, %v2134_v58  ;;  %v2190_v3 = vmul.f32 96.0, %v2182_v57 }
 0x81f   : > { %v4540_v61 = vsub.f32 %v4496_v16, %v4536_v60 }
 0x821   : > { %v2160_v63 = vmul.f32 %v4540_v61, %v4540_v61 }
 0x823   : > { %2173 = vadd.xlane.f32.xlu1 %v2160_v63 }
 0x824   : > { %v2136_v54 = vpop.xlane.xlu0 %2135 }
 0x825   : > { %v4546_v59 = vmul.f32 0.03125, %v2136_v54  ;;  %v4576_v54 = vld [vmem:[%s4926_s18] ss:$0 sm:$0xff] }
 0x827   : > { %v4550_v43 = vsub.f32 %v4499_v40, %v4546_v59 }
 0x829   : > { %v2161_v2 = vmul.f32 %v4550_v43, %v4550_v43 }
 0x82b   : > { %2175 = vadd.xlane.f32.xlu0 %v2161_v2 }
 0x834   : > { %v2164_v11 = vpop.xlane.xlu2 %2163 }
 0x835   : > { %v2195_v15 = vsub.f32 %v2164_v11, %v2187_v10 }
 0x837   : > { %v2203_v1 = vmul.f32 0.03125, %v2195_v15 }
 0x839   : > { %v2211_v19 = vadd.f32 1e-05, %v2203_v1 }
 0x83b   : > { %3629 = vrsqrt.f32 %v2211_v19  ;;  %vm2225_vm14 = vweird.f32 %v2211_v19 }
 0x83c   : > { %v2166_v22 = vpop.xlane.xlu1 %2165  ;;  %v2138_v7 = vpop.xlane.xlu2 %2137 }
 0x83d   : > { %v2196_v31 = vsub.f32 %v2166_v22, %v2188_v6  ;;  %v4560_v49 = vmul.f32 0.03125, %v2138_v7 }
 0x83f   : > { %v2204_v26 = vmul.f32 0.03125, %v2196_v31  ;;  %v4564_v37 = vsub.f32 %v4510_v36, %v4560_v49 }
 0x841   : > { %v3630_v34 = vpop.eup %3629  ;;  %v2212_v39 = vadd.f32 1e-05, %v2204_v26  ;;  %v2162_v29 = vmul.f32 %v4564_v37, %v4564_v37 }
 0x842   : > { %v2220_v41 = vmul.f32 %v3630_v34, %v2211_v19  ;;  %vm2226_vm13 = vweird.f32 %v3630_v34 }
 0x843   : > { %3631 = vrsqrt.f32 %v2212_v39  ;;  %2177 = vadd.xlane.f32.xlu2 %v2162_v29  ;;  %vm2227_vm15 = vmor %vm2225_vm14, %vm2226_vm13  ;;  %vm2235_vm1 = vweird.f32 %v2212_v39 }
 0x844   : > { %v2221_v44 = vmul.f32 %v3630_v34, %v2220_v41 }
 0x846   : > { %v2222_v17 = vmul.f32 0.5, %v2221_v44 }
 0x848   : > { %v2223_v23 = vsub.f32 1.5, %v2222_v17 }
 0x849   : > { %v3632_v27 = vpop.eup %3631 }
 0x84a   : > { %v2224_v30 = vmul.f32 %v3630_v34, %v2223_v23  ;;  %v2230_v32 = vmul.f32 %v3632_v27, %v2212_v39  ;;  %vm2236_vm0 = vweird.f32 %v3632_v27 }
 0x84b   : > { %vm2237_vm2 = vmor %vm2235_vm1, %vm2236_vm0 }
 0x84c   : > { %v2231_v14 = vmul.f32 %v3632_v27, %v2230_v32  ;;  %v2168_v35 = vpop.xlane.xlu1 %2167  ;;  %v2228_v56 = vsel %vm2227_vm15, %v3630_v34, %v2224_v30 }
 0x84d   : > { %v2197_v46 = vsub.f32 %v2168_v35, %v2189_v21  ;;  %v2299_v63 = vmul.f32 %v2228_v56, %v4503_v53  ;;  %v4585_v53 = vld [vmem:[%s4927_s10] ss:$0 sm:$0xff]  ;;  %v2184_v56 = vmul.f32 %v4536_v60, %v4536_v60 }
 0x84e   : > { %v2232_v52 = vmul.f32 0.5, %v2231_v14  ;;  %v2183_v14 = vmul.f32 %v4528_v13, %v4528_v13 }
 0x84f   : > { %v2205_v58 = vmul.f32 0.03125, %v2197_v46  ;;  %v2310_v38 = vmul.f32 %v4576_v54, %v2299_v63  ;;  %v2192_v57 = vmul.f32 96.0, %v2184_v56 }
 0x850   : > { %v2233_v45 = vsub.f32 1.5, %v2232_v52 }
 0x851   : > { %v2213_v42 = vadd.f32 1e-05, %v2205_v58  ;;  %v2321_v8 = vadd.f32 %v4585_v53, %v2310_v38 }
 0x852   : > { %v2234_v0 = vmul.f32 %v3632_v27, %v2233_v45 }
 0x853   : > { %3633 = vrsqrt.f32 %v2213_v42  ;;  %vm2245_vm4 = vweird.f32 %v2213_v42 }
 0x854   : > { %v2238_v2 = vsel %vm2237_vm2, %v3632_v27, %v2234_v0  ;;  %v2170_v47 = vpop.xlane.xlu0 %2169 }
 0x855   : > { %v2198_v4 = vsub.f32 %v2170_v47, %v2190_v3  ;;  %v2300_v33 = vmul.f32 %v2238_v2, %v4508_v50 }
 0x857   : > { %v2206_v10 = vmul.f32 0.03125, %v2198_v4  ;;  %v2311_v11 = vmul.f32 %v4576_v54, %v2300_v33 }
 0x859   : > { %v3634_v12 = vpop.eup %3633  ;;  %v2214_v15 = vadd.f32 1e-05, %v2206_v10  ;;  %v2322_v1 = vadd.f32 %v4585_v53, %v2311_v11 }
 0x85a   : > { %v2240_v9 = vmul.f32 %v3634_v12, %v2213_v42  ;;  %vm2246_vm3 = vweird.f32 %v3634_v12  ;;  %v2185_v42 = vmul.f32 %v4546_v59, %v4546_v59 }
 0x85b   : > { %3635 = vrsqrt.f32 %v2214_v15  ;;  %v2329_v50 = vpack.c.bf16 %v2322_v1, %v2321_v8  ;;  %vm2247_vm5 = vmor %vm2245_vm4, %vm2246_vm3  ;;  %vm2255_vm7 = vweird.f32 %v2214_v15 }
 0x85c   : > { %v2241_v19 = vmul.f32 %v3634_v12, %v2240_v9  ;;  %v2193_v13 = vmul.f32 96.0, %v2185_v42 }
 0x85d   : > { %2409 = vmatmul.bf16.vlgmr.msrb.gmra.mxu0 %v2329_v50 }
 0x85e   : > { %v2242_v6 = vmul.f32 0.5, %v2241_v19 }
 0x860   : > { %v2243_v22 = vsub.f32 1.5, %v2242_v6 }
 0x861   : > { %v3636_v7 = vpop.eup %3635 }
 0x862   : > { %v2244_v25 = vmul.f32 %v3634_v12, %v2243_v22  ;;  %v2250_v31 = vmul.f32 %v3636_v7, %v2214_v15  ;;  %vm2256_vm6 = vweird.f32 %v3636_v7 }
 0x863   : > { %vm2257_vm8 = vmor %vm2255_vm7, %vm2256_vm6 }
 0x864   : > { %v2251_v26 = vmul.f32 %v3636_v7, %v2250_v31  ;;  %v2248_v39 = vsel %vm2247_vm5, %v3634_v12, %v2244_v25 }
 0x865   : > { %v2301_v41 = vmul.f32 %v2248_v39, %v4516_v20  ;;  %v2191_v20 = vmul.f32 96.0, %v2183_v14 }
 0x866   : > { %v2252_v34 = vmul.f32 0.5, %v2251_v26  ;;  %v2186_v26 = vmul.f32 %v4560_v49, %v4560_v49 }
 0x867   : > { %v2312_v23 = vmul.f32 %v4576_v54, %v2301_v41 }
 0x868   : > { %v2253_v29 = vsub.f32 1.5, %v2252_v34 }
 0x869   : > { %v2323_v30 = vadd.f32 %v4585_v53, %v2312_v23 }
 0x86a   : > { %v2254_v44 = vmul.f32 %v3636_v7, %v2253_v29 }
 0x86c   : > { %v2258_v17 = vsel %vm2257_vm8, %v3636_v7, %v2254_v44 }
 0x86d   : > { %v2302_v51 = vmul.f32 %v2258_v17, %v4524_v48 }
 0x86f   : > { %v2313_v27 = vmul.f32 %v4576_v54, %v2302_v51 }
 0x871   : > { %v2324_v32 = vadd.f32 %v4585_v53, %v2313_v27 }
 0x873   : > { %v2330_v21 = vpack.c.bf16 %v2324_v32, %v2323_v30 }
 0x875   : > { %2414 = vmatmul.bf16.gmra.mxu0 %v2330_v21 }
 0x88e   : > { %v2172_v35 = vpop.xlane.xlu2 %2171 }
 0x88f   : > { %v2199_v46 = vsub.f32 %v2172_v35, %v2191_v20 }
 0x891   : > { %v2207_v48 = vmul.f32 0.03125, %v2199_v46 }
 0x893   : > { %v2215_v52 = vadd.f32 1e-05, %v2207_v48 }
 0x895   : > { %3637 = vrsqrt.f32 %v2215_v52  ;;  %vm2265_vm10 = vweird.f32 %v2215_v52 }
 0x896   : > { %v2174_v58 = vpop.xlane.xlu1 %2173 }
 0x897   : > { %v2200_v45 = vsub.f32 %v2174_v58, %v2192_v57 }
 0x899   : > { %v2208_v63 = vmul.f32 0.03125, %v2200_v45 }
 0x89b   : > { %v3638_v0 = vpop.eup %3637  ;;  %v2216_v3 = vadd.f32 1e-05, %v2208_v63 }
 0x89c   : > { %v2260_v2 = vmul.f32 %v3638_v0, %v2215_v52  ;;  %vm2266_vm9 = vweird.f32 %v3638_v0 }
 0x89d   : > { %3639 = vrsqrt.f32 %v2216_v3  ;;  %vm2267_vm11 = vmor %vm2265_vm10, %vm2266_vm9  ;;  %vm2275_vm13 = vweird.f32 %v2216_v3 }
 0x89e   : > { %v2261_v47 = vmul.f32 %v3638_v0, %v2260_v2  ;;  %v2176_v4 = vpop.xlane.xlu0 %2175 }
 0x89f   : > { %v2201_v33 = vsub.f32 %v2176_v4, %v2193_v13  ;;  %v3438_v4 = vld [vmem:[%s3897_s23 + $0x30] sm:$0xff] }
 0x8a0   : > { %v2262_v38 = vmul.f32 0.5, %v2261_v47 }
 0x8a1   : > { %v2209_v11 = vmul.f32 0.03125, %v2201_v33 }
 0x8a2   : > { %v2263_v60 = vsub.f32 1.5, %v2262_v38 }
 0x8a3   : > { %v3640_v10 = vpop.eup %3639  ;;  %v2217_v59 = vadd.f32 1e-05, %v2209_v11 }
 0x8a4   : > { %v2264_v12 = vmul.f32 %v3638_v0, %v2263_v60  ;;  %v2270_v15 = vmul.f32 %v3640_v10, %v2216_v3  ;;  %vm2276_vm12 = vweird.f32 %v3640_v10 }
 0x8a5   : > { %3641 = vrsqrt.f32 %v2217_v59  ;;  %vm2277_vm14 = vmor %vm2275_vm13, %vm2276_vm12  ;;  %vm2285_vm0 = vweird.f32 %v2217_v59 }
 0x8a6   : > { %v2271_v8 = vmul.f32 %v3640_v10, %v2270_v15  ;;  %v2268_v9 = vsel %vm2267_vm11, %v3638_v0, %v2264_v12  ;;  %v3437_v15 = vld [vmem:[%s3897_s23 + $0x28] sm:$0xff] }
 0x8a7   : > { %v2303_v19 = vmul.f32 %v2268_v9, %v4532_v55  ;;  %v2194_v55 = vmul.f32 96.0, %v2186_v26 }
 0x8a8   : > { %v2272_v1 = vmul.f32 0.5, %v2271_v8 }
 0x8a9   : > { %v2314_v25 = vmul.f32 %v4576_v54, %v2303_v19  ;;  %v3436_v19 = vld [vmem:[%s3897_s23 + $0x20] sm:$0xff] }
 0x8aa   : > { %v2273_v50 = vsub.f32 1.5, %v2272_v1 }
 0x8ab   : > { %v3642_v31 = vpop.eup %3641  ;;  %v2325_v39 = vadd.f32 %v4585_v53, %v2314_v25 }
 0x8ac   : > { %v2274_v6 = vmul.f32 %v3640_v10, %v2273_v50  ;;  %v2280_v41 = vmul.f32 %v3642_v31, %v2217_v59  ;;  %vm2286_vm15 = vweird.f32 %v3642_v31 }
 0x8ad   : > { %vm2287_vm1 = vmor %vm2285_vm0, %vm2286_vm15 }
 0x8ae   : > { %v2278_v22 = vsel %vm2277_vm14, %v3640_v10, %v2274_v6  ;;  %v2281_v23 = vmul.f32 %v3642_v31, %v2280_v41 }
 0x8af   : > { %v2304_v7 = vmul.f32 %v2278_v22, %v4540_v61 }
 0x8b0   : > { %v2282_v30 = vmul.f32 0.5, %v2281_v23  ;;  %v3434_v23 = vld [vmem:[%s3897_s23 + $0x10] sm:$0xff] }
 0x8b1   : > { %v2315_v34 = vmul.f32 %v4576_v54, %v2304_v7 }
 0x8b2   : > { %v2283_v32 = vsub.f32 1.5, %v2282_v30 }
 0x8b3   : > { %v2326_v29 = vadd.f32 %v4585_v53, %v2315_v34  ;;  %v3435_v34 = vld [vmem:[%s3897_s23 + $0x18] sm:$0xff] }
 0x8b4   : > { %v2284_v49 = vmul.f32 %v3642_v31, %v2283_v32 }
 0x8b5   : > { %v2331_v44 = vpack.c.bf16 %v2326_v29, %v2325_v39 }
 0x8b6   : > { %v2178_v17 = vpop.xlane.xlu2 %2177  ;;  %v2288_v46 = vsel %vm2287_vm1, %v3642_v31, %v2284_v49 }
 0x8b7   : > { %v2202_v51 = vsub.f32 %v2178_v17, %v2194_v55  ;;  %2419 = vmatmul.bf16.gmra.mxu0 %v2331_v44  ;;  %v2305_v48 = vmul.f32 %v2288_v46, %v4550_v43  ;;  %v4621_v43 = vld [vmem:[%s4928_s5] ss:$0 sm:$0xff] }
 0x8b9   : > { %v2210_v61 = vmul.f32 0.03125, %v2202_v51  ;;  %v2316_v45 = vmul.f32 %v4576_v54, %v2305_v48  ;;  %v3433_v48 = vld [vmem:[%s3897_s23 + $0x8] sm:$0xff] }
 0x8bb   : > { %v2218_v27 = vadd.f32 1e-05, %v2210_v61  ;;  %v2327_v63 = vadd.f32 %v4585_v53, %v2316_v45 }
 0x8bd   : > { %3643 = vrsqrt.f32 %v2218_v27  ;;  %vm2295_vm3 = vweird.f32 %v2218_v27 }
 0x8c3   : > { %v3644_v21 = vpop.eup %3643 }
 0x8c4   : > { %v2290_v14 = vmul.f32 %v3644_v21, %v2218_v27  ;;  %vm2296_vm2 = vweird.f32 %v3644_v21 }
 0x8c5   : > { %vm2297_vm4 = vmor %vm2295_vm3, %vm2296_vm2 }
 0x8c6   : > { %v2291_v20 = vmul.f32 %v3644_v21, %v2290_v14 }
 0x8c8   : > { %v2292_v35 = vmul.f32 0.5, %v2291_v20 }
 0x8ca   : > { %v2293_v56 = vsub.f32 1.5, %v2292_v35 }
 0x8cc   : > { %v2294_v52 = vmul.f32 %v3644_v21, %v2293_v56 }
 0x8ce   : > { %v2298_v57 = vsel %vm2297_vm4, %v3644_v21, %v2294_v52 }
 0x8cf   : > { %v2306_v58 = vmul.f32 %v2298_v57, %v4564_v37 }
 0x8d1   : > { %v2317_v42 = vmul.f32 %v4576_v54, %v2306_v58  ;;  %v3439_v54 = vld [vmem:[%s3897_s23 + $0x38] sm:$0xff] }
 0x8d2   : > { %2850 = vmatpush.bf16.msra.mxu0 %v3439_v54  ;;  %3464 = vmatpush.bf16.msra.mxu2 %v3439_v54 }
 0x8d3   : > { %v2328_v0 = vadd.f32 %v4585_v53, %v2317_v42  ;;  %v3432_v42 = vld [vmem:[%s3897_s23] sm:$0xff] }
 0x8d5   : > { %v2332_v3 = vpack.c.bf16 %v2328_v0, %v2327_v63 }
 0x8d6   : > { %2851 = vmatpush.bf16.msra.mxu0 %v3438_v4  ;;  %3465 = vmatpush.bf16.msra.mxu2 %v3438_v4 }
 0x8d7   : > { %2424 = vmatmul.bf16.gmra.mxu0 %v2332_v3 }
 0x8da   : > { %v2410_v2 = vpop.f32.mrf.mxu0  ;;  %2852 = vmatpush.bf16.msra.mxu0 %v3437_v15  ;;  %3466 = vmatpush.bf16.msra.mxu2 %v3437_v15 }
 0x8db   : > { %v4624_v37 = vadd.f32 %v4621_v43, %v2410_v2 }
 0x8dd   : > { %v4627_v13 = vmul.f32 0.70710677, %v4624_v37 }
 0x8de   : > { %2853 = vmatpush.bf16.msra.mxu0 %v3436_v19  ;;  %3467 = vmatpush.bf16.msra.mxu2 %v3436_v19 }
 0x8df   : > { %v2446_v53 = vmul.f32 %v4627_v13, %v4627_v13 }
 0x8e1   : > { %v4632_v47 = vmin.f32 %v2446_v53, 16.0 }
 0x8e2   : > { %v2412_v33 = vpop.f32.mrf.mxu0  ;;  %2854 = vmatpush.bf16.msra.mxu0 %v3435_v34  ;;  %3468 = vmatpush.bf16.msra.mxu2 %v3435_v34 }
 0x8e3   : > { %v2448_v38 = vmul.f32 2.1237322e-06, %v4632_v47  ;;  %v2459_v60 = vmul.f32 3.8918573e-05, %v4632_v47  ;;  %v4638_v10 = vadd.f32 %v4621_v43, %v2412_v33 }
 0x8e5   : > { %v2449_v11 = vadd.f32 0.00028619796, %v2448_v38  ;;  %v2460_v12 = vadd.f32 0.001143296, %v2459_v60  ;;  %v4642_v8 = vmul.f32 0.70710677, %v4638_v10 }
 0x8e6   : > { %2855 = vmatpush.bf16.msra.mxu0 %v3434_v23  ;;  %3469 = vmatpush.bf16.msra.mxu2 %v3434_v23 }
 0x8e7   : > { %v2461_v59 = vmul.f32 %v2460_v12, %v4632_v47  ;;  %v2486_v1 = vmul.f32 %v4642_v8, %v4642_v8  ;;  %v2450_v9 = vmul.f32 %v2449_v11, %v4632_v47 }
 0x8e9   : > { %v2462_v50 = vadd.f32 0.014752088, %v2461_v59  ;;  %v4649_v6 = vmin.f32 %v2486_v1, 16.0  ;;  %v2451_v31 = vadd.f32 0.0036580483, %v2450_v9 }
 0x8ea   : > { %2856 = vmatpush.bf16.msra.mxu0 %v3433_v48  ;;  %3470 = vmatpush.bf16.msra.mxu2 %v3433_v48 }
 0x8eb   : > { %v2463_v22 = vmul.f32 %v2462_v50, %v4632_v47  ;;  %v2488_v7 = vmul.f32 2.1237322e-06, %v4649_v6  ;;  %v2499_v25 = vmul.f32 3.8918573e-05, %v4649_v6  ;;  %v2452_v17 = vmul.f32 %v2451_v31, %v4632_v47 }
 0x8ed   : > { %v2464_v26 = vadd.f32 0.112945676, %v2463_v22  ;;  %v2489_v39 = vadd.f32 0.00028619796, %v2488_v7  ;;  %v2500_v29 = vadd.f32 0.001143296, %v2499_v25 }
 0x8ee   : > { %v2453_v14 = vadd.f32 0.05243302, %v2452_v17  ;;  %2857 = vmatpush.bf16.msra.mxu0 %v3432_v42  ;;  %3471 = vmatpush.bf16.msra.mxu2 %v3432_v42 }
 0x8ef   : > { %v2465_v41 = vmul.f32 %v2464_v26, %v4632_v47  ;;  %v2490_v55 = vmul.f32 %v2489_v39, %v4649_v6  ;;  %v2501_v44 = vmul.f32 %v2500_v29, %v4649_v6 }
 0x8f0   : > { %v2454_v58 = vmul.f32 %v2453_v14, %v4632_v47 }
 0x8f1   : > { %v2466_v51 = vadd.f32 0.4994258, %v2465_v41  ;;  %v2491_v61 = vadd.f32 0.0036580483, %v2490_v55  ;;  %v2502_v27 = vadd.f32 0.014752088, %v2501_v44 }
 0x8f2   : > { %v2415_v30 = vpop.f32.mrf.mxu0  ;;  %v2455_v38 = vadd.f32 0.18741608, %v2454_v58 }
 0x8f3   : > { %v2467_v32 = vmul.f32 %v2466_v51, %v4632_v47  ;;  %v4662_v21 = vadd.f32 %v4621_v43, %v2415_v30  ;;  %v2503_v49 = vmul.f32 %v2502_v27, %v4649_v6  ;;  %v2492_v35 = vmul.f32 %v2491_v61, %v4649_v6 }
 0x8f4   : > { %v2456_v19 = vmul.f32 %v2455_v38, %v4632_v47 }
 0x8f5   : > { %v2468_v20 = vadd.f32 1.0, %v2467_v32  ;;  %v4667_v46 = vmul.f32 0.70710677, %v4662_v21  ;;  %v2504_v56 = vadd.f32 0.112945676, %v2503_v49 }
 0x8f6   : > { %v2493_v45 = vadd.f32 0.05243302, %v2492_v35  ;;  %v2457_v17 = vadd.f32 1.1283791, %v2456_v19 }
 0x8f7   : > { %3645 = vrcp.f32 %v2468_v20  ;;  %v2505_v52 = vmul.f32 %v2504_v56, %v4649_v6  ;;  %v2526_v57 = vmul.f32 %v4667_v46, %v4667_v46  ;;  %v2480_v31 = vand.u32 2147483648, %v2468_v20 }
 0x8f8   : > { %v2494_v60 = vmul.f32 %v2493_v45, %v4649_v6  ;;  %v2478_v34 = vand.u32 2147483647, %v2468_v20  ;;  %vm2474_vm6 = vweird.f32 %v2468_v20 }
 0x8f9   : > { %v2506_v63 = vadd.f32 0.4994258, %v2505_v52  ;;  %v4675_v0 = vmin.f32 %v2526_v57, 16.0  ;;  %v2481_v27 = vor.u32 1.1754944e-38, %v2480_v31  ;;  %v2458_v52 = vmul.f32 %v2457_v17, %v4627_v13 }
 0x8fa   : > { %v2417_v3 = vpop.f32.mrf.mxu0  ;;  %v2495_v22 = vadd.f32 0.18741608, %v2494_v60  ;;  %vm2479_vm8 = vcmp.eq.f32.partialorder %v2478_v34, 8.507059e+37 }
 0x8fb   : > { %v4678_v2 = vadd.f32 %v4621_v43, %v2417_v3  ;;  %v2507_v54 = vmul.f32 %v2506_v63, %v4649_v6  ;;  %v2528_v53 = vmul.f32 2.1237322e-06, %v4675_v0  ;;  %v2539_v4 = vmul.f32 3.8918573e-05, %v4675_v0 }
 0x8fc   : > { %v2496_v47 = vmul.f32 %v2495_v22, %v4649_v6 }
 0x8fd   : > { %v3646_v33 = vpop.eup %3645  ;;  %v4685_v11 = vmul.f32 0.70710677, %v4678_v2  ;;  %v2508_v15 = vadd.f32 1.0, %v2507_v54  ;;  %v2529_v59 = vadd.f32 0.00028619796, %v2528_v53 }
 0x8fe   : > { %v2470_v12 = vmul.f32 %v3646_v33, %v2468_v20  ;;  %v2540_v1 = vadd.f32 0.001143296, %v2539_v4  ;;  %vm2475_vm5 = vweird.f32 %v3646_v33  ;;  %v2497_v57 = vadd.f32 1.1283791, %v2496_v47 }
 0x8ff   : > { %v2566_v9 = vmul.f32 %v4685_v11, %v4685_v11  ;;  %3647 = vrcp.f32 %v2508_v15  ;;  %v2530_v39 = vmul.f32 %v2529_v59, %v4675_v0  ;;  %vm2476_vm7 = vmor %vm2474_vm6, %vm2475_vm5  ;;  %v2518_v58 = vand.u32 2147483647, %v2508_v15 }
 0x900   : > { %v2471_v50 = vsub.f32 1.0, %v2470_v12  ;;  %v2541_v7 = vmul.f32 %v2540_v1, %v4675_v0  ;;  %v2520_v45 = vand.u32 2147483648, %v2508_v15  ;;  %vm2514_vm10 = vweird.f32 %v2508_v15 }
 0x901   : > { %v4691_v26 = vmin.f32 %v2566_v9, 16.0  ;;  %v2531_v14 = vadd.f32 0.0036580483, %v2530_v39  ;;  %v2498_v13 = vmul.f32 %v2497_v57, %v4642_v8  ;;  %vm2519_vm12 = vcmp.eq.f32.partialorder %v2518_v58, 8.507059e+37 }
 0x902   : > { %v2472_v25 = vmul.f32 %v3646_v33, %v2471_v50  ;;  %v2542_v29 = vadd.f32 0.014752088, %v2541_v7  ;;  %v2521_v12 = vor.u32 1.1754944e-38, %v2520_v45 }
 0x903   : > { %v2568_v55 = vmul.f32 2.1237322e-06, %v4691_v26  ;;  %v2579_v44 = vmul.f32 3.8918573e-05, %v4691_v26  ;;  %v2532_v53 = vmul.f32 %v2531_v14, %v4675_v0 }
 0x904   : > { %v2473_v41 = vadd.f32 %v3646_v33, %v2472_v25  ;;  %v2543_v51 = vmul.f32 %v2542_v29, %v4675_v0 }
 0x905   : > { %v3648_v23 = vpop.eup %3647  ;;  %v2569_v30 = vadd.f32 0.00028619796, %v2568_v55  ;;  %v2580_v32 = vadd.f32 0.001143296, %v2579_v44  ;;  %v2533_v19 = vadd.f32 0.05243302, %v2532_v53 }
 0x906   : > { %v2477_v61 = vsel %vm2476_vm7, %v3646_v33, %v2473_v41  ;;  %v2510_v49 = vmul.f32 %v3648_v23, %v2508_v15  ;;  %v2544_v20 = vadd.f32 0.112945676, %v2543_v51  ;;  %vm2515_vm9 = vweird.f32 %v3648_v23 }
 0x907   : > { %v2482_v35 = vsel %vm2479_vm8, %v2481_v27, %v2477_v61  ;;  %v2570_v56 = vmul.f32 %v2569_v30, %v4691_v26  ;;  %v2581_v48 = vmul.f32 %v2580_v32, %v4691_v26  ;;  %vm2516_vm11 = vmor %vm2514_vm10, %vm2515_vm9  ;;  %v2534_v8 = vmul.f32 %v2533_v19, %v4675_v0 }
 0x908   : > { %v2511_v6 = vsub.f32 1.0, %v2510_v49  ;;  %v2545_v42 = vmul.f32 %v2544_v20, %v4675_v0  ;;  %v2483_v3 = vmul.f32 %v2482_v35, %v2458_v52  ;;  %v2430_v55 = vmul.f32 0.5, %v4624_v37 }
 0x909   : > { %v2582_v63 = vadd.f32 0.014752088, %v2581_v48  ;;  %v2571_v33 = vadd.f32 0.0036580483, %v2570_v56  ;;  %v2431_v44 = vmul.f32 0.5, %v4638_v10 }
 0x90a   : > { %v2512_v54 = vmul.f32 %v3648_v23, %v2511_v6  ;;  %v2546_v4 = vadd.f32 0.4994258, %v2545_v42  ;;  %v3325_v9 = vclamps-f32 %v2483_v3, 1.0  ;;  %v2535_v61 = vadd.f32 0.18741608, %v2534_v8 }
 0x90b   : > { %v2583_v38 = vmul.f32 %v2582_v63, %v4691_v26  ;;  %v2572_v25 = vmul.f32 %v2571_v33, %v4691_v26 }
 0x90c   : > { %v2513_v60 = vadd.f32 %v3648_v23, %v2512_v54  ;;  %v2547_v59 = vmul.f32 %v2546_v4, %v4675_v0  ;;  %v2766_v15 = vadd.f32 1.0, %v3325_v9  ;;  %v2536_v35 = vmul.f32 %v2535_v61, %v4675_v0 }
 0x90d   : > { %v2584_v1 = vadd.f32 0.112945676, %v2583_v38  ;;  %v2573_v41 = vadd.f32 0.05243302, %v2572_v25 }
 0x90e   : > { %v2517_v50 = vsel %vm2516_vm11, %v3648_v23, %v2513_v60  ;;  %v2548_v7 = vadd.f32 1.0, %v2547_v59  ;;  %v2774_v51 = vmul.f32 %v2766_v15, %v2430_v55  ;;  %v2537_v52 = vadd.f32 1.1283791, %v2536_v35 }
 0x90f   : > { %v2522_v22 = vsel %vm2519_vm12, %v2521_v12, %v2517_v50  ;;  %v2585_v31 = vmul.f32 %v2584_v1, %v4691_v26  ;;  %v2574_v32 = vmul.f32 %v2573_v41, %v4691_v26 }
 0x910   : > { %v2523_v34 = vmul.f32 %v2522_v22, %v2498_v13  ;;  %3649 = vrcp.f32 %v2548_v7  ;;  %v2560_v37 = vand.u32 2147483648, %v2548_v7  ;;  %v2558_v48 = vand.u32 2147483647, %v2548_v7 }
 0x911   : > { %v2586_v29 = vadd.f32 0.4994258, %v2585_v31  ;;  %v2575_v56 = vadd.f32 0.18741608, %v2574_v32  ;;  %vm2554_vm14 = vweird.f32 %v2548_v7  ;;  %v2538_v0 = vmul.f32 %v2537_v52, %v4667_v46 }
 0x912   : > { %v3326_v39 = vclamps-f32 %v2523_v34, 1.0  ;;  %v2561_v58 = vor.u32 1.1754944e-38, %v2560_v37  ;;  %vm2559_vm0 = vcmp.eq.f32.partialorder %v2558_v48, 8.507059e+37  ;;  %v2432_v22 = vmul.f32 0.5, %v4662_v21 }
 0x913   : > { %v2587_v47 = vmul.f32 %v2586_v29, %v4691_v26  ;;  %v2576_v45 = vmul.f32 %v2575_v56, %v4691_v26 }
 0x914   : > { %v2767_v17 = vadd.f32 1.0, %v3326_v39 }
 0x915   : > { %v2588_v27 = vadd.f32 1.0, %v2587_v47  ;;  %v2577_v53 = vadd.f32 1.1283791, %v2576_v45 }
 0x916   : > { %v2775_v23 = vmul.f32 %v2767_v17, %v2431_v44  ;;  %v3650_v30 = vpop.eup %3649 }
 0x917   : > { %v2550_v14 = vmul.f32 %v3650_v30, %v2548_v7  ;;  %3651 = vrcp.f32 %v2588_v27  ;;  %vm2555_vm13 = vweird.f32 %v3650_v30  ;;  %v2600_v4 = vand.u32 2147483648, %v2588_v27 }
 0x918   : > { %v2782_v49 = vpack.c.bf16 %v2775_v23, %v2774_v51  ;;  %vm2556_vm15 = vmor %vm2554_vm14, %vm2555_vm13  ;;  %v2598_v60 = vand.u32 2147483647, %v2588_v27  ;;  %vm2594_vm2 = vweird.f32 %v2588_v27  ;;  %v2578_v26 = vmul.f32 %v2577_v53, %v4685_v11 }
 0x919   : > { %v2551_v20 = vsub.f32 1.0, %v2550_v14  ;;  %v2601_v12 = vor.u32 1.1754944e-38, %v2600_v4  ;;  %v2433_v7 = vmul.f32 0.5, %v4678_v2 }
 0x91a   : > { %2858 = vmatmul.bf16.vlgmr.msra.gmra.mxu0 %v2782_v49  ;;  %vm2599_vm4 = vcmp.eq.f32.partialorder %v2598_v60, 8.507059e+37 }
 0x91b   : > { %v2552_v10 = vmul.f32 %v3650_v30, %v2551_v20 }
 0x91d   : > { %v2553_v57 = vadd.f32 %v3650_v30, %v2552_v10  ;;  %v3652_v6 = vpop.eup %3651 }
 0x91e   : > { %v2590_v63 = vmul.f32 %v3652_v6, %v2588_v27  ;;  %vm2595_vm1 = vweird.f32 %v3652_v6 }
 0x91f   : > { %v2557_v42 = vsel %vm2556_vm15, %v3650_v30, %v2553_v57  ;;  %vm2596_vm3 = vmor %vm2594_vm2, %vm2595_vm1 }
 0x920   : > { %v2562_v3 = vsel %vm2559_vm0, %v2561_v58, %v2557_v42  ;;  %v2591_v54 = vsub.f32 1.0, %v2590_v63 }
 0x921   : > { %v2563_v33 = vmul.f32 %v2562_v3, %v2538_v0 }
 0x922   : > { %v2592_v38 = vmul.f32 %v3652_v6, %v2591_v54 }
 0x923   : > { %v3327_v59 = vclamps-f32 %v2563_v33, 1.0 }
 0x924   : > { %v2593_v13 = vadd.f32 %v3652_v6, %v2592_v38 }
 0x925   : > { %v2768_v19 = vadd.f32 1.0, %v3327_v59 }
 0x926   : > { %v2597_v1 = vsel %vm2596_vm3, %v3652_v6, %v2593_v13 }
 0x927   : > { %v2602_v9 = vsel %vm2599_vm4, %v2601_v12, %v2597_v1  ;;  %v2776_v31 = vmul.f32 %v2768_v19, %v2432_v22 }
 0x928   : > { %v2603_v50 = vmul.f32 %v2602_v9, %v2578_v26 }
 0x92a   : > { %v3328_v46 = vclamps-f32 %v2603_v50, 1.0 }
 0x92c   : > { %v2769_v25 = vadd.f32 1.0, %v3328_v46 }
 0x92e   : > { %v2777_v34 = vmul.f32 %v2769_v25, %v2433_v7 }
 0x930   : > { %v2783_v15 = vpack.c.bf16 %v2777_v34, %v2776_v31 }
 0x932   : > { %2863 = vmatmul.bf16.vlgmr.msra.gmra.mxu2 %v2783_v15 }
 0x934   : > { %v2420_v39 = vpop.f32.mrf.mxu0 }
 0x935   : > { %v4720_v8 = vadd.f32 %v4621_v43, %v2420_v39 }
 0x937   : > { %v4723_v11 = vmul.f32 0.70710677, %v4720_v8 }
 0x939   : > { %v2606_v29 = vmul.f32 %v4723_v11, %v4723_v11 }
 0x93b   : > { %v2607_v41 = vmin.f32 %v2606_v29, 16.0 }
 0x93c   : > { %v2422_v55 = vpop.f32.mrf.mxu0 }
 0x93d   : > { %v2608_v21 = vmul.f32 2.1237322e-06, %v2607_v41  ;;  %v4728_v2 = vadd.f32 %v4621_v43, %v2422_v55  ;;  %v2619_v44 = vmul.f32 3.8918573e-05, %v2607_v41 }
 0x93f   : > { %v2609_v17 = vadd.f32 0.00028619796, %v2608_v21  ;;  %v4731_v47 = vmul.f32 0.70710677, %v4728_v2  ;;  %v2620_v51 = vadd.f32 0.001143296, %v2619_v44 }
 0x941   : > { %v2646_v23 = vmul.f32 %v4731_v47, %v4731_v47  ;;  %v2621_v61 = vmul.f32 %v2620_v51, %v2607_v41  ;;  %v2610_v27 = vmul.f32 %v2609_v17, %v2607_v41 }
 0x943   : > { %v2647_v30 = vmin.f32 %v2646_v23, 16.0  ;;  %v2622_v32 = vadd.f32 0.014752088, %v2621_v61  ;;  %v2611_v20 = vadd.f32 0.0036580483, %v2610_v27 }
 0x945   : > { %v2648_v49 = vmul.f32 2.1237322e-06, %v2647_v30  ;;  %v2659_v14 = vmul.f32 3.8918573e-05, %v2647_v30  ;;  %v2623_v35 = vmul.f32 %v2622_v32, %v2607_v41  ;;  %v2612_v6 = vmul.f32 %v2611_v20, %v2607_v41 }
 0x947   : > { %v2649_v37 = vadd.f32 0.00028619796, %v2648_v49  ;;  %v2660_v56 = vadd.f32 0.001143296, %v2659_v14  ;;  %v2624_v10 = vadd.f32 0.112945676, %v2623_v35 }
 0x948   : > { %v2613_v0 = vadd.f32 0.05243302, %v2612_v6 }
 0x949   : > { %v2650_v48 = vmul.f32 %v2649_v37, %v2647_v30  ;;  %v2661_v52 = vmul.f32 %v2660_v56, %v2647_v30  ;;  %v2625_v57 = vmul.f32 %v2624_v10, %v2607_v41 }
 0x94a   : > { %v2614_v38 = vmul.f32 %v2613_v0, %v2607_v41 }
 0x94b   : > { %v2662_v58 = vadd.f32 0.014752088, %v2661_v52  ;;  %v2651_v45 = vadd.f32 0.0036580483, %v2650_v48  ;;  %v2626_v42 = vadd.f32 0.4994258, %v2625_v57 }
 0x94c   : > { %v2615_v1 = vadd.f32 0.18741608, %v2614_v38 }
 0x94d   : > { %v2663_v63 = vmul.f32 %v2662_v58, %v2647_v30  ;;  %v2627_v3 = vmul.f32 %v2626_v42, %v2607_v41  ;;  %v2652_v53 = vmul.f32 %v2651_v45, %v2647_v30 }
 0x94e   : > { %v2616_v25 = vmul.f32 %v2615_v1, %v2607_v41 }
 0x94f   : > { %v2664_v54 = vadd.f32 0.112945676, %v2663_v63  ;;  %v2628_v4 = vadd.f32 1.0, %v2627_v3  ;;  %v2653_v13 = vadd.f32 0.05243302, %v2652_v53 }
 0x950   : > { %v2617_v23 = vadd.f32 1.1283791, %v2616_v25 }
 0x951   : > { %v2665_v33 = vmul.f32 %v2664_v54, %v2647_v30  ;;  %3653 = vrcp.f32 %v2628_v4  ;;  %v2654_v46 = vmul.f32 %v2653_v13, %v2647_v30  ;;  %v2638_v29 = vand.u32 2147483647, %v2628_v4 }
 0x952   : > { %v2640_v55 = vand.u32 2147483648, %v2628_v4  ;;  %vm2634_vm6 = vweird.f32 %v2628_v4  ;;  %v2618_v48 = vmul.f32 %v2617_v23, %v4723_v11 }
 0x953   : > { %v2666_v60 = vadd.f32 0.4994258, %v2665_v33  ;;  %v2655_v15 = vadd.f32 0.18741608, %v2654_v46  ;;  %vm2639_vm8 = vcmp.eq.f32.partialorder %v2638_v29, 8.507059e+37 }
 0x954   : > { %v2425_v12 = vpop.f32.mrf.mxu0  ;;  %v2641_v14 = vor.u32 1.1754944e-38, %v2640_v55 }
 0x955   : > { %v4736_v59 = vadd.f32 %v4621_v43, %v2425_v12  ;;  %v2667_v26 = vmul.f32 %v2666_v60, %v2647_v30  ;;  %v2656_v32 = vmul.f32 %v2655_v15, %v2647_v30 }
 0x957   : > { %v4739_v9 = vmul.f32 0.70710677, %v4736_v59  ;;  %v2668_v50 = vadd.f32 1.0, %v2667_v26  ;;  %v3654_v19 = vpop.eup %3653  ;;  %v2657_v30 = vadd.f32 1.1283791, %v2656_v32 }
 0x958   : > { %v2630_v7 = vmul.f32 %v3654_v19, %v2628_v4  ;;  %vm2635_vm5 = vweird.f32 %v3654_v19 }
 0x959   : > { %v2686_v22 = vmul.f32 %v4739_v9, %v4739_v9  ;;  %3655 = vrcp.f32 %v2668_v50  ;;  %vm2636_vm7 = vmor %vm2634_vm6, %vm2635_vm5  ;;  %v2680_v6 = vand.u32 2147483648, %v2668_v50  ;;  %v2678_v45 = vand.u32 2147483647, %v2668_v50 }
 0x95a   : > { %v2631_v34 = vsub.f32 1.0, %v2630_v7  ;;  %vm2674_vm10 = vweird.f32 %v2668_v50  ;;  %v2658_v38 = vmul.f32 %v2657_v30, %v4731_v47 }
 0x95b   : > { %v4743_v31 = vmin.f32 %v2686_v22, 16.0  ;;  %v2681_v33 = vor.u32 1.1754944e-38, %v2680_v6  ;;  %vm2679_vm12 = vcmp.eq.f32.partialorder %v2678_v45, 8.507059e+37 }
 0x95c   : > { %v2427_v39 = vpop.f32.mrf.mxu0  ;;  %v2632_v17 = vmul.f32 %v3654_v19, %v2631_v34 }
 0x95d   : > { %v2688_v21 = vmul.f32 2.1237322e-06, %v4743_v31  ;;  %v4747_v44 = vadd.f32 %v4621_v43, %v2427_v39  ;;  %v2699_v51 = vmul.f32 3.8918573e-05, %v4743_v31 }
 0x95e   : > { %v2633_v41 = vadd.f32 %v3654_v19, %v2632_v17  ;;  %v2434_v17 = vmul.f32 0.5, %v4720_v8 }
 0x95f   : > { %v4751_v61 = vmul.f32 0.70710677, %v4747_v44  ;;  %v3656_v27 = vpop.eup %3655  ;;  %v2689_v49 = vadd.f32 0.00028619796, %v2688_v21  ;;  %v2700_v35 = vadd.f32 0.001143296, %v2699_v51 }
 0x960   : > { %v2637_v43 = vsel %vm2636_vm7, %v3654_v19, %v2633_v41  ;;  %v2670_v37 = vmul.f32 %v3656_v27, %v2668_v50  ;;  %vm2675_vm9 = vweird.f32 %v3656_v27  ;;  %v2435_v51 = vmul.f32 0.5, %v4728_v2 }
 0x961   : > { %v2726_v20 = vmul.f32 %v4751_v61, %v4751_v61  ;;  %v2642_v56 = vsel %vm2639_vm8, %v2641_v14, %v2637_v43  ;;  %v2701_v10 = vmul.f32 %v2700_v35, %v4743_v31  ;;  %v2690_v58 = vmul.f32 %v2689_v49, %v4743_v31  ;;  %vm2676_vm11 = vmor %vm2674_vm10, %vm2675_vm9 }
 0x962   : > { %v2671_v57 = vsub.f32 1.0, %v2670_v37  ;;  %v2643_v3 = vmul.f32 %v2642_v56, %v2618_v48 }
 0x963   : > { %v4757_v52 = vmin.f32 %v2726_v20, 16.0  ;;  %v2702_v42 = vadd.f32 0.014752088, %v2701_v10  ;;  %v2691_v60 = vadd.f32 0.0036580483, %v2690_v58 }
 0x964   : > { %v2672_v0 = vmul.f32 %v3656_v27, %v2671_v57  ;;  %v3329_v1 = vclamps-f32 %v2643_v3, 1.0 }
 0x965   : > { %v2728_v63 = vmul.f32 2.1237322e-06, %v4757_v52  ;;  %v2703_v54 = vmul.f32 %v2702_v42, %v4743_v31  ;;  %v2739_v53 = vmul.f32 3.8918573e-05, %v4757_v52  ;;  %v2692_v50 = vmul.f32 %v2691_v60, %v4743_v31 }
 0x966   : > { %v2673_v11 = vadd.f32 %v3656_v27, %v2672_v0  ;;  %v2770_v29 = vadd.f32 1.0, %v3329_v1 }
 0x967   : > { %v2729_v4 = vadd.f32 0.00028619796, %v2728_v63  ;;  %v2704_v13 = vadd.f32 0.112945676, %v2703_v54  ;;  %v2740_v12 = vadd.f32 0.001143296, %v2739_v53 }
 0x968   : > { %v2677_v19 = vsel %vm2676_vm11, %v3656_v27, %v2673_v11  ;;  %v2693_v41 = vadd.f32 0.05243302, %v2692_v50  ;;  %v2778_v14 = vmul.f32 %v2770_v29, %v2434_v17  ;;  %v2436_v29 = vmul.f32 0.5, %v4736_v59 }
 0x969   : > { %v2730_v26 = vmul.f32 %v2729_v4, %v4757_v52  ;;  %v2682_v46 = vsel %vm2679_vm12, %v2681_v33, %v2677_v19  ;;  %v2705_v22 = vmul.f32 %v2704_v13, %v4743_v31  ;;  %v2741_v7 = vmul.f32 %v2740_v12, %v4757_v52 }
 0x96a   : > { %v2683_v25 = vmul.f32 %v2682_v46, %v2658_v38  ;;  %v2694_v37 = vmul.f32 %v2693_v41, %v4743_v31 }
 0x96b   : > { %v2706_v34 = vadd.f32 0.4994258, %v2705_v22  ;;  %v2742_v15 = vadd.f32 0.014752088, %v2741_v7  ;;  %v2731_v47 = vadd.f32 0.0036580483, %v2730_v26 }
 0x96c   : > { %v3330_v39 = vclamps-f32 %v2683_v25, 1.0  ;;  %v2695_v48 = vadd.f32 0.18741608, %v2694_v37 }
 0x96d   : > { %v2707_v55 = vmul.f32 %v2706_v34, %v4743_v31  ;;  %v2743_v21 = vmul.f32 %v2742_v15, %v4757_v52  ;;  %v2732_v49 = vmul.f32 %v2731_v47, %v4757_v52 }
 0x96e   : > { %v2771_v23 = vadd.f32 1.0, %v3330_v39  ;;  %v2696_v45 = vmul.f32 %v2695_v48, %v4743_v31 }
 0x96f   : > { %v2708_v27 = vadd.f32 1.0, %v2707_v55  ;;  %v2744_v32 = vadd.f32 0.112945676, %v2743_v21  ;;  %v2733_v56 = vadd.f32 0.05243302, %v2732_v49  ;;  %v2437_v55 = vmul.f32 0.5, %v4747_v44 }
 0x970   : > { %v2779_v35 = vmul.f32 %v2771_v23, %v2435_v51  ;;  %v2697_v53 = vadd.f32 1.1283791, %v2696_v45 }
 0x971   : > { %3657 = vrcp.f32 %v2708_v27  ;;  %v2745_v43 = vmul.f32 %v2744_v32, %v4757_v52  ;;  %v2734_v57 = vmul.f32 %v2733_v56, %v4757_v52  ;;  %v2720_v3 = vand.u32 2147483648, %v2708_v27 }
 0x972   : > { %v2784_v20 = vpack.c.bf16 %v2779_v35, %v2778_v14  ;;  %v2718_v0 = vand.u32 2147483647, %v2708_v27  ;;  %vm2714_vm14 = vweird.f32 %v2708_v27  ;;  %v2698_v12 = vmul.f32 %v2697_v53, %v4739_v9 }
 0x973   : > { %v2746_v10 = vadd.f32 0.4994258, %v2745_v43  ;;  %v2735_v42 = vadd.f32 0.18741608, %v2734_v57  ;;  %v2721_v38 = vor.u32 1.1754944e-38, %v2720_v3 }
 0x974   : > { %2868 = vmatmul.bf16.gmra.mxu2 %v2784_v20  ;;  %vm2719_vm0 = vcmp.eq.f32.partialorder %v2718_v0, 8.507059e+37 }
 0x975   : > { %v2747_v8 = vmul.f32 %v2746_v10, %v4757_v52  ;;  %v2736_v11 = vmul.f32 %v2735_v42, %v4757_v52 }
 0x977   : > { %v3658_v2 = vpop.eup %3657  ;;  %v2748_v30 = vadd.f32 1.0, %v2747_v8  ;;  %v2737_v26 = vadd.f32 1.1283791, %v2736_v11 }
 0x978   : > { %v2710_v6 = vmul.f32 %v3658_v2, %v2708_v27  ;;  %vm2715_vm13 = vweird.f32 %v3658_v2 }
 0x979   : > { %3659 = vrcp.f32 %v2748_v30  ;;  %vm2716_vm15 = vmor %vm2714_vm14, %vm2715_vm13  ;;  %v2760_v1 = vand.u32 2147483648, %v2748_v30  ;;  %v2758_v22 = vand.u32 2147483647, %v2748_v30  ;;  %vm2754_vm2 = vweird.f32 %v2748_v30 }
 0x97a   : > { %v2711_v58 = vsub.f32 1.0, %v2710_v6  ;;  %v2738_v52 = vmul.f32 %v2737_v26, %v4751_v61  ;;  %v3580_v61 = vld [vmem:[%s4929_s4] ss:$0 sm:$0xff] }
 0x97b   : > { %v2761_v25 = vor.u32 1.1754944e-38, %v2760_v1  ;;  %vm2759_vm4 = vcmp.eq.f32.partialorder %v2758_v22, 8.507059e+37 }
 0x97c   : > { %v2712_v63 = vmul.f32 %v3658_v2, %v2711_v58 }
 0x97e   : > { %v2713_v54 = vadd.f32 %v3658_v2, %v2712_v63 }
 0x97f   : > { %v3660_v4 = vpop.eup %3659 }
 0x980   : > { %v2717_v33 = vsel %vm2716_vm15, %v3658_v2, %v2713_v54  ;;  %v2750_v60 = vmul.f32 %v3660_v4, %v2748_v30  ;;  %vm2755_vm1 = vweird.f32 %v3660_v4 }
 0x981   : > { %v2722_v13 = vsel %vm2719_vm0, %v2721_v38, %v2717_v33  ;;  %vm2756_vm3 = vmor %vm2754_vm2, %vm2755_vm1 }
 0x982   : > { %v2751_v31 = vsub.f32 1.0, %v2750_v60  ;;  %v2723_v19 = vmul.f32 %v2722_v13, %v2698_v12 }
 0x984   : > { %v2752_v46 = vmul.f32 %v3660_v4, %v2751_v31  ;;  %v3331_v50 = vclamps-f32 %v2723_v19, 1.0 }
 0x986   : > { %v2753_v7 = vadd.f32 %v3660_v4, %v2752_v46  ;;  %v2772_v39 = vadd.f32 1.0, %v3331_v50 }
 0x988   : > { %v2757_v34 = vsel %vm2756_vm3, %v3660_v4, %v2753_v7  ;;  %v2780_v17 = vmul.f32 %v2772_v39, %v2436_v29 }
 0x989   : > { %v2762_v15 = vsel %vm2759_vm4, %v2761_v25, %v2757_v34 }
 0x98a   : > { %v2763_v47 = vmul.f32 %v2762_v15, %v2738_v52 }
 0x98c   : > { %v3332_v9 = vclamps-f32 %v2763_v47, 1.0 }
 0x98e   : > { %v2773_v21 = vadd.f32 1.0, %v3332_v9 }
 0x990   : > { %v2781_v51 = vmul.f32 %v2773_v21, %v2437_v55 }
 0x992   : > { %v2785_v23 = vpack.c.bf16 %v2781_v51, %v2780_v17 }
 0x994   : > { %2873 = vmatmul.bf16.gmra.mxu2 %v2785_v23 }
 0x997   : > { %v2859_v41 = vpop.f32.mrf.mxu0 }
 0x998   : > { %v2879_v27 = vadd.f32 %v2859_v41, %v4481_v62 }
 0x99a   : > { %v2891_v32 = vadd.f32 %v3580_v61, %v2879_v27 }
 0x99c   : > { %2899 = vst [vmem:[#allocation2 + $0x30] sm:$0xff] %v2891_v32 }
 0x99d   : > { %2907 = vst [vmem:[%s4883_s22] sm:$0xff] %v2891_v32 }
 0x99f   : > { %v2861_v59 = vpop.f32.mrf.mxu0 }
 0x9a0   : > { %v2880_v44 = vadd.f32 %v2861_v59, %v4484_v28 }
 0x9a2   : > { %v2892_v49 = vadd.f32 %v3580_v61, %v2880_v44 }
 0x9a4   : > { %2900 = vst [vmem:[#allocation2] sm:$0xff] %v2892_v49 }
 0x9a5   : > { %2908 = vst [vmem:[%s4883_s22 + $0x8] sm:$0xff] %v2892_v49 }
 0x9b5   : > { %v2864_v14 = vpop.f32.mrf.mxu2 }
 0x9b6   : > { %v2881_v35 = vadd.f32 %v2864_v14, %v4487_v18 }
 0x9b8   : > { %v2893_v20 = vadd.f32 %v3580_v61, %v2881_v35 }
 0x9ba   : > { %2901 = vst [vmem:[#allocation2 + $0x18] sm:$0xff] %v2893_v20 }
 0x9bb   : > { %2909 = vst [vmem:[%s4883_s22 + $0x10] sm:$0xff] %v2893_v20 }
 0x9bd   : > { %v2866_v62 = vpop.f32.mrf.mxu2 }
 0x9be   : > { %v2882_v43 = vadd.f32 %v2866_v62, %v4490_v24 }
 0x9c0   : > { %v2894_v37 = vadd.f32 %v3580_v61, %v2882_v43 }
 0x9c2   : > { %2902 = vst [vmem:[#allocation2 + $0x10] sm:$0xff] %v2894_v37 }
 0x9c3   : > { %2910 = vst [vmem:[%s4883_s22 + $0x18] sm:$0xff] %v2894_v37 }
 0x9f7   : > { %v2869_v28 = vpop.f32.mrf.mxu2 }
 0x9f8   : > { %v2883_v56 = vadd.f32 %v2869_v28, %v4493_v5 }
 0x9fa   : > { %v2895_v10 = vadd.f32 %v3580_v61, %v2883_v56 }
 0x9fc   : > { %2903 = vst [vmem:[#allocation2 + $0x8] sm:$0xff] %v2895_v10 }
 0x9fd   : > { %2911 = vst [vmem:[%s4883_s22 + $0x20] sm:$0xff] %v2895_v10 }
 0x9ff   : > { %v2871_v18 = vpop.f32.mrf.mxu2 }
 0xa00   : > { %v2884_v8 = vadd.f32 %v2871_v18, %v4496_v16 }
 0xa02   : > { %v2896_v2 = vadd.f32 %v3580_v61, %v2884_v8 }
 0xa04   : > { %2904 = vst [vmem:[#allocation2 + $0x20] sm:$0xff] %v2896_v2 }
 0xa05   : > { %2912 = vst [vmem:[%s4883_s22 + $0x28] sm:$0xff] %v2896_v2 }
 0xa17   : > { %v2874_v24 = vpop.f32.mrf.mxu2 }
 0xa18   : > { %v2885_v48 = vadd.f32 %v2874_v24, %v4499_v40 }
 0xa1a   : > { %v2897_v57 = vadd.f32 %v3580_v61, %v2885_v48 }
 0xa1c   : > { %2905 = vst [vmem:[#allocation2 + $0x28] sm:$0xff] %v2897_v57 }
 0xa1d   : > { %2913 = vst [vmem:[%s4883_s22 + $0x30] sm:$0xff] %v2897_v57 }
 0xa1f   : > { %v2876_v5 = vpop.f32.mrf.mxu2 }
 0xa20   : > { %v2886_v6 = vadd.f32 %v2876_v5, %v4510_v36 }
 0xa21   : > { %2918 = sbr.rel (%p3365_p5) target bundleno = 3007 (0xbbf), region = 116 }
 0xa22   : > { %v2898_v30 = vadd.f32 %v3580_v61, %v2886_v6 }
 0xa24   : > { %2906 = vst [vmem:[#allocation2 + $0x38] sm:$0xff] %v2898_v30 }
 0xa25   : > { %2914 = vst [vmem:[%s4883_s22 + $0x38] sm:$0xff] %v2898_v30 }
 0xa26   : > { %v2920_v16 = vrot.slane %v2895_v10, 7  ;;  %vm2922_vm5 = vcmask 1040384   ;;  %vm2926_vm6 = vcmask 1041408   ;;  %v3447_v0 = vld [vmem:[%s4881_s20 + $0x38] sm:$0xff]  ;;  %v3446_v54 = vld [vmem:[%s4881_s20 + $0x30] sm:$0xff]  ;;  %v3445_v53 = vld [vmem:[%s4881_s20 + $0x28] sm:$0xff] }
 0xa27   : > { %3029 = vmatpush.bf16.msra.mxu0 %v3447_v0  ;;  %v3444_v4 = vld [vmem:[%s4881_s20 + $0x20] sm:$0xff]  ;;  %v3443_v11 = vld [vmem:[%s4881_s20 + $0x18] sm:$0xff]  ;;  %v3442_v33 = vld [vmem:[%s4881_s20 + $0x10] sm:$0xff] }
 0xa28   : > { %v2923_v40 = vsel %vm2922_vm5, %v2891_v32, %v2920_v16  ;;  %v3441_v38 = vld [vmem:[%s4881_s20 + $0x8] sm:$0xff]  ;;  %v3440_v60 = vld [vmem:[%s4881_s20] sm:$0xff] }
 0xa29   : > { %v2927_v58 = vsel %vm2926_vm6, %v2923_v40, 0.0  ;;  %v3669_v34 = vld [vmem:[%s4930_s24] ss:$0 sm:$0xff] }
 0xa2a   : > { %2928 = vadd.xlane.f32.xlu0 %v2927_v58  ;;  %v3670_v9 = vld [vmem:[%s4931_s3] ss:$0 sm:$0xff] }
 0xa2b   : > { %3030 = vmatpush.bf16.msra.mxu0 %v3446_v54  ;;  %v3671_v21 = vld [vmem:[%s4932_s6] ss:$0 sm:$0xff] }
 0xa2f   : > { %3031 = vmatpush.bf16.msra.mxu0 %v3445_v53 }
 0xa33   : > { %3032 = vmatpush.bf16.msra.mxu0 %v3444_v4 }
 0xa37   : > { %3033 = vmatpush.bf16.msra.mxu0 %v3443_v11 }
 0xa3b   : > { %3034 = vmatpush.bf16.msra.mxu0 %v3442_v33 }
 0xa3f   : > { %3035 = vmatpush.bf16.msra.mxu0 %v3441_v38 }
 0xa43   : > { %3036 = vmatpush.bf16.msra.mxu0 %v3440_v60 }
 0xa9d   : > { %v2929_v45 = vpop.xlane.xlu0 %2928 }
 0xa9e   : > { %v2930_v42 = vmul.f32 0.03125, %v2929_v45 }
 0xaa0   : > { %v2931_v63 = vsub.f32 %v2923_v40, %v2930_v42  ;;  %v2936_v13 = vmul.f32 %v2930_v42, %v2930_v42 }
 0xaa2   : > { %v2932_v3 = vmul.f32 %v2931_v63, %v2931_v63  ;;  %v2937_v12 = vmul.f32 96.0, %v2936_v13 }
 0xaa4   : > { %v2933_v36 = vsel %vm2926_vm6, %v2932_v3, 0.0 }
 0xaa5   : > { %2934 = vadd.xlane.f32.xlu0 %v2933_v36 }
 0xb18   : > { %v2935_v31 = vpop.xlane.xlu0 %2934 }
 0xb19   : > { %v2938_v26 = vsub.f32 %v2935_v31, %v2937_v12 }
 0xb1b   : > { %v2939_v1 = vmul.f32 0.03125, %v2938_v26 }
 0xb1d   : > { %v2940_v19 = vadd.f32 1e-05, %v2939_v1 }
 0xb1f   : > { %3672 = vrsqrt.f32 %v2940_v19  ;;  %vm2947_vm8 = vweird.f32 %v2940_v19 }
 0xb25   : > { %v3673_v46 = vpop.eup %3672 }
 0xb26   : > { %v2942_v22 = vmul.f32 %v3673_v46, %v2940_v19  ;;  %vm2948_vm7 = vweird.f32 %v3673_v46 }
 0xb27   : > { %vm2949_vm9 = vmor %vm2947_vm8, %vm2948_vm7 }
 0xb28   : > { %v2943_v7 = vmul.f32 %v3673_v46, %v2942_v22 }
 0xb2a   : > { %v2944_v25 = vmul.f32 0.5, %v2943_v7 }
 0xb2c   : > { %v2945_v52 = vsub.f32 1.5, %v2944_v25 }
 0xb2e   : > { %v2946_v50 = vmul.f32 %v3673_v46, %v2945_v52 }
 0xb30   : > { %v2950_v15 = vsel %vm2949_vm9, %v3673_v46, %v2946_v50 }
 0xb31   : > { %v2951_v47 = vmul.f32 %v2950_v15, %v2931_v63 }
 0xb33   : > { %v2955_v39 = vmul.f32 %v3669_v34, %v2951_v47 }
 0xb35   : > { %v2959_v29 = vadd.f32 %v3670_v9, %v2955_v39 }
 0xb37   : > { %v2960_v55 = vpack.c.bf16 %v2959_v29, %v2959_v29 }
 0xb39   : > { %3037 = vmatmul.bf16.vlgmr.msra.gmra.mxu0 %v2960_v55 }
 0xbb6   : > { %v3038_v17 = vpop.f32.mrf.mxu0 }
 0xbb7   : > { %v3039_v51 = vadd.f32 %v3671_v21, %v3038_v17 }
 0xbb9   : > { %3042 = vst [vmem:[#allocation3] sm:$0x3] %v3039_v51 }
 0xbbe   : > { %v3040_v23 = vpop.f32.mrf.mxu0 }
 0xbbf PF: > { %p3476_p6 = scmp.eq.s32.totalorder %s3845_s30, 1  ;;  %s3718_s5 = smov [#allocation3]  }
 0xbc0   : > { %s3052_s23 = sshll.u32 %s3718_s5, 4  ;;  %s4933_s25 = sld [smem:[#allocation20_spill]]  ;;  %s3053_s23 = int_to_ptr.vmem [resolvable:$true] %s3052_s23 }
 0xbc6   : > { %s3054_s27 = sshll.u32 %s4933_s25, 4  ;;  %s3055_s27 = int_to_ptr.hbm [resolvable:$true] %s3054_s27 }
 0xbc7   : > { %3473 = dma.vmem_to_hbm [thread:$0]  (%p3476_p6), %s3053_s23, 32, %s3055_s27, [#allocation4]  }
 0xbc8   : > { %3707 = dma.done.wait (%p3476_p6), [#allocation4], 32  }
 0xbc9   : > { %3709 = vsyncadd (%p3476_p6), [#allocation4], 4294967264 }
 0xbca PF: > { %s4934_s9 = sld [smem:[#allocation6_spill]] }
 0xbd0   : > { %s35_s4 = sadd.s32 1, %s4934_s9  }
 0xbd1   : > { %p32_p7 = scmp.ge.s32.totalorder %s35_s4, 4  }
 0xbd3   :  { %34 = sbr.rel (!%p32_p7) target bundleno = 16 (0x10), region = 181 }
 0xbd8   :  { %3071 = vsyncpa [#allocation4], 1 }
 0xbd9   :  { %3073 = vsyncpa [#allocation4 + $0x1], 1 }

</bundles_post_ra>
